<compile_context>
chip_gen: v5e
topology: v5e:2x2
jax: 0.10.0
libtpu: 0.0.40
codegen_flags: <defaults>
</compile_context>

<pallas_src>
import functools

import jax
import jax.numpy as jnp
from jax import lax
from jax.experimental import pallas as pl
from jax.experimental.pallas import tpu as pltpu


def _silu(y):
    return y * jax.nn.sigmoid(y)


# ---------------------------------------------------------------------------
# Fused GSConv kernel: one grid step = one batch image (NCHW).
#   x_ref  : (1, C1, H*W)        input image, spatial flattened on lanes
#   w1_ref : (C_, C1)            folded 1x1 conv weight
#   b1_ref : (C_, 1)             folded 1x1 conv bias
#   w2_ref : (C_, K, K)          folded depthwise weight
#   b2_ref : (C_, 1, 1)          folded depthwise bias
#   o_ref  : (1, 2*C_, H, W)     shuffled NCHW output block
#   xp_ref : (C_, H+2p, W+2p)    VMEM scratch: zero-padded SiLU(x1)
# ---------------------------------------------------------------------------
def _gsconv_kernel(x_ref, w1_ref, b1_ref, w2_ref, b2_ref, o_ref, xp_ref,
                   *, C_, H, W, K):
    pad = K // 2

    # --- cv1: pointwise conv (+folded BN) + SiLU, lane-dense MXU matmul -----
    x = x_ref[0]                                               # (C1, H*W)
    y = jnp.dot(w1_ref[...], x, preferred_element_type=jnp.float32)
    y = y + b1_ref[...]                                        # (C_, 1) broadcast
    x1 = _silu(y)                                              # (C_, H*W) f32

    # --- stage SiLU(x1) into zero-padded scratch (C_, H+2p, W+2p) -----------
    xp_ref[...] = jnp.zeros((C_, H + 2 * pad, W + 2 * pad), jnp.float32)
    for h in range(H):
        row = x1[:, h * W:(h + 1) * W]                         # (C_, W)
        xp_ref[:, h + pad:h + pad + 1, pad:pad + W] = row[:, None, :]

    # --- cv2: depthwise KxK conv (+folded BN) + SiLU ------------------------
    w2 = w2_ref[...]                                           # (C_, K, K)
    acc = jnp.zeros((C_, H, W), jnp.float32)
    for i in range(K):
        for j in range(K):
            acc = acc + xp_ref[:, i:i + H, j:j + W] * w2[:, i:i + 1, j:j + 1]
    d = _silu(acc + b2_ref[...])                               # (C_, H, W)

    # --- concat + channel shuffle epilogue, written straight to NCHW out ----
    # out[j]      = x2[2j]       (x2 = [x1; d])
    # out[C_ + j] = x2[2j + 1]
    for jo in range(C_):
        for s in range(2):
            src = 2 * jo + s
            if src < C_:
                val = xp_ref[src, pad:pad + H, pad:pad + W]    # SiLU(x1)[src]
            else:
                val = d[src - C_]
            o_ref[0, s * C_ + jo] = val.astype(o_ref.dtype)


def gsconv_pallas(x_nchw, params):
    B, C1, H, W = x_nchw.shape
    w1 = params["w1_folded"]        # (C_, C1)
    b1 = params["b1_folded"]        # (C_, 1)
    w2 = params["w2_folded"]        # (C_, K, K)
    b2 = params["b2_folded"]        # (C_, 1, 1)
    C_, K = w2.shape[0], w2.shape[1]
    C2 = 2 * C_
    HW = H * W
    pad = K // 2

    # Free (metadata-only) reshape: merge trailing spatial dims onto lanes.
    x_flat = x_nchw.reshape(B, C1, HW)

    kern = functools.partial(_gsconv_kernel, C_=C_, H=H, W=W, K=K)

    # VMEM budget: double-buffered in/out blocks + weights + padded scratch.
    f32b = 4
    est = (2 * (C1 * HW + C2 * HW) * f32b
           + 2 * (C_ * C1 + C_ + C_ * K * K + C_) * f32b
           + C_ * (H + 2 * pad) * (W + 2 * pad) * f32b)
    vmem_limit = int(min(max(4 * est, 16 * 2**20), 32 * 2**20))

    return pl.pallas_call(
        kern,
        out_shape=jax.ShapeDtypeStruct((B, C2, H, W), jnp.float32),
        grid=(B,),
        in_specs=[
            pl.BlockSpec((1, C1, HW), lambda b: (b, 0, 0)),
            pl.BlockSpec((C_, C1), lambda b: (0, 0)),
            pl.BlockSpec((C_, 1), lambda b: (0, 0)),
            pl.BlockSpec((C_, K, K), lambda b: (0, 0, 0)),
            pl.BlockSpec((C_, 1, 1), lambda b: (0, 0, 0)),
        ],
        out_specs=pl.BlockSpec((1, C2, H, W), lambda b: (b, 0, 0, 0)),
        scratch_shapes=[pltpu.VMEM((C_, H + 2 * pad, W + 2 * pad), jnp.float32)],
        compiler_params=pltpu.CompilerParams(
            dimension_semantics=("parallel",),
            vmem_limit_bytes=vmem_limit,
        ),
    )(x_flat, w1, b1, w2, b2)


# ---------------------------------------------------------------------------
# Pure-JAX reference replicating the PyTorch module exactly
# ---------------------------------------------------------------------------
def gsconv_reference(x, raw):
    C_ = raw["w1"].shape[0]
    eps = 1e-3

    def bn(y, g, b, m, v):
        s = g / jnp.sqrt(v + eps)
        return y * s[None, :, None, None] + (b - m * s)[None, :, None, None]

    silu = lambda t: t * jax.nn.sigmoid(t)

    # cv1: 1x1 conv
    y = lax.conv_general_dilated(
        x, raw["w1"].reshape(C_, -1, 1, 1), (1, 1), "VALID",
        dimension_numbers=("NCHW", "OIHW", "NCHW"))
    x1 = silu(bn(y, raw["g1"], raw["be1"], raw["m1"], raw["v1"]))

    # cv2: depthwise 5x5, pad 2
    y = lax.conv_general_dilated(
        x1, raw["w2"], (1, 1), ((2, 2), (2, 2)),
        dimension_numbers=("NCHW", "OIHW", "NCHW"), feature_group_count=C_)
    d = silu(bn(y, raw["g2"], raw["be2"], raw["m2"], raw["v2"]))

    x2 = jnp.concatenate([x1, d], axis=1)
    b, n, h, w = x2.shape
    yv = x2.reshape(b * n // 2, 2, h * w).transpose(1, 0, 2).reshape(2, -1, n // 2, h, w)
    return jnp.concatenate([yv[0], yv[1]], axis=1)


if __name__ == "__main__":
    B, C1, H, W = 2, 4, 16, 16
    C2 = 8
    C_ = C2 // 2
    eps = 1e-3  # ultralytics BatchNorm2d eps

    keys = jax.random.split(jax.random.PRNGKey(0), 12)
    x = jax.random.normal(keys[0], (B, C1, H, W), jnp.float32)

    # --- deterministic parameter init (shapes from the module __init__) ---
    w1 = 0.3 * jax.random.normal(keys[1], (C_, C1), jnp.float32)       # cv1 1x1 conv (O,I)
    g1 = 1.0 + 0.1 * jax.random.normal(keys[2], (C_,), jnp.float32)
    be1 = 0.1 * jax.random.normal(keys[3], (C_,), jnp.float32)
    m1 = 0.1 * jax.random.normal(keys[4], (C_,), jnp.float32)
    v1 = 1.0 + 0.2 * jax.random.uniform(keys[5], (C_,), jnp.float32)

    w2 = 0.2 * jax.random.normal(keys[6], (C_, 1, 5, 5), jnp.float32)  # cv2 depthwise (O,1,kh,kw)
    g2 = 1.0 + 0.1 * jax.random.normal(keys[7], (C_,), jnp.float32)
    be2 = 0.1 * jax.random.normal(keys[8], (C_,), jnp.float32)
    m2 = 0.1 * jax.random.normal(keys[9], (C_,), jnp.float32)
    v2 = 1.0 + 0.2 * jax.random.uniform(keys[10], (C_,), jnp.float32)

    # --- fold BN into conv weights/bias (JAX glue) ---
    s1 = g1 / jnp.sqrt(v1 + eps)
    w1_folded = w1 * s1[:, None]                               # (C_, C1)
    b1_folded = (be1 - m1 * s1).reshape(C_, 1)

    s2 = g2 / jnp.sqrt(v2 + eps)
    w2_folded = w2[:, 0] * s2[:, None, None]                   # (C_, 5, 5)
    b2_folded = (be2 - m2 * s2).reshape(C_, 1, 1)

    params = dict(w1_folded=w1_folded, b1_folded=b1_folded,
                  w2_folded=w2_folded, b2_folded=b2_folded)
    raw = dict(w1=w1, g1=g1, be1=be1, m1=m1, v1=v1,
               w2=w2, g2=g2, be2=be2, m2=m2, v2=v2)

    out = jax.block_until_ready(gsconv_pallas(x, params))
    ref = jax.block_until_ready(gsconv_reference(x, raw))

    assert out.shape == (B, C2, H, W), out.shape
    assert jnp.allclose(out, ref, atol=1e-4, rtol=1e-4), float(jnp.max(jnp.abs(out - ref)))

    print("KERNEL_OK")
</pallas_src>

<mosaic_0001>
module attributes {stable_mosaic.version = 11 : i64} {
  func.func @_gsconv_kernel(%arg0: i32, %arg1: memref<1x4x256xf32, #tpu.memory_space<vmem>>, %arg2: memref<4x4xf32, #tpu.memory_space<vmem>>, %arg3: memref<4x1xf32, #tpu.memory_space<vmem>>, %arg4: memref<4x5x5xf32, #tpu.memory_space<vmem>>, %arg5: memref<4x1x1xf32, #tpu.memory_space<vmem>>, %arg6: memref<1x8x16x16xf32, #tpu.memory_space<vmem>>, %arg7: memref<4x20x20xf32, #tpu.memory_space<vmem>>) attributes {dimension_semantics = [#tpu.dimension_semantics<parallel>], iteration_bounds = array<i64: 2>, scalar_prefetch = 0 : i64, scratch_operands = 1 : i64, tpu.core_type = #tpu.core_type<tc>, window_params = [{transform_indices = @transform_0, window_bounds = array<i64: 1, 4, 256>}, {pipeline_mode = #tpu.pipeline_mode<synchronous>, transform_indices = @transform_1, window_bounds = array<i64: 4, 4>}, {pipeline_mode = #tpu.pipeline_mode<synchronous>, transform_indices = @transform_2, window_bounds = array<i64: 4, 1>}, {pipeline_mode = #tpu.pipeline_mode<synchronous>, transform_indices = @transform_3, window_bounds = array<i64: 4, 5, 5>}, {pipeline_mode = #tpu.pipeline_mode<synchronous>, transform_indices = @transform_4, window_bounds = array<i64: 4, 1, 1>}, {transform_indices = @transform_5, window_bounds = array<i64: 1, 8, 16, 16>}]} {
    %c0 = arith.constant 0 : index
    %c0_0 = arith.constant 0 : index
    %c0_1 = arith.constant 0 : index
    %0 = vector.load %arg1[%c0, %c0_0, %c0_1] : memref<1x4x256xf32, #tpu.memory_space<vmem>>, vector<1x4x256xf32>
    %1 = vector.shape_cast %0 : vector<1x4x256xf32> to vector<4x256xf32>
    %c0_2 = arith.constant 0 : index
    %c0_3 = arith.constant 0 : index
    %2 = vector.load %arg2[%c0_2, %c0_3] : memref<4x4xf32, #tpu.memory_space<vmem>>, vector<4x4xf32>
    %cst = arith.constant dense<0.000000e+00> : vector<4x256xf32>
    %3 = tpu.matmul %2, %1, %cst {dimension_numbers = #tpu.dot_dimension_numbers<[1], [0], [0], [1], [0, 0, 1, 1], [], []>} : vector<4x4xf32>, vector<4x256xf32>, vector<4x256xf32> -> vector<4x256xf32>
    %c0_4 = arith.constant 0 : index
    %c0_5 = arith.constant 0 : index
    %4 = vector.load %arg3[%c0_4, %c0_5] : memref<4x1xf32, #tpu.memory_space<vmem>>, vector<4x1xf32>
    %5 = vector.broadcast %4 : vector<4x1xf32> to vector<4x256xf32>
    %6 = arith.addf %3, %5 : vector<4x256xf32>
    %7 = arith.negf %6 : vector<4x256xf32>
    %8 = math.exp %7 : vector<4x256xf32>
    %cst_6 = arith.constant 1.000000e+00 : f32
    %9 = vector.broadcast %cst_6 : f32 to vector<4x256xf32>
    %10 = arith.addf %9, %8 : vector<4x256xf32>
    %11 = arith.divf %9, %10 : vector<4x256xf32>
    %12 = arith.mulf %6, %11 : vector<4x256xf32>
    %cst_7 = arith.constant 0.000000e+00 : f32
    %13 = vector.broadcast %cst_7 : f32 to vector<4x20x20xf32>
    %c0_8 = arith.constant 0 : index
    %c0_9 = arith.constant 0 : index
    %c0_10 = arith.constant 0 : index
    %14 = vector.load %arg7[%c0_8, %c0_9, %c0_10] : memref<4x20x20xf32, #tpu.memory_space<vmem>>, vector<4x20x20xf32>
    tpu.vector_store %arg7[%c0_8, %c0_9, %c0_10], %13 {strides = array<i32>} : memref<4x20x20xf32, #tpu.memory_space<vmem>>, vector<4x20x20xf32>,
    %15 = vector.extract_strided_slice %12 {offsets = [0, 0], sizes = [4, 16], strides = [1, 1]} : vector<4x256xf32> to vector<4x16xf32>
    %16 = vector.shape_cast %15 : vector<4x16xf32> to vector<4x1x16xf32>
    %c0_11 = arith.constant 0 : index
    %c2 = arith.constant 2 : index
    %c2_12 = arith.constant 2 : index
    %17 = vector.load %arg7[%c0_11, %c2, %c2_12] : memref<4x20x20xf32, #tpu.memory_space<vmem>>, vector<4x1x16xf32>
    tpu.vector_store %arg7[%c0_11, %c2, %c2_12], %16 {strides = array<i32>} : memref<4x20x20xf32, #tpu.memory_space<vmem>>, vector<4x1x16xf32>,
    %18 = vector.extract_strided_slice %12 {offsets = [0, 16], sizes = [4, 16], strides = [1, 1]} : vector<4x256xf32> to vector<4x16xf32>
    %19 = vector.shape_cast %18 : vector<4x16xf32> to vector<4x1x16xf32>
    %c0_13 = arith.constant 0 : index
    %c3 = arith.constant 3 : index
    %c2_14 = arith.constant 2 : index
    %20 = vector.load %arg7[%c0_13, %c3, %c2_14] : memref<4x20x20xf32, #tpu.memory_space<vmem>>, vector<4x1x16xf32>
    tpu.vector_store %arg7[%c0_13, %c3, %c2_14], %19 {strides = array<i32>} : memref<4x20x20xf32, #tpu.memory_space<vmem>>, vector<4x1x16xf32>,
    %21 = vector.extract_strided_slice %12 {offsets = [0, 32], sizes = [4, 16], strides = [1, 1]} : vector<4x256xf32> to vector<4x16xf32>
    %22 = vector.shape_cast %21 : vector<4x16xf32> to vector<4x1x16xf32>
    %c0_15 = arith.constant 0 : index
    %c4 = arith.constant 4 : index
    %c2_16 = arith.constant 2 : index
    %23 = vector.load %arg7[%c0_15, %c4, %c2_16] : memref<4x20x20xf32, #tpu.memory_space<vmem>>, vector<4x1x16xf32>
    tpu.vector_store %arg7[%c0_15, %c4, %c2_16], %22 {strides = array<i32>} : memref<4x20x20xf32, #tpu.memory_space<vmem>>, vector<4x1x16xf32>,
    %24 = vector.extract_strided_slice %12 {offsets = [0, 48], sizes = [4, 16], strides = [1, 1]} : vector<4x256xf32> to vector<4x16xf32>
    %25 = vector.shape_cast %24 : vector<4x16xf32> to vector<4x1x16xf32>
    %c0_17 = arith.constant 0 : index
    %c5 = arith.constant 5 : index
    %c2_18 = arith.constant 2 : index
    %26 = vector.load %arg7[%c0_17, %c5, %c2_18] : memref<4x20x20xf32, #tpu.memory_space<vmem>>, vector<4x1x16xf32>
    tpu.vector_store %arg7[%c0_17, %c5, %c2_18], %25 {strides = array<i32>} : memref<4x20x20xf32, #tpu.memory_space<vmem>>, vector<4x1x16xf32>,
    %27 = vector.extract_strided_slice %12 {offsets = [0, 64], sizes = [4, 16], strides = [1, 1]} : vector<4x256xf32> to vector<4x16xf32>
    %28 = vector.shape_cast %27 : vector<4x16xf32> to vector<4x1x16xf32>
    %c0_19 = arith.constant 0 : index
    %c6 = arith.constant 6 : index
    %c2_20 = arith.constant 2 : index
    %29 = vector.load %arg7[%c0_19, %c6, %c2_20] : memref<4x20x20xf32, #tpu.memory_space<vmem>>, vector<4x1x16xf32>
    tpu.vector_store %arg7[%c0_19, %c6, %c2_20], %28 {strides = array<i32>} : memref<4x20x20xf32, #tpu.memory_space<vmem>>, vector<4x1x16xf32>,
    %30 = vector.extract_strided_slice %12 {offsets = [0, 80], sizes = [4, 16], strides = [1, 1]} : vector<4x256xf32> to vector<4x16xf32>
    %31 = vector.shape_cast %30 : vector<4x16xf32> to vector<4x1x16xf32>
    %c0_21 = arith.constant 0 : index
    %c7 = arith.constant 7 : index
    %c2_22 = arith.constant 2 : index
    %32 = vector.load %arg7[%c0_21, %c7, %c2_22] : memref<4x20x20xf32, #tpu.memory_space<vmem>>, vector<4x1x16xf32>
    tpu.vector_store %arg7[%c0_21, %c7, %c2_22], %31 {strides = array<i32>} : memref<4x20x20xf32, #tpu.memory_space<vmem>>, vector<4x1x16xf32>,
    %33 = vector.extract_strided_slice %12 {offsets = [0, 96], sizes = [4, 16], strides = [1, 1]} : vector<4x256xf32> to vector<4x16xf32>
    %34 = vector.shape_cast %33 : vector<4x16xf32> to vector<4x1x16xf32>
    %c0_23 = arith.constant 0 : index
    %c8 = arith.constant 8 : index
    %c2_24 = arith.constant 2 : index
    %35 = vector.load %arg7[%c0_23, %c8, %c2_24] : memref<4x20x20xf32, #tpu.memory_space<vmem>>, vector<4x1x16xf32>
    tpu.vector_store %arg7[%c0_23, %c8, %c2_24], %34 {strides = array<i32>} : memref<4x20x20xf32, #tpu.memory_space<vmem>>, vector<4x1x16xf32>,
    %36 = vector.extract_strided_slice %12 {offsets = [0, 112], sizes = [4, 16], strides = [1, 1]} : vector<4x256xf32> to vector<4x16xf32>
    %37 = vector.shape_cast %36 : vector<4x16xf32> to vector<4x1x16xf32>
    %c0_25 = arith.constant 0 : index
    %c9 = arith.constant 9 : index
    %c2_26 = arith.constant 2 : index
    %38 = vector.load %arg7[%c0_25, %c9, %c2_26] : memref<4x20x20xf32, #tpu.memory_space<vmem>>, vector<4x1x16xf32>
    tpu.vector_store %arg7[%c0_25, %c9, %c2_26], %37 {strides = array<i32>} : memref<4x20x20xf32, #tpu.memory_space<vmem>>, vector<4x1x16xf32>,
    %39 = vector.extract_strided_slice %12 {offsets = [0, 128], sizes = [4, 16], strides = [1, 1]} : vector<4x256xf32> to vector<4x16xf32>
    %40 = vector.shape_cast %39 : vector<4x16xf32> to vector<4x1x16xf32>
    %c0_27 = arith.constant 0 : index
    %c10 = arith.constant 10 : index
    %c2_28 = arith.constant 2 : index
    %41 = vector.load %arg7[%c0_27, %c10, %c2_28] : memref<4x20x20xf32, #tpu.memory_space<vmem>>, vector<4x1x16xf32>
    tpu.vector_store %arg7[%c0_27, %c10, %c2_28], %40 {strides = array<i32>} : memref<4x20x20xf32, #tpu.memory_space<vmem>>, vector<4x1x16xf32>,
    %42 = vector.extract_strided_slice %12 {offsets = [0, 144], sizes = [4, 16], strides = [1, 1]} : vector<4x256xf32> to vector<4x16xf32>
    %43 = vector.shape_cast %42 : vector<4x16xf32> to vector<4x1x16xf32>
    %c0_29 = arith.constant 0 : index
    %c11 = arith.constant 11 : index
    %c2_30 = arith.constant 2 : index
    %44 = vector.load %arg7[%c0_29, %c11, %c2_30] : memref<4x20x20xf32, #tpu.memory_space<vmem>>, vector<4x1x16xf32>
    tpu.vector_store %arg7[%c0_29, %c11, %c2_30], %43 {strides = array<i32>} : memref<4x20x20xf32, #tpu.memory_space<vmem>>, vector<4x1x16xf32>,
    %45 = vector.extract_strided_slice %12 {offsets = [0, 160], sizes = [4, 16], strides = [1, 1]} : vector<4x256xf32> to vector<4x16xf32>
    %46 = vector.shape_cast %45 : vector<4x16xf32> to vector<4x1x16xf32>
    %c0_31 = arith.constant 0 : index
    %c12 = arith.constant 12 : index
    %c2_32 = arith.constant 2 : index
    %47 = vector.load %arg7[%c0_31, %c12, %c2_32] : memref<4x20x20xf32, #tpu.memory_space<vmem>>, vector<4x1x16xf32>
    tpu.vector_store %arg7[%c0_31, %c12, %c2_32], %46 {strides = array<i32>} : memref<4x20x20xf32, #tpu.memory_space<vmem>>, vector<4x1x16xf32>,
    %48 = vector.extract_strided_slice %12 {offsets = [0, 176], sizes = [4, 16], strides = [1, 1]} : vector<4x256xf32> to vector<4x16xf32>
    %49 = vector.shape_cast %48 : vector<4x16xf32> to vector<4x1x16xf32>
    %c0_33 = arith.constant 0 : index
    %c13 = arith.constant 13 : index
    %c2_34 = arith.constant 2 : index
    %50 = vector.load %arg7[%c0_33, %c13, %c2_34] : memref<4x20x20xf32, #tpu.memory_space<vmem>>, vector<4x1x16xf32>
    tpu.vector_store %arg7[%c0_33, %c13, %c2_34], %49 {strides = array<i32>} : memref<4x20x20xf32, #tpu.memory_space<vmem>>, vector<4x1x16xf32>,
    %51 = vector.extract_strided_slice %12 {offsets = [0, 192], sizes = [4, 16], strides = [1, 1]} : vector<4x256xf32> to vector<4x16xf32>
    %52 = vector.shape_cast %51 : vector<4x16xf32> to vector<4x1x16xf32>
    %c0_35 = arith.constant 0 : index
    %c14 = arith.constant 14 : index
    %c2_36 = arith.constant 2 : index
    %53 = vector.load %arg7[%c0_35, %c14, %c2_36] : memref<4x20x20xf32, #tpu.memory_space<vmem>>, vector<4x1x16xf32>
    tpu.vector_store %arg7[%c0_35, %c14, %c2_36], %52 {strides = array<i32>} : memref<4x20x20xf32, #tpu.memory_space<vmem>>, vector<4x1x16xf32>,
    %54 = vector.extract_strided_slice %12 {offsets = [0, 208], sizes = [4, 16], strides = [1, 1]} : vector<4x256xf32> to vector<4x16xf32>
    %55 = vector.shape_cast %54 : vector<4x16xf32> to vector<4x1x16xf32>
    %c0_37 = arith.constant 0 : index
    %c15 = arith.constant 15 : index
    %c2_38 = arith.constant 2 : index
    %56 = vector.load %arg7[%c0_37, %c15, %c2_38] : memref<4x20x20xf32, #tpu.memory_space<vmem>>, vector<4x1x16xf32>
    tpu.vector_store %arg7[%c0_37, %c15, %c2_38], %55 {strides = array<i32>} : memref<4x20x20xf32, #tpu.memory_space<vmem>>, vector<4x1x16xf32>,
    %57 = vector.extract_strided_slice %12 {offsets = [0, 224], sizes = [4, 16], strides = [1, 1]} : vector<4x256xf32> to vector<4x16xf32>
    %58 = vector.shape_cast %57 : vector<4x16xf32> to vector<4x1x16xf32>
    %c0_39 = arith.constant 0 : index
    %c16 = arith.constant 16 : index
    %c2_40 = arith.constant 2 : index
    %59 = vector.load %arg7[%c0_39, %c16, %c2_40] : memref<4x20x20xf32, #tpu.memory_space<vmem>>, vector<4x1x16xf32>
    tpu.vector_store %arg7[%c0_39, %c16, %c2_40], %58 {strides = array<i32>} : memref<4x20x20xf32, #tpu.memory_space<vmem>>, vector<4x1x16xf32>,
    %60 = vector.extract_strided_slice %12 {offsets = [0, 240], sizes = [4, 16], strides = [1, 1]} : vector<4x256xf32> to vector<4x16xf32>
    %61 = vector.shape_cast %60 : vector<4x16xf32> to vector<4x1x16xf32>
    %c0_41 = arith.constant 0 : index
    %c17 = arith.constant 17 : index
    %c2_42 = arith.constant 2 : index
    %62 = vector.load %arg7[%c0_41, %c17, %c2_42] : memref<4x20x20xf32, #tpu.memory_space<vmem>>, vector<4x1x16xf32>
    tpu.vector_store %arg7[%c0_41, %c17, %c2_42], %61 {strides = array<i32>} : memref<4x20x20xf32, #tpu.memory_space<vmem>>, vector<4x1x16xf32>,
    %c0_43 = arith.constant 0 : index
    %c0_44 = arith.constant 0 : index
    %c0_45 = arith.constant 0 : index
    %63 = vector.load %arg4[%c0_43, %c0_44, %c0_45] : memref<4x5x5xf32, #tpu.memory_space<vmem>>, vector<4x5x5xf32>
    %cst_46 = arith.constant 0.000000e+00 : f32
    %64 = vector.broadcast %cst_46 : f32 to vector<4x16x16xf32>
    %c0_47 = arith.constant 0 : index
    %c0_48 = arith.constant 0 : index
    %c0_49 = arith.constant 0 : index
    %65 = vector.load %arg7[%c0_47, %c0_48, %c0_49] : memref<4x20x20xf32, #tpu.memory_space<vmem>>, vector<4x16x16xf32>
    %66 = vector.extract_strided_slice %63 {offsets = [0, 0, 0], sizes = [4, 1, 1], strides = [1, 1, 1]} : vector<4x5x5xf32> to vector<4x1x1xf32>
    %67 = vector.broadcast %66 : vector<4x1x1xf32> to vector<4x16x16xf32>
    %68 = arith.mulf %65, %67 : vector<4x16x16xf32>
    %69 = arith.addf %64, %68 : vector<4x16x16xf32>
    %c0_50 = arith.constant 0 : index
    %c0_51 = arith.constant 0 : index
    %c1 = arith.constant 1 : index
    %70 = vector.load %arg7[%c0_50, %c0_51, %c1] : memref<4x20x20xf32, #tpu.memory_space<vmem>>, vector<4x16x16xf32>
    %71 = vector.extract_strided_slice %63 {offsets = [0, 0, 1], sizes = [4, 1, 1], strides = [1, 1, 1]} : vector<4x5x5xf32> to vector<4x1x1xf32>
    %72 = vector.broadcast %71 : vector<4x1x1xf32> to vector<4x16x16xf32>
    %73 = arith.mulf %70, %72 : vector<4x16x16xf32>
    %74 = arith.addf %69, %73 : vector<4x16x16xf32>
    %c0_52 = arith.constant 0 : index
    %c0_53 = arith.constant 0 : index
    %c2_54 = arith.constant 2 : index
    %75 = vector.load %arg7[%c0_52, %c0_53, %c2_54] : memref<4x20x20xf32, #tpu.memory_space<vmem>>, vector<4x16x16xf32>
    %76 = vector.extract_strided_slice %63 {offsets = [0, 0, 2], sizes = [4, 1, 1], strides = [1, 1, 1]} : vector<4x5x5xf32> to vector<4x1x1xf32>
    %77 = vector.broadcast %76 : vector<4x1x1xf32> to vector<4x16x16xf32>
    %78 = arith.mulf %75, %77 : vector<4x16x16xf32>
    %79 = arith.addf %74, %78 : vector<4x16x16xf32>
    %c0_55 = arith.constant 0 : index
    %c0_56 = arith.constant 0 : index
    %c3_57 = arith.constant 3 : index
    %80 = vector.load %arg7[%c0_55, %c0_56, %c3_57] : memref<4x20x20xf32, #tpu.memory_space<vmem>>, vector<4x16x16xf32>
    %81 = vector.extract_strided_slice %63 {offsets = [0, 0, 3], sizes = [4, 1, 1], strides = [1, 1, 1]} : vector<4x5x5xf32> to vector<4x1x1xf32>
    %82 = vector.broadcast %81 : vector<4x1x1xf32> to vector<4x16x16xf32>
    %83 = arith.mulf %80, %82 : vector<4x16x16xf32>
    %84 = arith.addf %79, %83 : vector<4x16x16xf32>
    %c0_58 = arith.constant 0 : index
    %c0_59 = arith.constant 0 : index
    %c4_60 = arith.constant 4 : index
    %85 = vector.load %arg7[%c0_58, %c0_59, %c4_60] : memref<4x20x20xf32, #tpu.memory_space<vmem>>, vector<4x16x16xf32>
    %86 = vector.extract_strided_slice %63 {offsets = [0, 0, 4], sizes = [4, 1, 1], strides = [1, 1, 1]} : vector<4x5x5xf32> to vector<4x1x1xf32>
    %87 = vector.broadcast %86 : vector<4x1x1xf32> to vector<4x16x16xf32>
    %88 = arith.mulf %85, %87 : vector<4x16x16xf32>
    %89 = arith.addf %84, %88 : vector<4x16x16xf32>
    %c0_61 = arith.constant 0 : index
    %c1_62 = arith.constant 1 : index
    %c0_63 = arith.constant 0 : index
    %90 = vector.load %arg7[%c0_61, %c1_62, %c0_63] : memref<4x20x20xf32, #tpu.memory_space<vmem>>, vector<4x16x16xf32>
    %91 = vector.extract_strided_slice %63 {offsets = [0, 1, 0], sizes = [4, 1, 1], strides = [1, 1, 1]} : vector<4x5x5xf32> to vector<4x1x1xf32>
    %92 = vector.broadcast %91 : vector<4x1x1xf32> to vector<4x16x16xf32>
    %93 = arith.mulf %90, %92 : vector<4x16x16xf32>
    %94 = arith.addf %89, %93 : vector<4x16x16xf32>
    %c0_64 = arith.constant 0 : index
    %c1_65 = arith.constant 1 : index
    %c1_66 = arith.constant 1 : index
    %95 = vector.load %arg7[%c0_64, %c1_65, %c1_66] : memref<4x20x20xf32, #tpu.memory_space<vmem>>, vector<4x16x16xf32>
    %96 = vector.extract_strided_slice %63 {offsets = [0, 1, 1], sizes = [4, 1, 1], strides = [1, 1, 1]} : vector<4x5x5xf32> to vector<4x1x1xf32>
    %97 = vector.broadcast %96 : vector<4x1x1xf32> to vector<4x16x16xf32>
    %98 = arith.mulf %95, %97 : vector<4x16x16xf32>
    %99 = arith.addf %94, %98 : vector<4x16x16xf32>
    %c0_67 = arith.constant 0 : index
    %c1_68 = arith.constant 1 : index
    %c2_69 = arith.constant 2 : index
    %100 = vector.load %arg7[%c0_67, %c1_68, %c2_69] : memref<4x20x20xf32, #tpu.memory_space<vmem>>, vector<4x16x16xf32>
    %101 = vector.extract_strided_slice %63 {offsets = [0, 1, 2], sizes = [4, 1, 1], strides = [1, 1, 1]} : vector<4x5x5xf32> to vector<4x1x1xf32>
    %102 = vector.broadcast %101 : vector<4x1x1xf32> to vector<4x16x16xf32>
    %103 = arith.mulf %100, %102 : vector<4x16x16xf32>
    %104 = arith.addf %99, %103 : vector<4x16x16xf32>
    %c0_70 = arith.constant 0 : index
    %c1_71 = arith.constant 1 : index
    %c3_72 = arith.constant 3 : index
    %105 = vector.load %arg7[%c0_70, %c1_71, %c3_72] : memref<4x20x20xf32, #tpu.memory_space<vmem>>, vector<4x16x16xf32>
    %106 = vector.extract_strided_slice %63 {offsets = [0, 1, 3], sizes = [4, 1, 1], strides = [1, 1, 1]} : vector<4x5x5xf32> to vector<4x1x1xf32>
    %107 = vector.broadcast %106 : vector<4x1x1xf32> to vector<4x16x16xf32>
    %108 = arith.mulf %105, %107 : vector<4x16x16xf32>
    %109 = arith.addf %104, %108 : vector<4x16x16xf32>
    %c0_73 = arith.constant 0 : index
    %c1_74 = arith.constant 1 : index
    %c4_75 = arith.constant 4 : index
    %110 = vector.load %arg7[%c0_73, %c1_74, %c4_75] : memref<4x20x20xf32, #tpu.memory_space<vmem>>, vector<4x16x16xf32>
    %111 = vector.extract_strided_slice %63 {offsets = [0, 1, 4], sizes = [4, 1, 1], strides = [1, 1, 1]} : vector<4x5x5xf32> to vector<4x1x1xf32>
    %112 = vector.broadcast %111 : vector<4x1x1xf32> to vector<4x16x16xf32>
    %113 = arith.mulf %110, %112 : vector<4x16x16xf32>
    %114 = arith.addf %109, %113 : vector<4x16x16xf32>
    %c0_76 = arith.constant 0 : index
    %c2_77 = arith.constant 2 : index
    %c0_78 = arith.constant 0 : index
    %115 = vector.load %arg7[%c0_76, %c2_77, %c0_78] : memref<4x20x20xf32, #tpu.memory_space<vmem>>, vector<4x16x16xf32>
    %116 = vector.extract_strided_slice %63 {offsets = [0, 2, 0], sizes = [4, 1, 1], strides = [1, 1, 1]} : vector<4x5x5xf32> to vector<4x1x1xf32>
    %117 = vector.broadcast %116 : vector<4x1x1xf32> to vector<4x16x16xf32>
    %118 = arith.mulf %115, %117 : vector<4x16x16xf32>
    %119 = arith.addf %114, %118 : vector<4x16x16xf32>
    %c0_79 = arith.constant 0 : index
    %c2_80 = arith.constant 2 : index
    %c1_81 = arith.constant 1 : index
    %120 = vector.load %arg7[%c0_79, %c2_80, %c1_81] : memref<4x20x20xf32, #tpu.memory_space<vmem>>, vector<4x16x16xf32>
    %121 = vector.extract_strided_slice %63 {offsets = [0, 2, 1], sizes = [4, 1, 1], strides = [1, 1, 1]} : vector<4x5x5xf32> to vector<4x1x1xf32>
    %122 = vector.broadcast %121 : vector<4x1x1xf32> to vector<4x16x16xf32>
    %123 = arith.mulf %120, %122 : vector<4x16x16xf32>
    %124 = arith.addf %119, %123 : vector<4x16x16xf32>
    %c0_82 = arith.constant 0 : index
    %c2_83 = arith.constant 2 : index
    %c2_84 = arith.constant 2 : index
    %125 = vector.load %arg7[%c0_82, %c2_83, %c2_84] : memref<4x20x20xf32, #tpu.memory_space<vmem>>, vector<4x16x16xf32>
    %126 = vector.extract_strided_slice %63 {offsets = [0, 2, 2], sizes = [4, 1, 1], strides = [1, 1, 1]} : vector<4x5x5xf32> to vector<4x1x1xf32>
    %127 = vector.broadcast %126 : vector<4x1x1xf32> to vector<4x16x16xf32>
    %128 = arith.mulf %125, %127 : vector<4x16x16xf32>
    %129 = arith.addf %124, %128 : vector<4x16x16xf32>
    %c0_85 = arith.constant 0 : index
    %c2_86 = arith.constant 2 : index
    %c3_87 = arith.constant 3 : index
    %130 = vector.load %arg7[%c0_85, %c2_86, %c3_87] : memref<4x20x20xf32, #tpu.memory_space<vmem>>, vector<4x16x16xf32>
    %131 = vector.extract_strided_slice %63 {offsets = [0, 2, 3], sizes = [4, 1, 1], strides = [1, 1, 1]} : vector<4x5x5xf32> to vector<4x1x1xf32>
    %132 = vector.broadcast %131 : vector<4x1x1xf32> to vector<4x16x16xf32>
    %133 = arith.mulf %130, %132 : vector<4x16x16xf32>
    %134 = arith.addf %129, %133 : vector<4x16x16xf32>
    %c0_88 = arith.constant 0 : index
    %c2_89 = arith.constant 2 : index
    %c4_90 = arith.constant 4 : index
    %135 = vector.load %arg7[%c0_88, %c2_89, %c4_90] : memref<4x20x20xf32, #tpu.memory_space<vmem>>, vector<4x16x16xf32>
    %136 = vector.extract_strided_slice %63 {offsets = [0, 2, 4], sizes = [4, 1, 1], strides = [1, 1, 1]} : vector<4x5x5xf32> to vector<4x1x1xf32>
    %137 = vector.broadcast %136 : vector<4x1x1xf32> to vector<4x16x16xf32>
    %138 = arith.mulf %135, %137 : vector<4x16x16xf32>
    %139 = arith.addf %134, %138 : vector<4x16x16xf32>
    %c0_91 = arith.constant 0 : index
    %c3_92 = arith.constant 3 : index
    %c0_93 = arith.constant 0 : index
    %140 = vector.load %arg7[%c0_91, %c3_92, %c0_93] : memref<4x20x20xf32, #tpu.memory_space<vmem>>, vector<4x16x16xf32>
    %141 = vector.extract_strided_slice %63 {offsets = [0, 3, 0], sizes = [4, 1, 1], strides = [1, 1, 1]} : vector<4x5x5xf32> to vector<4x1x1xf32>
    %142 = vector.broadcast %141 : vector<4x1x1xf32> to vector<4x16x16xf32>
    %143 = arith.mulf %140, %142 : vector<4x16x16xf32>
    %144 = arith.addf %139, %143 : vector<4x16x16xf32>
    %c0_94 = arith.constant 0 : index
    %c3_95 = arith.constant 3 : index
    %c1_96 = arith.constant 1 : index
    %145 = vector.load %arg7[%c0_94, %c3_95, %c1_96] : memref<4x20x20xf32, #tpu.memory_space<vmem>>, vector<4x16x16xf32>
    %146 = vector.extract_strided_slice %63 {offsets = [0, 3, 1], sizes = [4, 1, 1], strides = [1, 1, 1]} : vector<4x5x5xf32> to vector<4x1x1xf32>
    %147 = vector.broadcast %146 : vector<4x1x1xf32> to vector<4x16x16xf32>
    %148 = arith.mulf %145, %147 : vector<4x16x16xf32>
    %149 = arith.addf %144, %148 : vector<4x16x16xf32>
    %c0_97 = arith.constant 0 : index
    %c3_98 = arith.constant 3 : index
    %c2_99 = arith.constant 2 : index
    %150 = vector.load %arg7[%c0_97, %c3_98, %c2_99] : memref<4x20x20xf32, #tpu.memory_space<vmem>>, vector<4x16x16xf32>
    %151 = vector.extract_strided_slice %63 {offsets = [0, 3, 2], sizes = [4, 1, 1], strides = [1, 1, 1]} : vector<4x5x5xf32> to vector<4x1x1xf32>
    %152 = vector.broadcast %151 : vector<4x1x1xf32> to vector<4x16x16xf32>
    %153 = arith.mulf %150, %152 : vector<4x16x16xf32>
    %154 = arith.addf %149, %153 : vector<4x16x16xf32>
    %c0_100 = arith.constant 0 : index
    %c3_101 = arith.constant 3 : index
    %c3_102 = arith.constant 3 : index
    %155 = vector.load %arg7[%c0_100, %c3_101, %c3_102] : memref<4x20x20xf32, #tpu.memory_space<vmem>>, vector<4x16x16xf32>
    %156 = vector.extract_strided_slice %63 {offsets = [0, 3, 3], sizes = [4, 1, 1], strides = [1, 1, 1]} : vector<4x5x5xf32> to vector<4x1x1xf32>
    %157 = vector.broadcast %156 : vector<4x1x1xf32> to vector<4x16x16xf32>
    %158 = arith.mulf %155, %157 : vector<4x16x16xf32>
    %159 = arith.addf %154, %158 : vector<4x16x16xf32>
    %c0_103 = arith.constant 0 : index
    %c3_104 = arith.constant 3 : index
    %c4_105 = arith.constant 4 : index
    %160 = vector.load %arg7[%c0_103, %c3_104, %c4_105] : memref<4x20x20xf32, #tpu.memory_space<vmem>>, vector<4x16x16xf32>
    %161 = vector.extract_strided_slice %63 {offsets = [0, 3, 4], sizes = [4, 1, 1], strides = [1, 1, 1]} : vector<4x5x5xf32> to vector<4x1x1xf32>
    %162 = vector.broadcast %161 : vector<4x1x1xf32> to vector<4x16x16xf32>
    %163 = arith.mulf %160, %162 : vector<4x16x16xf32>
    %164 = arith.addf %159, %163 : vector<4x16x16xf32>
    %c0_106 = arith.constant 0 : index
    %c4_107 = arith.constant 4 : index
    %c0_108 = arith.constant 0 : index
    %165 = vector.load %arg7[%c0_106, %c4_107, %c0_108] : memref<4x20x20xf32, #tpu.memory_space<vmem>>, vector<4x16x16xf32>
    %166 = vector.extract_strided_slice %63 {offsets = [0, 4, 0], sizes = [4, 1, 1], strides = [1, 1, 1]} : vector<4x5x5xf32> to vector<4x1x1xf32>
    %167 = vector.broadcast %166 : vector<4x1x1xf32> to vector<4x16x16xf32>
    %168 = arith.mulf %165, %167 : vector<4x16x16xf32>
    %169 = arith.addf %164, %168 : vector<4x16x16xf32>
    %c0_109 = arith.constant 0 : index
    %c4_110 = arith.constant 4 : index
    %c1_111 = arith.constant 1 : index
    %170 = vector.load %arg7[%c0_109, %c4_110, %c1_111] : memref<4x20x20xf32, #tpu.memory_space<vmem>>, vector<4x16x16xf32>
    %171 = vector.extract_strided_slice %63 {offsets = [0, 4, 1], sizes = [4, 1, 1], strides = [1, 1, 1]} : vector<4x5x5xf32> to vector<4x1x1xf32>
    %172 = vector.broadcast %171 : vector<4x1x1xf32> to vector<4x16x16xf32>
    %173 = arith.mulf %170, %172 : vector<4x16x16xf32>
    %174 = arith.addf %169, %173 : vector<4x16x16xf32>
    %c0_112 = arith.constant 0 : index
    %c4_113 = arith.constant 4 : index
    %c2_114 = arith.constant 2 : index
    %175 = vector.load %arg7[%c0_112, %c4_113, %c2_114] : memref<4x20x20xf32, #tpu.memory_space<vmem>>, vector<4x16x16xf32>
    %176 = vector.extract_strided_slice %63 {offsets = [0, 4, 2], sizes = [4, 1, 1], strides = [1, 1, 1]} : vector<4x5x5xf32> to vector<4x1x1xf32>
    %177 = vector.broadcast %176 : vector<4x1x1xf32> to vector<4x16x16xf32>
    %178 = arith.mulf %175, %177 : vector<4x16x16xf32>
    %179 = arith.addf %174, %178 : vector<4x16x16xf32>
    %c0_115 = arith.constant 0 : index
    %c4_116 = arith.constant 4 : index
    %c3_117 = arith.constant 3 : index
    %180 = vector.load %arg7[%c0_115, %c4_116, %c3_117] : memref<4x20x20xf32, #tpu.memory_space<vmem>>, vector<4x16x16xf32>
    %181 = vector.extract_strided_slice %63 {offsets = [0, 4, 3], sizes = [4, 1, 1], strides = [1, 1, 1]} : vector<4x5x5xf32> to vector<4x1x1xf32>
    %182 = vector.broadcast %181 : vector<4x1x1xf32> to vector<4x16x16xf32>
    %183 = arith.mulf %180, %182 : vector<4x16x16xf32>
    %184 = arith.addf %179, %183 : vector<4x16x16xf32>
    %c0_118 = arith.constant 0 : index
    %c4_119 = arith.constant 4 : index
    %c4_120 = arith.constant 4 : index
    %185 = vector.load %arg7[%c0_118, %c4_119, %c4_120] : memref<4x20x20xf32, #tpu.memory_space<vmem>>, vector<4x16x16xf32>
    %186 = vector.extract_strided_slice %63 {offsets = [0, 4, 4], sizes = [4, 1, 1], strides = [1, 1, 1]} : vector<4x5x5xf32> to vector<4x1x1xf32>
    %187 = vector.broadcast %186 : vector<4x1x1xf32> to vector<4x16x16xf32>
    %188 = arith.mulf %185, %187 : vector<4x16x16xf32>
    %189 = arith.addf %184, %188 : vector<4x16x16xf32>
    %c0_121 = arith.constant 0 : index
    %c0_122 = arith.constant 0 : index
    %c0_123 = arith.constant 0 : index
    %190 = vector.load %arg5[%c0_121, %c0_122, %c0_123] : memref<4x1x1xf32, #tpu.memory_space<vmem>>, vector<4x1x1xf32>
    %191 = vector.broadcast %190 : vector<4x1x1xf32> to vector<4x16x16xf32>
    %192 = arith.addf %189, %191 : vector<4x16x16xf32>
    %193 = arith.negf %192 : vector<4x16x16xf32>
    %194 = math.exp %193 : vector<4x16x16xf32>
    %cst_124 = arith.constant 1.000000e+00 : f32
    %195 = vector.broadcast %cst_124 : f32 to vector<4x16x16xf32>
    %196 = arith.addf %195, %194 : vector<4x16x16xf32>
    %197 = arith.divf %195, %196 : vector<4x16x16xf32>
    %198 = arith.mulf %192, %197 : vector<4x16x16xf32>
    %c0_125 = arith.constant 0 : index
    %c2_126 = arith.constant 2 : index
    %c2_127 = arith.constant 2 : index
    %199 = vector.load %arg7[%c0_125, %c2_126, %c2_127] : memref<4x20x20xf32, #tpu.memory_space<vmem>>, vector<1x16x16xf32>
    %200 = vector.shape_cast %199 : vector<1x16x16xf32> to vector<16x16xf32>
    %c0_128 = arith.constant 0 : index
    %c0_129 = arith.constant 0 : index
    %c0_130 = arith.constant 0 : index
    %c0_131 = arith.constant 0 : index
    %201 = vector.load %arg6[%c0_128, %c0_129, %c0_130, %c0_131] : memref<1x8x16x16xf32, #tpu.memory_space<vmem>>, vector<1x1x16x16xf32>
    %202 = vector.shape_cast %201 : vector<1x1x16x16xf32> to vector<16x16xf32>
    %203 = vector.shape_cast %200 : vector<16x16xf32> to vector<1x1x16x16xf32>
    tpu.vector_store %arg6[%c0_128, %c0_129, %c0_130, %c0_131], %203 {strides = array<i32>} : memref<1x8x16x16xf32, #tpu.memory_space<vmem>>, vector<1x1x16x16xf32>,
    %c1_132 = arith.constant 1 : index
    %c2_133 = arith.constant 2 : index
    %c2_134 = arith.constant 2 : index
    %204 = vector.load %arg7[%c1_132, %c2_133, %c2_134] : memref<4x20x20xf32, #tpu.memory_space<vmem>>, vector<1x16x16xf32>
    %205 = vector.shape_cast %204 : vector<1x16x16xf32> to vector<16x16xf32>
    %c0_135 = arith.constant 0 : index
    %c4_136 = arith.constant 4 : index
    %c0_137 = arith.constant 0 : index
    %c0_138 = arith.constant 0 : index
    %206 = vector.load %arg6[%c0_135, %c4_136, %c0_137, %c0_138] : memref<1x8x16x16xf32, #tpu.memory_space<vmem>>, vector<1x1x16x16xf32>
    %207 = vector.shape_cast %206 : vector<1x1x16x16xf32> to vector<16x16xf32>
    %208 = vector.shape_cast %205 : vector<16x16xf32> to vector<1x1x16x16xf32>
    tpu.vector_store %arg6[%c0_135, %c4_136, %c0_137, %c0_138], %208 {strides = array<i32>} : memref<1x8x16x16xf32, #tpu.memory_space<vmem>>, vector<1x1x16x16xf32>,
    %c2_139 = arith.constant 2 : index
    %c2_140 = arith.constant 2 : index
    %c2_141 = arith.constant 2 : index
    %209 = vector.load %arg7[%c2_139, %c2_140, %c2_141] : memref<4x20x20xf32, #tpu.memory_space<vmem>>, vector<1x16x16xf32>
    %210 = vector.shape_cast %209 : vector<1x16x16xf32> to vector<16x16xf32>
    %c0_142 = arith.constant 0 : index
    %c1_143 = arith.constant 1 : index
    %c0_144 = arith.constant 0 : index
    %c0_145 = arith.constant 0 : index
    %211 = vector.load %arg6[%c0_142, %c1_143, %c0_144, %c0_145] : memref<1x8x16x16xf32, #tpu.memory_space<vmem>>, vector<1x1x16x16xf32>
    %212 = vector.shape_cast %211 : vector<1x1x16x16xf32> to vector<16x16xf32>
    %213 = vector.shape_cast %210 : vector<16x16xf32> to vector<1x1x16x16xf32>
    tpu.vector_store %arg6[%c0_142, %c1_143, %c0_144, %c0_145], %213 {strides = array<i32>} : memref<1x8x16x16xf32, #tpu.memory_space<vmem>>, vector<1x1x16x16xf32>,
    %c3_146 = arith.constant 3 : index
    %c2_147 = arith.constant 2 : index
    %c2_148 = arith.constant 2 : index
    %214 = vector.load %arg7[%c3_146, %c2_147, %c2_148] : memref<4x20x20xf32, #tpu.memory_space<vmem>>, vector<1x16x16xf32>
    %215 = vector.shape_cast %214 : vector<1x16x16xf32> to vector<16x16xf32>
    %c0_149 = arith.constant 0 : index
    %c5_150 = arith.constant 5 : index
    %c0_151 = arith.constant 0 : index
    %c0_152 = arith.constant 0 : index
    %216 = vector.load %arg6[%c0_149, %c5_150, %c0_151, %c0_152] : memref<1x8x16x16xf32, #tpu.memory_space<vmem>>, vector<1x1x16x16xf32>
    %217 = vector.shape_cast %216 : vector<1x1x16x16xf32> to vector<16x16xf32>
    %218 = vector.shape_cast %215 : vector<16x16xf32> to vector<1x1x16x16xf32>
    tpu.vector_store %arg6[%c0_149, %c5_150, %c0_151, %c0_152], %218 {strides = array<i32>} : memref<1x8x16x16xf32, #tpu.memory_space<vmem>>, vector<1x1x16x16xf32>,
    %219 = vector.extract_strided_slice %198 {offsets = [0, 0, 0], sizes = [1, 16, 16], strides = [1, 1, 1]} : vector<4x16x16xf32> to vector<1x16x16xf32>
    %220 = vector.shape_cast %219 : vector<1x16x16xf32> to vector<16x16xf32>
    %c0_153 = arith.constant 0 : index
    %c2_154 = arith.constant 2 : index
    %c0_155 = arith.constant 0 : index
    %c0_156 = arith.constant 0 : index
    %221 = vector.load %arg6[%c0_153, %c2_154, %c0_155, %c0_156] : memref<1x8x16x16xf32, #tpu.memory_space<vmem>>, vector<1x1x16x16xf32>
    %222 = vector.shape_cast %221 : vector<1x1x16x16xf32> to vector<16x16xf32>
    %223 = vector.shape_cast %220 : vector<16x16xf32> to vector<1x1x16x16xf32>
    tpu.vector_store %arg6[%c0_153, %c2_154, %c0_155, %c0_156], %223 {strides = array<i32>} : memref<1x8x16x16xf32, #tpu.memory_space<vmem>>, vector<1x1x16x16xf32>,
    %224 = vector.extract_strided_slice %198 {offsets = [1, 0, 0], sizes = [1, 16, 16], strides = [1, 1, 1]} : vector<4x16x16xf32> to vector<1x16x16xf32>
    %225 = vector.shape_cast %224 : vector<1x16x16xf32> to vector<16x16xf32>
    %c0_157 = arith.constant 0 : index
    %c6_158 = arith.constant 6 : index
    %c0_159 = arith.constant 0 : index
    %c0_160 = arith.constant 0 : index
    %226 = vector.load %arg6[%c0_157, %c6_158, %c0_159, %c0_160] : memref<1x8x16x16xf32, #tpu.memory_space<vmem>>, vector<1x1x16x16xf32>
    %227 = vector.shape_cast %226 : vector<1x1x16x16xf32> to vector<16x16xf32>
    %228 = vector.shape_cast %225 : vector<16x16xf32> to vector<1x1x16x16xf32>
    tpu.vector_store %arg6[%c0_157, %c6_158, %c0_159, %c0_160], %228 {strides = array<i32>} : memref<1x8x16x16xf32, #tpu.memory_space<vmem>>, vector<1x1x16x16xf32>,
    %229 = vector.extract_strided_slice %198 {offsets = [2, 0, 0], sizes = [1, 16, 16], strides = [1, 1, 1]} : vector<4x16x16xf32> to vector<1x16x16xf32>
    %230 = vector.shape_cast %229 : vector<1x16x16xf32> to vector<16x16xf32>
    %c0_161 = arith.constant 0 : index
    %c3_162 = arith.constant 3 : index
    %c0_163 = arith.constant 0 : index
    %c0_164 = arith.constant 0 : index
    %231 = vector.load %arg6[%c0_161, %c3_162, %c0_163, %c0_164] : memref<1x8x16x16xf32, #tpu.memory_space<vmem>>, vector<1x1x16x16xf32>
    %232 = vector.shape_cast %231 : vector<1x1x16x16xf32> to vector<16x16xf32>
    %233 = vector.shape_cast %230 : vector<16x16xf32> to vector<1x1x16x16xf32>
    tpu.vector_store %arg6[%c0_161, %c3_162, %c0_163, %c0_164], %233 {strides = array<i32>} : memref<1x8x16x16xf32, #tpu.memory_space<vmem>>, vector<1x1x16x16xf32>,
    %234 = vector.extract_strided_slice %198 {offsets = [3, 0, 0], sizes = [1, 16, 16], strides = [1, 1, 1]} : vector<4x16x16xf32> to vector<1x16x16xf32>
    %235 = vector.shape_cast %234 : vector<1x16x16xf32> to vector<16x16xf32>
    %c0_165 = arith.constant 0 : index
    %c7_166 = arith.constant 7 : index
    %c0_167 = arith.constant 0 : index
    %c0_168 = arith.constant 0 : index
    %236 = vector.load %arg6[%c0_165, %c7_166, %c0_167, %c0_168] : memref<1x8x16x16xf32, #tpu.memory_space<vmem>>, vector<1x1x16x16xf32>
    %237 = vector.shape_cast %236 : vector<1x1x16x16xf32> to vector<16x16xf32>
    %238 = vector.shape_cast %235 : vector<16x16xf32> to vector<1x1x16x16xf32>
    tpu.vector_store %arg6[%c0_165, %c7_166, %c0_167, %c0_168], %238 {strides = array<i32>} : memref<1x8x16x16xf32, #tpu.memory_space<vmem>>, vector<1x1x16x16xf32>,
    return
  }
  func.func @transform_0(%arg0: i32) -> (i32, i32, i32) {
    %c0_i32 = arith.constant 0 : i32
    %c0_i32_0 = arith.constant 0 : i32
    %c0_i32_1 = arith.constant 0 : i32
    return %arg0, %c0_i32, %c0_i32_0 : i32, i32, i32
  }
  func.func @transform_1(%arg0: i32) -> (i32, i32) {
    %c0_i32 = arith.constant 0 : i32
    %c0_i32_0 = arith.constant 0 : i32
    %c0_i32_1 = arith.constant 0 : i32
    return %c0_i32, %c0_i32_0 : i32, i32
  }
  func.func @transform_2(%arg0: i32) -> (i32, i32) {
    %c0_i32 = arith.constant 0 : i32
    %c0_i32_0 = arith.constant 0 : i32
    %c0_i32_1 = arith.constant 0 : i32
    return %c0_i32, %c0_i32_0 : i32, i32
  }
  func.func @transform_3(%arg0: i32) -> (i32, i32, i32) {
    %c0_i32 = arith.constant 0 : i32
    %c0_i32_0 = arith.constant 0 : i32
    %c0_i32_1 = arith.constant 0 : i32
    %c0_i32_2 = arith.constant 0 : i32
    return %c0_i32, %c0_i32_0, %c0_i32_1 : i32, i32, i32
  }
  func.func @transform_4(%arg0: i32) -> (i32, i32, i32) {
    %c0_i32 = arith.constant 0 : i32
    %c0_i32_0 = arith.constant 0 : i32
    %c0_i32_1 = arith.constant 0 : i32
    %c0_i32_2 = arith.constant 0 : i32
    return %c0_i32, %c0_i32_0, %c0_i32_1 : i32, i32, i32
  }
  func.func @transform_5(%arg0: i32) -> (i32, i32, i32, i32) {
    %c0_i32 = arith.constant 0 : i32
    %c0_i32_0 = arith.constant 0 : i32
    %c0_i32_1 = arith.constant 0 : i32
    %c0_i32_2 = arith.constant 0 : i32
    return %arg0, %c0_i32, %c0_i32_0, %c0_i32_1 : i32, i32, i32, i32
  }
}

</mosaic_0001>

<bundles_post_ra>
// kernel: tpu_custom_call.1
= control target key start
LH: loop header
LB: loop body
LE: loop exit
PB: predicated region body
PF: predicated region fallthrough
CT: control target
= control target key end

     0   :  { %10 = vsyncpa [#allocation4], 0  ;;  %s4445_s0 = inlined_call_operand.vmem [shape: f32[2,4,256], index: 0, kind: input, shape index: {}]   ;;  %s4446_s1 = inlined_call_operand.vmem [shape: f32[4,4], index: 1, kind: input, shape index: {}]   ;;  %s4447_s2 = inlined_call_operand.vmem [shape: f32[4,1], index: 2, kind: input, shape index: {}]   ;;  %s4448_s3 = inlined_call_operand.vmem [shape: f32[4,5,5], index: 3, kind: input, shape index: {}]   ;;  %s4449_s4 = inlined_call_operand.vmem [shape: f32[4,1,1], index: 4, kind: input, shape index: {}]   ;;  %s4450_s5 = inlined_call_operand.hbm [shape: f32[2,8,16,16], index: 5, kind: output, shape index: {}]  }
   0x1   :  { %12 = vsyncpa [#allocation4 + $0x1], 0  ;;  %s2978_s18 = smov 0   ;;  %s2980_s19 = smov 0  }
   0x2   :  { %s2982_s20 = smov 0   ;;  %s2984_s21 = smov 0  }
   0x3 LB: > { %s2999_s22 = sadd.s32 4294967295, %s2930_s21   ;;  %s2516_s23 = sadd.s32 4294967294, %s2930_s21   ;;  %s2930_s21 = sphi %s2984_s21, %s4506_s21   ;;  %s2926_s20 = sphi %s2982_s20, %s4505_s20   ;;  %s2922_s19 = sphi %s2980_s19, %s4504_s19   ;;  %s2918_s18 = sphi %s2978_s18, %s4503_s18  }
   0x4   : > { %s3003_s24 = sadd.s32 1, %s2930_s21   ;;  %s135_s25 = sadd.s32 1, %s2926_s20 }
   0x5   : > { %s132_s26 = ssub.s32 %s2930_s21, %s3003_s24  ;;  %p145_p0 = scmp.ne.s32.totalorder %s2926_s20, %s2922_s19 }
   0x6   : > { %p133_p1 = scmp.eq.s32.totalorder %s132_s26, 0  ;;  %p146_p2 = scmp.eq.s32.totalorder %s2999_s22, 1 }
   0x7   : > { %p151_p3 = scmp.ne.s32.totalorder %s2922_s19, %s2918_s18  ;;  %p152_p4 = scmp.eq.s32.totalorder %s2516_s23, 1 }
   0x8   : > { %s3014_s27 = scalar_select %p133_p1, %s2926_s20, %s135_s25  }
   0x9   : > { %p3016_p5 = por %p146_p2, %p145_p0  ;;  %p3020_p6 = por %p152_p4, %p151_p3 }
   0xa   : > { %p2519_p7 = scmp.ge.s32.totalorder %s2930_s21, 1  ;;  %p190_p8 = scmp.lt.s32.totalorder %s2930_s21, 3 }
   0xc   : > { %p191_p9 = pnand %p2519_p7, %p190_p8 }
   0xe   : > { %194 = sbr.rel (%p191_p9) target bundleno = 3385 (0xd39), region = 40 }
  0x13   : > { %p218_p10 = scmp.lt.s32.totalorder %s2999_s22, 1  ;;  %v2932_v0 = vmov 0   ;;  %v225_v1 = vld [vmem:[%s4447_s2] sm:$0xf]  ;;  %vm239_vm0 = vcmask 1043456   ;;  %vm235_vm1 = vcmask 31744  }
  0x14   : > { %2813 = vset.pattern.permute.xlu0 %v2932_v0  ;;  %2814 = vset.pattern.permute.xlu2 %v2932_v0  ;;  %v224_v3 = vld [vmem:[%s4446_s1] sm:$0xf]  ;;  %v3040_v6 = vld [vmem:[%s4448_s3 + $0x10] sm:$0x1f]  ;;  %v3045_v7 = vld [vmem:[%s4448_s3 + $0x8] sm:$0x1f] }
  0x15   : > { %s219_s7 = scalar_select %p218_p10, %s2999_s22, 1  ;;  %228 = vperm.xlu0 %2813, %v225_v1   ;;  %2815 = vset.pattern.permute.xlu1 %v2932_v0  ;;  %v3054_v8 = vld [vmem:[%s4448_s3] sm:$0x1f]  ;;  %v3064_v9 = vld [vmem:[%s4448_s3 + $0x18] sm:$0x1f]  ;;  %vm324_vm10 = vcmask 162816  }
  0x16   : > { %s2933_s23 = smov 127   ;;  %2558 = vpush %v3054_v8  ;;  %s2936_s9 = smov 2   ;;  %v2942_v52 = vmov 0.0   ;;  %vm358_vm11 = vcmask 139280   ;;  %vm327_vm12 = vcmask 158720   ;;  %vm2381_vm13 = vcmask 130048  }
  0x17   : > { %s2556_s8 = sshll.u32 %s219_s7, 3  ;;  %659 = vrot.lane.b32.xlu1 %v3040_v6, %s2933_s23  ;;  %655 = vrot.lane.b32.xlu2 %v3054_v8, %s2933_s23  ;;  %2560 = vpush %v3045_v7  ;;  %s2934_s7 = smov 82  }
  0x18   : > { %s222_s11 = scalar_lea.vmem %s4445_s0, %s2556_s8  ;;  %2562 = vpush %v3040_v6  ;;  %s2935_s8 = smov 114  }
  0x19   : > { %v223_v2 = vld [vmem:[%s222_s11] sm:$0xff]  ;;  %2564 = vpush %v3064_v9  ;;  %s2937_s10 = smov 34   ;;  %s2938_s11 = smov 66  }
  0x1a   : > { %232 = vst [vmem:[#allocation1] ss:$2 sm:$0xff] %v223_v2  ;;  %s2939_s12 = smov 98   ;;  %s2940_s13 = smov 18  }
  0x1b   : > { %s2941_s14 = smov 50   ;;  %325 = vst.msk [vmem:[#allocation2] sm:$0xff] %vm324_vm10, %v2942_v52  ;;  %s2943_s15 = smov 126  }
  0x1c   : > { %326 = vst.msk [vmem:[#allocation2 + $0x8] sm:$0xff] %vm324_vm10, %v2942_v52  ;;  %s2944_s16 = smov 125   ;;  %s2945_s6 = smov 124  }
  0x1d   : > { %657 = vrot.lane.b32.xlu0 %v3045_v7, %s2933_s23  ;;  %329 = vst.msk [vmem:[#allocation2 + $0x18] sm:$0xff] %vm324_vm10, %v2942_v52 }
  0x1e   : > { %330 = vst.msk [vmem:[#allocation2 + $0x20] sm:$0xff] %vm324_vm10, %v2942_v52 }
  0x1f   : > { %661 = vrot.lane.b32.xlu2 %v3064_v9, %s2933_s23  ;;  %332 = vst.msk [vmem:[#allocation2 + $0x30] sm:$0xff] %vm324_vm10, %v2942_v52 }
  0x20   : > { %333 = vst.msk [vmem:[#allocation2 + $0x38] sm:$0xff] %vm324_vm10, %v2942_v52 }
  0x21   : > { %v233_v4 = vld.sshfl [vmem:[#allocation1] sm:$0xff pattern:$0x75316420]  ;;  %v234_v5 = vld.sshfl [vmem:[#allocation1 + $0x8] sm:$0xff pattern:$0x75316420] }
  0x22   : > { %2523 = vmatpush.msk.msra.mxu0 %vm239_vm0, %v233_v4  ;;  %2525 = vmatpush.msk.msra.mxu1 %vm239_vm0, %v234_v5  ;;  %335 = vst.msk [vmem:[#allocation2 + $0x48] sm:$0xff] %vm324_vm10, %v2942_v52 }
  0x23   : > { %2524 = vmatmul.msk.f32.vlgmr.msra.gmra.mxu0 %vm235_vm1, %v224_v3  ;;  %2526 = vmatmul.msk.f32.vlgmr.msra.gmra.mxu1 %vm235_vm1, %v224_v3  ;;  %336 = vst.msk [vmem:[#allocation2 + $0x50] sm:$0xff] %vm324_vm10, %v2942_v52 }
  0x24   : > { %328 = vst.msk [vmem:[#allocation2 + $0x10] sm:$0xf] %vm327_vm12, %v2942_v52 }
  0x25   : > { %331 = vst.msk [vmem:[#allocation2 + $0x28] sm:$0xf] %vm327_vm12, %v2942_v52 }
  0x26   : > { %334 = vst.msk [vmem:[#allocation2 + $0x40] sm:$0xf] %vm327_vm12, %v2942_v52 }
  0x27   : > { %337 = vst.msk [vmem:[#allocation2 + $0x58] sm:$0xf] %vm327_vm12, %v2942_v52 }
  0x47   : > { %s3196_s17 = spop %2558 }
  0x48   : > { %s3200_s25 = spop %2560 }
  0x49   : > { %s3203_s26 = spop %2562 }
  0x4a   : > { %s3209_s30 = spop %2564 }
  0x71   : > { %v656_v50 = vpop.permute.xlu2 %655 }
  0x72   : > { %2566 = vpush %v656_v50 }
  0x79   : > { %v662_v55 = vpop.permute.xlu2 %661 }
  0x87   : > { %v229_v10 = vpop.permute.xlu0 %228 }
  0x89   : > { %v660_v54 = vpop.permute.xlu1 %659 }
  0x8f   : > { %v658_v53 = vpop.permute.xlu0 %657 }
  0x90   : > { %2568 = vpush %v658_v53 }
  0x91   : > { %2570 = vpush %v660_v54 }
  0x92   : > { %2572 = vpush %v662_v55 }
  0xa0   : > { %v261_v11 = vpop.f32.mrf.mxu0  ;;  %v281_v12 = vpop.f32.mrf.mxu1 }
  0xa1   : > { %v262_v13 = vadd.f32 %v261_v11, %v229_v10  ;;  %v282_v14 = vadd.f32 %v281_v12, %v229_v10 }
  0xa3   : > { %v2527_v15 = vmul.f32 -1.442695, %v262_v13  ;;  %v2528_v16 = vmul.f32 -1.442695, %v282_v14 }
  0xa5   : > { %2820 = vpow2.f32 %v2527_v15 }
  0xa6   : > { %2822 = vpow2.f32 %v2528_v16 }
  0xab   : > { %v2821_v17 = vpop.eup %2820 }
  0xac   : > { %v2823_v18 = vpop.eup %2822  ;;  %v290_v19 = vadd.f32 1.0, %v2821_v17 }
  0xad   : > { %v291_v20 = vadd.f32 1.0, %v2823_v18 }
  0xae   : > { %2824 = vrcp.f32 %v290_v19  ;;  %v303_v26 = vand.u32 2147483648, %v290_v19  ;;  %v301_v28 = vand.u32 2147483647, %v290_v19  ;;  %vm297_vm3 = vweird.f32 %v290_v19 }
  0xaf   : > { %2826 = vrcp.f32 %v291_v20  ;;  %v318_v38 = vand.u32 2147483648, %v291_v20  ;;  %vm312_vm7 = vweird.f32 %v291_v20  ;;  %v316_v39 = vand.u32 2147483647, %v291_v20 }
  0xb0   : > { %v304_v31 = vor.u32 1.1754944e-38, %v303_v26  ;;  %vm302_vm5 = vcmp.eq.f32.partialorder %v301_v28, 8.507059e+37 }
  0xb1   : > { %v319_v41 = vor.u32 1.1754944e-38, %v318_v38  ;;  %vm317_vm9 = vcmp.eq.f32.partialorder %v316_v39, 8.507059e+37 }
  0xb4   : > { %v2825_v21 = vpop.eup %2824 }
  0xb5   : > { %v2827_v22 = vpop.eup %2826  ;;  %v293_v23 = vmul.f32 %v2825_v21, %v290_v19  ;;  %vm298_vm2 = vweird.f32 %v2825_v21 }
  0xb6   : > { %v308_v25 = vmul.f32 %v2827_v22, %v291_v20  ;;  %vm299_vm4 = vmor %vm297_vm3, %vm298_vm2  ;;  %vm313_vm6 = vweird.f32 %v2827_v22 }
  0xb7   : > { %v294_v24 = vsub.f32 1.0, %v293_v23  ;;  %vm314_vm8 = vmor %vm312_vm7, %vm313_vm6 }
  0xb8   : > { %v309_v30 = vsub.f32 1.0, %v308_v25 }
  0xb9   : > { %v295_v27 = vmul.f32 %v2825_v21, %v294_v24 }
  0xba   : > { %v310_v35 = vmul.f32 %v2827_v22, %v309_v30 }
  0xbb   : > { %v296_v29 = vadd.f32 %v2825_v21, %v295_v27 }
  0xbc   : > { %v311_v37 = vadd.f32 %v2827_v22, %v310_v35 }
  0xbd   : > { %v300_v32 = vsel %vm299_vm4, %v2825_v21, %v296_v29 }
  0xbe   : > { %v305_v33 = vsel %vm302_vm5, %v304_v31, %v300_v32  ;;  %v315_v40 = vsel %vm314_vm8, %v2827_v22, %v311_v37 }
  0xbf   : > { %v322_v34 = vmul.f32 %v305_v33, %v262_v13  ;;  %v320_v42 = vsel %vm317_vm9, %v319_v41, %v315_v40 }
  0xc0   : > { %v3075_v43 = vmul.f32 %v320_v42, %v282_v14 }
  0xc1   : > { %v342_v36 = vperm.slane %v322_v34, 0  ;;  %v339_v45 = vrot.slane %v322_v34, 1  ;;  %v341_v46 = vrot.slane %v322_v34, 3  ;;  %v340_v49 = vrot.slane %v322_v34, 2 }
  0xc2   : > { %v479_v44 = vperm.slane %v3075_v43, 0  ;;  %v477_v57 = vrot.slane %v3075_v43, 2  ;;  %v478_v59 = vrot.slane %v3075_v43, 3  ;;  %v476_v62 = vrot.slane %v3075_v43, 1 }
  0xc3   : > { %395 = vrot.lane.b32.xlu1 %v342_v36, %s2934_s7  ;;  %363 = vrot.lane.b32.xlu2 %v342_v36, %s2935_s8  ;;  %v343_v47 = vperm.slane %v339_v45, 0  ;;  %v345_v48 = vperm.slane %v341_v46, 0  ;;  %v344_v51 = vperm.slane %v340_v49, 0  ;;  %v3241_v49 = vrot.slane %v3054_v8, 1 }
  0xc4   : > { %346 = vrot.lane.b32.xlu0 %v342_v36, %s2936_s9  ;;  %v3115_v60 = vperm.slane %v477_v57, 0  ;;  %v3117_v61 = vperm.slane %v478_v59, 0  ;;  %v480_v0 = vperm.slane %v476_v62, 0 }
  0xcb   : > { %443 = vrot.lane.b32.xlu1 %v342_v36, %s2937_s10  ;;  %411 = vrot.lane.b32.xlu2 %v342_v36, %s2938_s11 }
  0xcc   : > { %379 = vrot.lane.b32.xlu0 %v342_v36, %s2939_s12 }
  0xd3   : > { %499 = vrot.lane.b32.xlu1 %v479_v44, %s2935_s8  ;;  %459 = vrot.lane.b32.xlu2 %v342_v36, %s2940_s13 }
  0xd4   : > { %427 = vrot.lane.b32.xlu0 %v342_v36, %s2941_s14 }
  0xdb   : > { %547 = vrot.lane.b32.xlu1 %v479_v44, %s2938_s11  ;;  %515 = vrot.lane.b32.xlu2 %v479_v44, %s2939_s12 }
  0xdc   : > { %483 = vrot.lane.b32.xlu0 %v479_v44, %s2936_s9 }
  0xe3   : > { %595 = vrot.lane.b32.xlu1 %v479_v44, %s2940_s13  ;;  %563 = vrot.lane.b32.xlu2 %v479_v44, %s2941_s14 }
  0xe4   : > { %531 = vrot.lane.b32.xlu0 %v479_v44, %s2934_s7 }
  0xeb   : > { %352 = vrot.lane.b32.xlu2 %v345_v48, %s2936_s9  ;;  %348 = vrot.lane.b32.xlu1 %v343_v47, %s2936_s9 }
  0xec   : > { %579 = vrot.lane.b32.xlu0 %v479_v44, %s2937_s10 }
  0xf3   : > { %369 = vrot.lane.b32.xlu2 %v345_v48, %s2935_s8  ;;  %350 = vrot.lane.b32.xlu1 %v344_v51, %s2936_s9 }
  0xf4   : > { %365 = vrot.lane.b32.xlu0 %v343_v47, %s2935_s8 }
  0xfb   : > { %383 = vrot.lane.b32.xlu2 %v344_v51, %s2939_s12  ;;  %367 = vrot.lane.b32.xlu1 %v344_v51, %s2935_s8 }
  0xfc   : > { %385 = vrot.lane.b32.xlu0 %v345_v48, %s2939_s12 }
 0x103   : > { %397 = vrot.lane.b32.xlu2 %v343_v47, %s2934_s7  ;;  %381 = vrot.lane.b32.xlu1 %v343_v47, %s2939_s12 }
 0x104   : > { %399 = vrot.lane.b32.xlu0 %v344_v51, %s2934_s7 }
 0x10b   : > { %417 = vrot.lane.b32.xlu2 %v345_v48, %s2938_s11  ;;  %401 = vrot.lane.b32.xlu1 %v345_v48, %s2934_s7 }
 0x10c   : > { %413 = vrot.lane.b32.xlu0 %v343_v47, %s2938_s11 }
 0x113   : > { %431 = vrot.lane.b32.xlu2 %v344_v51, %s2941_s14  ;;  %415 = vrot.lane.b32.xlu1 %v344_v51, %s2938_s11 }
 0x114   : > { %433 = vrot.lane.b32.xlu0 %v345_v48, %s2941_s14 }
 0x11b   : > { %445 = vrot.lane.b32.xlu2 %v343_v47, %s2937_s10  ;;  %429 = vrot.lane.b32.xlu1 %v343_v47, %s2941_s14 }
 0x11c   : > { %447 = vrot.lane.b32.xlu0 %v344_v51, %s2937_s10 }
 0x11d   : > { %v364_v56 = vpop.permute.xlu2 %363 }
 0x11e   : > { %375 = vst.msk [vmem:[#allocation2 + $0x3] sm:$0x1] %vm358_vm11, %v364_v56 }
 0x123   : > { %465 = vrot.lane.b32.xlu2 %v345_v48, %s2940_s13  ;;  %449 = vrot.lane.b32.xlu1 %v345_v48, %s2937_s10 }
 0x124   : > { %461 = vrot.lane.b32.xlu0 %v343_v47, %s2940_s13 }
 0x125   : > { %v412_v58 = vpop.permute.xlu2 %411 }
 0x126   : > { %423 = vst.msk [vmem:[#allocation2 + $0x6] sm:$0x1] %vm358_vm11, %v412_v58 }
 0x12b   : > { %487 = vrot.lane.b32.xlu2 %v3115_v60, %s2936_s9  ;;  %463 = vrot.lane.b32.xlu1 %v344_v51, %s2940_s13 }
 0x12c   : > { %489 = vrot.lane.b32.xlu0 %v3117_v61, %s2936_s9 }
 0x12d   : > { %v460_v63 = vpop.permute.xlu2 %459 }
 0x12e   : > { %471 = vst.msk [vmem:[#allocation2 + $0x9] sm:$0x1] %vm358_vm11, %v460_v63 }
 0x133   : > { %501 = vrot.lane.b32.xlu2 %v480_v0, %s2935_s8  ;;  %485 = vrot.lane.b32.xlu1 %v480_v0, %s2936_s9 }
 0x134   : > { %503 = vrot.lane.b32.xlu0 %v3115_v60, %s2935_s8 }
 0x135   : > { %v396_v1 = vpop.permute.xlu1 %395  ;;  %v516_v2 = vpop.permute.xlu2 %515 }
 0x136   : > { %407 = vst.msk [vmem:[#allocation2 + $0x5] sm:$0x1] %vm358_vm11, %v396_v1  ;;  %v347_v3 = vpop.permute.xlu0 %346 }
 0x137   : > { %527 = vst.msk [vmem:[#allocation2 + $0xc] sm:$0x1] %vm358_vm11, %v516_v2 }
 0x138   : > { %359 = vst.msk [vmem:[#allocation2 + $0x2] sm:$0x1] %vm358_vm11, %v347_v3 }
 0x13b   : > { %521 = vrot.lane.b32.xlu2 %v3117_v61, %s2939_s12  ;;  %505 = vrot.lane.b32.xlu1 %v3117_v61, %s2935_s8 }
 0x13c   : > { %517 = vrot.lane.b32.xlu0 %v480_v0, %s2939_s12 }
 0x13d   : > { %v444_v4 = vpop.permute.xlu1 %443  ;;  %v564_v5 = vpop.permute.xlu2 %563 }
 0x13e   : > { %455 = vst.msk [vmem:[#allocation2 + $0x8] sm:$0x1] %vm358_vm11, %v444_v4  ;;  %v380_v10 = vpop.permute.xlu0 %379 }
 0x13f   : > { %575 = vst.msk [vmem:[#allocation2 + $0xf] sm:$0x1] %vm358_vm11, %v564_v5 }
 0x140   : > { %391 = vst.msk [vmem:[#allocation2 + $0x4] sm:$0x1] %vm358_vm11, %v380_v10 }
 0x143   : > { %535 = vrot.lane.b32.xlu2 %v3115_v60, %s2934_s7  ;;  %519 = vrot.lane.b32.xlu1 %v3115_v60, %s2939_s12 }
 0x144   : > { %537 = vrot.lane.b32.xlu0 %v3117_v61, %s2934_s7 }
 0x145   : > { %v500_v11 = vpop.permute.xlu1 %499  ;;  %v353_v12 = vpop.permute.xlu2 %352 }
 0x146   : > { %511 = vst.msk [vmem:[#allocation2 + $0xb] sm:$0x1] %vm358_vm11, %v500_v11  ;;  %v428_v13 = vpop.permute.xlu0 %427 }
 0x147   : > { %439 = vst.msk [vmem:[#allocation2 + $0x7] sm:$0x1] %vm358_vm11, %v428_v13 }
 0x148   : > { %362 = vst.msk [vmem:[#allocation2 + $0x4a] sm:$0x1] %vm358_vm11, %v353_v12 }
 0x14b   : > { %549 = vrot.lane.b32.xlu2 %v480_v0, %s2938_s11  ;;  %533 = vrot.lane.b32.xlu1 %v480_v0, %s2934_s7  ;;  %s2567_s7 = spop %2566 }
 0x14c   : > { %551 = vrot.lane.b32.xlu0 %v3115_v60, %s2938_s11  ;;  %v664_v36 = vstv %s2567_s7  ;;  %s3249_s8 = spop %2568 }
 0x14d   : > { %v548_v14 = vpop.permute.xlu1 %547  ;;  %v370_v15 = vpop.permute.xlu2 %369  ;;  %s3274_s9 = spop %2570 }
 0x14e   : > { %559 = vst.msk [vmem:[#allocation2 + $0xe] sm:$0x1] %vm358_vm11, %v548_v14  ;;  %v484_v16 = vpop.permute.xlu0 %483  ;;  %v3214_v35 = vld [vmem:[#allocation2] sm:$0xff]  ;;  %v670_v13 = vstv %s3274_s9 }
 0x14f   : > { %495 = vst.msk [vmem:[#allocation2 + $0xa] sm:$0x1] %vm358_vm11, %v484_v16  ;;  %v675_v37 = vmul.f32 %v664_v36, %v3214_v35 }
 0x150   : > { %378 = vst.msk [vmem:[#allocation2 + $0x4b] sm:$0x1] %vm358_vm11, %v370_v15 }
 0x153   : > { %569 = vrot.lane.b32.xlu2 %v3117_v61, %s2941_s14  ;;  %553 = vrot.lane.b32.xlu1 %v3117_v61, %s2938_s11 }
 0x154   : > { %565 = vrot.lane.b32.xlu0 %v480_v0, %s2941_s14 }
 0x155   : > { %v596_v17 = vpop.permute.xlu1 %595  ;;  %v384_v18 = vpop.permute.xlu2 %383 }
 0x156   : > { %607 = vst.msk [vmem:[#allocation2 + $0x11] sm:$0x1] %vm358_vm11, %v596_v17  ;;  %v532_v19 = vpop.permute.xlu0 %531 }
 0x157   : > { %543 = vst.msk [vmem:[#allocation2 + $0xd] sm:$0x1] %vm358_vm11, %v532_v19 }
 0x158   : > { %393 = vst.msk [vmem:[#allocation2 + $0x34] sm:$0x1] %vm358_vm11, %v384_v18 }
 0x15b   : > { %583 = vrot.lane.b32.xlu2 %v3115_v60, %s2937_s10  ;;  %567 = vrot.lane.b32.xlu1 %v3115_v60, %s2941_s14 }
 0x15c   : > { %585 = vrot.lane.b32.xlu0 %v3117_v61, %s2937_s10 }
 0x15d   : > { %v398_v20 = vpop.permute.xlu2 %397  ;;  %v349_v21 = vpop.permute.xlu1 %348 }
 0x15e   : > { %v580_v22 = vpop.permute.xlu0 %579  ;;  %408 = vst.msk [vmem:[#allocation2 + $0x1d] sm:$0x1] %vm358_vm11, %v398_v20  ;;  %v3225_v41 = vld [vmem:[#allocation2 + $0x8] sm:$0xff] }
 0x15f   : > { %591 = vst.msk [vmem:[#allocation2 + $0x10] sm:$0x1] %vm358_vm11, %v580_v22  ;;  %v676_v42 = vmul.f32 %v664_v36, %v3225_v41 }
 0x160   : > { %360 = vst.msk [vmem:[#allocation2 + $0x1a] sm:$0x1] %vm358_vm11, %v349_v21 }
 0x163   : > { %597 = vrot.lane.b32.xlu2 %v480_v0, %s2940_s13  ;;  %581 = vrot.lane.b32.xlu1 %v480_v0, %s2937_s10  ;;  %s3295_s10 = spop %2572 }
 0x164   : > { %599 = vrot.lane.b32.xlu0 %v3115_v60, %s2940_s13 }
 0x165   : > { %v418_v23 = vpop.permute.xlu2 %417  ;;  %v351_v24 = vpop.permute.xlu1 %350 }
 0x166   : > { %426 = vst.msk [vmem:[#allocation2 + $0x4e] sm:$0x1] %vm358_vm11, %v418_v23  ;;  %v366_v25 = vpop.permute.xlu0 %365 }
 0x167   : > { %376 = vst.msk [vmem:[#allocation2 + $0x1b] sm:$0x1] %vm358_vm11, %v366_v25 }
 0x168   : > { %361 = vst.msk [vmem:[#allocation2 + $0x32] sm:$0x1] %vm358_vm11, %v351_v24 }
 0x16b   : > { %723 = vrot.lane.b32.xlu2 %v3054_v8, %s2943_s15  ;;  %601 = vrot.lane.b32.xlu1 %v3117_v61, %s2940_s13 }
 0x16c   : > { %725 = vrot.lane.b32.xlu0 %v3045_v7, %s2943_s15 }
 0x16d   : > { %v432_v26 = vpop.permute.xlu2 %431  ;;  %v368_v27 = vpop.permute.xlu1 %367 }
 0x16e   : > { %441 = vst.msk [vmem:[#allocation2 + $0x37] sm:$0x1] %vm358_vm11, %v432_v26  ;;  %v386_v28 = vpop.permute.xlu0 %385 }
 0x16f   : > { %394 = vst.msk [vmem:[#allocation2 + $0x4c] sm:$0x1] %vm358_vm11, %v386_v28 }
 0x170   : > { %377 = vst.msk [vmem:[#allocation2 + $0x33] sm:$0x1] %vm358_vm11, %v368_v27 }
 0x173   : > { %729 = vrot.lane.b32.xlu2 %v3064_v9, %s2943_s15  ;;  %727 = vrot.lane.b32.xlu1 %v3040_v6, %s2943_s15 }
 0x174   : > { %793 = vrot.lane.b32.xlu0 %v3045_v7, %s2944_s16 }
 0x175   : > { %v446_v29 = vpop.permute.xlu2 %445  ;;  %v382_v30 = vpop.permute.xlu1 %381 }
 0x176   : > { %456 = vst.msk [vmem:[#allocation2 + $0x20] sm:$0x1] %vm358_vm11, %v446_v29  ;;  %v400_v31 = vpop.permute.xlu0 %399  ;;  %v3287_v29 = vrot.slane %v3045_v7, 1 }
 0x177   : > { %409 = vst.msk [vmem:[#allocation2 + $0x35] sm:$0x1] %vm358_vm11, %v400_v31  ;;  %v3293_v31 = vrot.slane %v3064_v9, 1 }
 0x178   : > { %392 = vst.msk [vmem:[#allocation2 + $0x1c] sm:$0x1] %vm358_vm11, %v382_v30  ;;  %v3290_v30 = vrot.slane %v3040_v6, 1 }
 0x17b   : > { %791 = vrot.lane.b32.xlu2 %v3054_v8, %s2944_s16  ;;  %795 = vrot.lane.b32.xlu1 %v3040_v6, %s2944_s16 }
 0x17c   : > { %861 = vrot.lane.b32.xlu0 %v3045_v7, %s2945_s6 }
 0x17d   : > { %v466_v32 = vpop.permute.xlu2 %465  ;;  %v402_v33 = vpop.permute.xlu1 %401 }
 0x17e   : > { %474 = vst.msk [vmem:[#allocation2 + $0x51] sm:$0x1] %vm358_vm11, %v466_v32  ;;  %v414_v34 = vpop.permute.xlu0 %413 }
 0x17f   : > { %424 = vst.msk [vmem:[#allocation2 + $0x1e] sm:$0x1] %vm358_vm11, %v414_v34 }
 0x180   : > { %410 = vst.msk [vmem:[#allocation2 + $0x4d] sm:$0x1] %vm358_vm11, %v402_v33 }
 0x183   : > { %797 = vrot.lane.b32.xlu2 %v3064_v9, %s2944_s16  ;;  %863 = vrot.lane.b32.xlu1 %v3040_v6, %s2945_s6 }
 0x184   : > { %691 = vrot.lane.b32.xlu0 %v675_v37, %s2933_s23 }
 0x185   : > { %v488_v38 = vpop.permute.xlu2 %487  ;;  %v416_v39 = vpop.permute.xlu1 %415 }
 0x186   : > { %497 = vst.msk [vmem:[#allocation2 + $0x3a] sm:$0x1] %vm358_vm11, %v488_v38  ;;  %v434_v40 = vpop.permute.xlu0 %433 }
 0x187   : > { %442 = vst.msk [vmem:[#allocation2 + $0x4f] sm:$0x1] %vm358_vm11, %v434_v40 }
 0x188   : > { %425 = vst.msk [vmem:[#allocation2 + $0x36] sm:$0x1] %vm358_vm11, %v416_v39 }
 0x18b   : > { %859 = vrot.lane.b32.xlu2 %v3054_v8, %s2945_s6  ;;  %693 = vrot.lane.b32.xlu1 %v676_v42, %s2933_s23  ;;  %v667_v8 = vstv %s3249_s8 }
 0x18d   : > { %v502_v43 = vpop.permute.xlu2 %501  ;;  %v430_v44 = vpop.permute.xlu1 %429 }
 0x18e   : > { %512 = vst.msk [vmem:[#allocation2 + $0x23] sm:$0x1] %vm358_vm11, %v502_v43  ;;  %v448_v45 = vpop.permute.xlu0 %447 }
 0x18f   : > { %457 = vst.msk [vmem:[#allocation2 + $0x38] sm:$0x1] %vm358_vm11, %v448_v45 }
 0x190   : > { %440 = vst.msk [vmem:[#allocation2 + $0x1f] sm:$0x1] %vm358_vm11, %v430_v44 }
 0x193   : > { %865 = vrot.lane.b32.xlu2 %v3064_v9, %s2945_s6 }
 0x195   : > { %v522_v46 = vpop.permute.xlu2 %521  ;;  %v450_v47 = vpop.permute.xlu1 %449 }
 0x196   : > { %530 = vst.msk [vmem:[#allocation2 + $0x54] sm:$0x1] %vm358_vm11, %v522_v46  ;;  %v462_v48 = vpop.permute.xlu0 %461 }
 0x197   : > { %472 = vst.msk [vmem:[#allocation2 + $0x21] sm:$0x1] %vm358_vm11, %v462_v48  ;;  %v3247_v53 = vld [vmem:[#allocation2 + $0x18] sm:$0xff] }
 0x198   : > { %458 = vst.msk [vmem:[#allocation2 + $0x50] sm:$0x1] %vm358_vm11, %v450_v47  ;;  %v677_v54 = vmul.f32 %v667_v8, %v3247_v53 }
 0x19b   : > { %967 = vrot.lane.b32.xlu2 %v3241_v49, %s2933_s23 }
 0x19d   : > { %v536_v50 = vpop.permute.xlu2 %535  ;;  %v464_v51 = vpop.permute.xlu1 %463 }
 0x19e   : > { %545 = vst.msk [vmem:[#allocation2 + $0x3d] sm:$0x1] %vm358_vm11, %v536_v50  ;;  %v490_v52 = vpop.permute.xlu0 %489  ;;  %v3337_v50 = vld [vmem:[#allocation2 + $0x30] sm:$0xff] }
 0x19f   : > { %498 = vst.msk [vmem:[#allocation2 + $0x52] sm:$0x1] %vm358_vm11, %v490_v52  ;;  %v679_v52 = vmul.f32 %v670_v13, %v3337_v50 }
 0x1a0   : > { %473 = vst.msk [vmem:[#allocation2 + $0x39] sm:$0x1] %vm358_vm11, %v464_v51 }
 0x1a3   : > { %695 = vrot.lane.b32.xlu2 %v677_v54, %s2933_s23 }
 0x1a5   : > { %v550_v55 = vpop.permute.xlu2 %549  ;;  %v486_v56 = vpop.permute.xlu1 %485 }
 0x1a6   : > { %560 = vst.msk [vmem:[#allocation2 + $0x26] sm:$0x1] %vm358_vm11, %v550_v55  ;;  %v504_v57 = vpop.permute.xlu0 %503 }
 0x1a7   : > { %513 = vst.msk [vmem:[#allocation2 + $0x3b] sm:$0x1] %vm358_vm11, %v504_v57 }
 0x1a8   : > { %496 = vst.msk [vmem:[#allocation2 + $0x22] sm:$0x1] %vm358_vm11, %v486_v56  ;;  %v3352_v56 = vld [vmem:[#allocation2 + $0x48] sm:$0xff] }
 0x1ad   : > { %v570_v58 = vpop.permute.xlu2 %569  ;;  %v506_v59 = vpop.permute.xlu1 %505 }
 0x1ae   : > { %578 = vst.msk [vmem:[#allocation2 + $0x57] sm:$0x1] %vm358_vm11, %v570_v58  ;;  %v518_v60 = vpop.permute.xlu0 %517  ;;  %v673_v58 = vstv %s3295_s10 }
 0x1af   : > { %528 = vst.msk [vmem:[#allocation2 + $0x24] sm:$0x1] %vm358_vm11, %v518_v60  ;;  %v681_v60 = vmul.f32 %v673_v58, %v3352_v56 }
 0x1b0   : > { %514 = vst.msk [vmem:[#allocation2 + $0x53] sm:$0x1] %vm358_vm11, %v506_v59 }
 0x1b5   : > { %v584_v61 = vpop.permute.xlu2 %583  ;;  %v520_v62 = vpop.permute.xlu1 %519 }
 0x1b6   : > { %593 = vst.msk [vmem:[#allocation2 + $0x40] sm:$0x1] %vm358_vm11, %v584_v61  ;;  %v538_v63 = vpop.permute.xlu0 %537 }
 0x1b7   : > { %546 = vst.msk [vmem:[#allocation2 + $0x55] sm:$0x1] %vm358_vm11, %v538_v63 }
 0x1b8   : > { %529 = vst.msk [vmem:[#allocation2 + $0x3c] sm:$0x1] %vm358_vm11, %v520_v62 }
 0x1bd   : > { %v598_v0 = vpop.permute.xlu2 %597  ;;  %v534_v1 = vpop.permute.xlu1 %533 }
 0x1be   : > { %608 = vst.msk [vmem:[#allocation2 + $0x29] sm:$0x1] %vm358_vm11, %v598_v0  ;;  %v552_v2 = vpop.permute.xlu0 %551 }
 0x1bf   : > { %561 = vst.msk [vmem:[#allocation2 + $0x3e] sm:$0x1] %vm358_vm11, %v552_v2 }
 0x1c0   : > { %544 = vst.msk [vmem:[#allocation2 + $0x25] sm:$0x1] %vm358_vm11, %v534_v1 }
 0x1c5   : > { %v724_v3 = vpop.permute.xlu2 %723  ;;  %v554_v4 = vpop.permute.xlu1 %553 }
 0x1c6   : > { %v566_v5 = vpop.permute.xlu0 %565  ;;  %562 = vst.msk [vmem:[#allocation2 + $0x56] sm:$0x1] %vm358_vm11, %v554_v4 }
 0x1c7   : > { %576 = vst.msk [vmem:[#allocation2 + $0x27] sm:$0x1] %vm358_vm11, %v566_v5 }
 0x1c8   : > { %2574 = vpush %v724_v3 }
 0x1cd   : > { %v730_v10 = vpop.permute.xlu2 %729  ;;  %v568_v11 = vpop.permute.xlu1 %567  ;;  %v3354_v57 = vld [vmem:[#allocation2 + $0x50] sm:$0xff] }
 0x1ce   : > { %v586_v12 = vpop.permute.xlu0 %585  ;;  %577 = vst.msk [vmem:[#allocation2 + $0x3f] sm:$0x1] %vm358_vm11, %v568_v11  ;;  %v3335_v48 = vld [vmem:[#allocation2 + $0x20] sm:$0xff] }
 0x1cf   : > { %594 = vst.msk [vmem:[#allocation2 + $0x58] sm:$0x1] %vm358_vm11, %v586_v12  ;;  %v678_v54 = vmul.f32 %v667_v8, %v3335_v48  ;;  %v682_v8 = vmul.f32 %v673_v58, %v3354_v57 }
 0x1d5   : > { %v792_v14 = vpop.permute.xlu2 %791  ;;  %v582_v15 = vpop.permute.xlu1 %581  ;;  %v3277_v16 = vld [vmem:[#allocation2 + $0x38] sm:$0xff] }
 0x1d6   : > { %v600_v17 = vpop.permute.xlu0 %599  ;;  %592 = vst.msk [vmem:[#allocation2 + $0x28] sm:$0x1] %vm358_vm11, %v582_v15  ;;  %v680_v18 = vmul.f32 %v670_v13, %v3277_v16 }
 0x1d7   : > { %609 = vst.msk [vmem:[#allocation2 + $0x41] sm:$0x1] %vm358_vm11, %v600_v17 }
 0x1d8   : > { %701 = vrot.lane.b32.xlu2 %v680_v18, %s2933_s23 }
 0x1dd   : > { %v798_v19 = vpop.permute.xlu2 %797  ;;  %v602_v20 = vpop.permute.xlu1 %601 }
 0x1de   : > { %v726_v21 = vpop.permute.xlu0 %725  ;;  %610 = vst.msk [vmem:[#allocation2 + $0x59] sm:$0x1] %vm358_vm11, %v602_v20  ;;  %v3405_v20 = vld [vmem:[#allocation2 + $0x1] sm:$0xff] }
 0x1df   : > { %2576 = vpush %v726_v21  ;;  %v3407_v21 = vld [vmem:[#allocation2 + $0x9] sm:$0xff] }
 0x1e5   : > { %v860_v22 = vpop.permute.xlu2 %859  ;;  %v728_v23 = vpop.permute.xlu1 %727 }
 0x1e6   : > { %v794_v24 = vpop.permute.xlu0 %793  ;;  %2578 = vpush %v728_v23 }
 0x1e7   : > { %2580 = vpush %v730_v10 }
 0x1e8   : > { %2582 = vpush %v792_v14 }
 0x1e9   : > { %2584 = vpush %v794_v24 }
 0x1ed   : > { %v796_v25 = vpop.permute.xlu1 %795  ;;  %v866_v27 = vpop.permute.xlu2 %865 }
 0x1ee   : > { %v862_v26 = vpop.permute.xlu0 %861  ;;  %2586 = vpush %v796_v25 }
 0x1ef   : > { %2588 = vpush %v798_v19 }
 0x1f0   : > { %2590 = vpush %v860_v22 }
 0x1f1   : > { %2592 = vpush %v862_v26 }
 0x1f5   : > { %v864_v28 = vpop.permute.xlu1 %863  ;;  %v968_v32 = vpop.permute.xlu2 %967 }
 0x1f6   : > { %2594 = vpush %v864_v28  ;;  %v3413_v24 = vpop.permute.xlu0 %691 }
 0x1f7   : > { %2596 = vpush %v866_v27 }
 0x1f8   : > { %2598 = vpush %v3241_v49 }
 0x1f9   : > { %2600 = vpush %v3287_v29  ;;  %s2575_s11 = spop %2574 }
 0x1fa   : > { %2602 = vpush %v3290_v30  ;;  %v732_v7 = vstv %s2575_s11 }
 0x1fb   : > { %2604 = vpush %v3293_v31  ;;  %v743_v6 = vmul.f32 %v732_v7, %v3214_v35  ;;  %v744_v33 = vmul.f32 %v732_v7, %v3225_v41 }
 0x1fc   : > { %2606 = vpush %v968_v32 }
 0x1fd   : > { %759 = vrot.lane.b32.xlu0 %v743_v6, %s2943_s15  ;;  %761 = vrot.lane.b32.xlu1 %v744_v33, %s2943_s15  ;;  %v3415_v25 = vpop.permute.xlu1 %693  ;;  %v3425_v7 = vpop.permute.xlu2 %695 }
 0x210   : > { %s3305_s12 = spop %2576 }
 0x211   : > { %v735_v9 = vstv %s3305_s12 }
 0x212   : > { %v745_v34 = vmul.f32 %v735_v9, %v3247_v53  ;;  %v746_v63 = vmul.f32 %v735_v9, %v3335_v48 }
 0x214   : > { %763 = vrot.lane.b32.xlu2 %v745_v34, %s2943_s15 }
 0x217   : > { %s3310_s13 = spop %2578 }
 0x218   : > { %v738_v36 = vstv %s3310_s13  ;;  %s3313_s14 = spop %2580 }
 0x219   : > { %v748_v37 = vmul.f32 %v738_v36, %v3277_v16  ;;  %s2583_s7 = spop %2582  ;;  %v747_v0 = vmul.f32 %v738_v36, %v3337_v50  ;;  %v741_v1 = vstv %s3313_s14 }
 0x21a   : > { %v800_v38 = vstv %s2583_s7  ;;  %s3318_s11 = spop %2584  ;;  %v749_v2 = vmul.f32 %v741_v1, %v3352_v56  ;;  %v750_v3 = vmul.f32 %v741_v1, %v3354_v57 }
 0x21b   : > { %v811_v39 = vmul.f32 %v800_v38, %v3214_v35  ;;  %v812_v40 = vmul.f32 %v800_v38, %v3225_v41  ;;  %v803_v42 = vstv %s3318_s11 }
 0x21c   : > { %769 = vrot.lane.b32.xlu2 %v748_v37, %s2943_s15  ;;  %v813_v43 = vmul.f32 %v803_v42, %v3247_v53  ;;  %v814_v4 = vmul.f32 %v803_v42, %v3335_v48 }
 0x21d   : > { %829 = vrot.lane.b32.xlu1 %v812_v40, %s2944_s16  ;;  %827 = vrot.lane.b32.xlu0 %v811_v39, %s2944_s16 }
 0x21f   : > { %s3324_s12 = spop %2586 }
 0x220   : > { %s3326_s13 = spop %2588  ;;  %v806_v47 = vstv %s3324_s12 }
 0x221   : > { %s2591_s7 = spop %2590  ;;  %v816_v51 = vmul.f32 %v806_v47, %v3277_v16  ;;  %v815_v5 = vmul.f32 %v806_v47, %v3337_v50  ;;  %v809_v10 = vstv %s3326_s13 }
 0x222   : > { %v868_v44 = vstv %s2591_s7  ;;  %s3346_s11 = spop %2592  ;;  %v817_v11 = vmul.f32 %v809_v10, %v3352_v56  ;;  %v818_v12 = vmul.f32 %v809_v10, %v3354_v57 }
 0x223   : > { %v879_v45 = vmul.f32 %v868_v44, %v3214_v35  ;;  %v880_v46 = vmul.f32 %v868_v44, %v3225_v41  ;;  %v871_v55 = vstv %s3346_s11 }
 0x224   : > { %831 = vrot.lane.b32.xlu2 %v813_v43, %s2944_s16  ;;  %v881_v59 = vmul.f32 %v871_v55, %v3247_v53  ;;  %v882_v13 = vmul.f32 %v871_v55, %v3335_v48 }
 0x225   : > { %897 = vrot.lane.b32.xlu1 %v880_v46, %s2945_s6  ;;  %895 = vrot.lane.b32.xlu0 %v879_v45, %s2945_s6 }
 0x227   : > { %s2595_s8 = spop %2594 }
 0x228   : > { %v874_v61 = vstv %s2595_s8  ;;  %s2597_s9 = spop %2596 }
 0x229   : > { %v884_v62 = vmul.f32 %v874_v61, %v3277_v16  ;;  %v883_v14 = vmul.f32 %v874_v61, %v3337_v50  ;;  %v877_v15 = vstv %s2597_s9  ;;  %s3391_s10 = spop %2598 }
 0x22a   : > { %v885_v17 = vmul.f32 %v877_v15, %v3352_v56  ;;  %v886_v18 = vmul.f32 %v877_v15, %v3354_v57  ;;  %s3395_s14 = spop %2600 }
 0x22b   : > { %s3397_s12 = spop %2602 }
 0x22c   : > { %837 = vrot.lane.b32.xlu2 %v816_v51, %s2944_s16  ;;  %s3399_s13 = spop %2604 }
 0x22d   : > { %699 = vrot.lane.b32.xlu1 %v679_v52, %s2933_s23  ;;  %697 = vrot.lane.b32.xlu0 %v678_v54, %s2933_s23  ;;  %s2607_s7 = spop %2606 }
 0x22e   : > { %v976_v19 = vstv %s2607_s7 }
 0x22f   : > { %v987_v22 = vmul.f32 %v976_v19, %v3405_v20  ;;  %v988_v23 = vmul.f32 %v976_v19, %v3407_v21 }
 0x232   : > { %v3431_v9 = vpop.permute.xlu2 %701 }
 0x234   : > { %899 = vrot.lane.b32.xlu2 %v881_v59, %s2945_s6  ;;  %v637_v59 = vstv %s3209_s30 }
 0x235   : > { %705 = vrot.lane.b32.xlu1 %v682_v8, %s2933_s23  ;;  %703 = vrot.lane.b32.xlu0 %v681_v60, %s2933_s23  ;;  %v645_v61 = vmul.f32 %v637_v59, %v3352_v56 }
 0x23c   : > { %905 = vrot.lane.b32.xlu2 %v884_v62, %s2945_s6  ;;  %v646_v62 = vmul.f32 %v637_v59, %v3354_v57 }
 0x23d   : > { %767 = vrot.lane.b32.xlu1 %v747_v0, %s2943_s15  ;;  %765 = vrot.lane.b32.xlu0 %v746_v63, %s2943_s15 }
 0x244   : > { %973 = vrot.lane.b32.xlu2 %v3293_v31, %s2933_s23 }
 0x245   : > { %773 = vrot.lane.b32.xlu1 %v750_v3, %s2943_s15  ;;  %771 = vrot.lane.b32.xlu0 %v749_v2, %s2943_s15  ;;  %v949_v3 = vstv %s3399_s13 }
 0x24d   : > { %833 = vrot.lane.b32.xlu0 %v814_v4, %s2944_s16  ;;  %835 = vrot.lane.b32.xlu1 %v815_v5, %s2944_s16 }
 0x255   : > { %839 = vrot.lane.b32.xlu0 %v817_v11, %s2944_s16  ;;  %841 = vrot.lane.b32.xlu1 %v818_v12, %s2944_s16  ;;  %v3465_v11 = vld [vmem:[#allocation2 + $0x49] sm:$0xff]  ;;  %v3467_v12 = vld [vmem:[#allocation2 + $0x51] sm:$0xff] }
 0x256   : > { %v957_v15 = vmul.f32 %v949_v3, %v3465_v11  ;;  %v958_v56 = vmul.f32 %v949_v3, %v3467_v12 }
 0x25d   : > { %901 = vrot.lane.b32.xlu0 %v882_v13, %s2945_s6  ;;  %903 = vrot.lane.b32.xlu1 %v883_v14, %s2945_s6 }
 0x265   : > { %907 = vrot.lane.b32.xlu0 %v885_v17, %s2945_s6  ;;  %909 = vrot.lane.b32.xlu1 %v886_v18, %s2945_s6 }
 0x26d   : > { %969 = vrot.lane.b32.xlu0 %v3287_v29, %s2933_s23  ;;  %971 = vrot.lane.b32.xlu1 %v3290_v30, %s2933_s23 }
 0x26e   : > { %v3437_v37 = vpop.permute.xlu2 %763 }
 0x26f   : > { %v3417_v26 = vpop.permute.xlu0 %759  ;;  %v3419_v27 = vpop.permute.xlu1 %761 }
 0x275   : > { %1003 = vrot.lane.b32.xlu0 %v987_v22, %s2933_s23  ;;  %1005 = vrot.lane.b32.xlu1 %v988_v23, %s2933_s23 }
 0x276   : > { %v3439_v40 = vpop.permute.xlu2 %769 }
 0x27e   : > { %v3445_v46 = vpop.permute.xlu2 %831 }
 0x286   : > { %v3451_v52 = vpop.permute.xlu2 %837 }
 0x28e   : > { %v3453_v58 = vpop.permute.xlu2 %899 }
 0x28f   : > { %v3421_v28 = vpop.permute.xlu0 %827  ;;  %v3423_v32 = vpop.permute.xlu1 %829 }
 0x296   : > { %v3463_v4 = vpop.permute.xlu2 %905 }
 0x297   : > { %v3427_v6 = vpop.permute.xlu0 %895  ;;  %v3429_v33 = vpop.permute.xlu1 %897 }
 0x29e   : > { %v974_v22 = vpop.permute.xlu2 %973 }
 0x29f   : > { %v3433_v34 = vpop.permute.xlu0 %697  ;;  %v3435_v36 = vpop.permute.xlu1 %699 }
 0x2a7   : > { %v704_v38 = vpop.permute.xlu0 %703  ;;  %v706_v39 = vpop.permute.xlu1 %705 }
 0x2a8   : > { %v721_v63 = vadd.f32 %v704_v38, %v645_v61  ;;  %v722_v0 = vadd.f32 %v706_v39, %v646_v62  ;;  %v3475_v39 = vld [vmem:[#allocation2 + $0x19] sm:$0xff] }
 0x2af   : > { %v3441_v42 = vpop.permute.xlu0 %765  ;;  %v3443_v43 = vpop.permute.xlu1 %767 }
 0x2b7   : > { %v772_v44 = vpop.permute.xlu0 %771  ;;  %v774_v45 = vpop.permute.xlu1 %773 }
 0x2b8   : > { %v789_v1 = vadd.f32 %v772_v44, %v721_v63  ;;  %v790_v2 = vadd.f32 %v774_v45, %v722_v0  ;;  %v3477_v44 = vld [vmem:[#allocation2 + $0x21] sm:$0xff]  ;;  %v3487_v0 = vld [vmem:[#allocation2 + $0x39] sm:$0xff] }
 0x2bf   : > { %v3447_v47 = vpop.permute.xlu0 %833  ;;  %v3449_v51 = vpop.permute.xlu1 %835 }
 0x2c7   : > { %v840_v54 = vpop.permute.xlu0 %839  ;;  %v842_v55 = vpop.permute.xlu1 %841 }
 0x2c8   : > { %v857_v5 = vadd.f32 %v840_v54, %v789_v1  ;;  %v858_v10 = vadd.f32 %v842_v55, %v790_v2  ;;  %v3479_v54 = vld [vmem:[#allocation2 + $0x31] sm:$0xff] }
 0x2cf   : > { %v3456_v8 = vpop.permute.xlu0 %901  ;;  %v3458_v60 = vpop.permute.xlu1 %903 }
 0x2d7   : > { %v908_v13 = vpop.permute.xlu0 %907  ;;  %v910_v14 = vpop.permute.xlu1 %909 }
 0x2d8   : > { %v925_v57 = vadd.f32 %v908_v13, %v857_v5  ;;  %v926_v17 = vadd.f32 %v910_v14, %v858_v10 }
 0x2da   : > { %v3471_v18 = vadd.f32 %v957_v15, %v925_v57  ;;  %v3473_v19 = vadd.f32 %v958_v56, %v926_v17 }
 0x2dc   : > { %4462 = vst [vmem:[#allocation6_spill] sm:$0xff] %v3471_v18 }
 0x2dd   : > { %4463 = vst [vmem:[#allocation7_spill] sm:$0xff] %v3473_v19 }
 0x2df   : > { %v970_v23 = vpop.permute.xlu0 %969  ;;  %v972_v38 = vpop.permute.xlu1 %971 }
 0x2e0   : > { %2608 = vpush %v970_v23 }
 0x2e1   : > { %2610 = vpush %v972_v38 }
 0x2e2   : > { %2612 = vpush %v974_v22 }
 0x2e7   : > { %v3507_v13 = vpop.permute.xlu0 %1003  ;;  %v3509_v15 = vpop.permute.xlu1 %1005 }
 0x311   : > { %s2609_s30 = spop %2608 }
 0x312   : > { %v979_v45 = vstv %s2609_s30  ;;  %s2611_s11 = spop %2610 }
 0x313   : > { %v989_v55 = vmul.f32 %v979_v45, %v3475_v39  ;;  %v990_v59 = vmul.f32 %v979_v45, %v3477_v44  ;;  %v982_v61 = vstv %s2611_s11  ;;  %s2613_s8 = spop %2612 }
 0x314   : > { %v991_v62 = vmul.f32 %v982_v61, %v3479_v54  ;;  %v985_v63 = vstv %s2613_s8  ;;  %v992_v1 = vmul.f32 %v982_v61, %v3487_v0 }
 0x315   : > { %1009 = vrot.lane.b32.xlu0 %v990_v59, %s2933_s23  ;;  %1007 = vrot.lane.b32.xlu2 %v989_v55, %s2933_s23  ;;  %v993_v2 = vmul.f32 %v985_v63, %v3465_v11  ;;  %v994_v3 = vmul.f32 %v985_v63, %v3467_v12 }
 0x316   : > { %1011 = vrot.lane.b32.xlu1 %v991_v62, %s2933_s23 }
 0x31d   : > { %1015 = vrot.lane.b32.xlu0 %v993_v2, %s2933_s23  ;;  %1013 = vrot.lane.b32.xlu2 %v992_v1, %s2933_s23 }
 0x31e   : > { %1017 = vrot.lane.b32.xlu1 %v994_v3, %s2933_s23 }
 0x325   : > { %1037 = vrot.lane.b32.xlu0 %v3287_v29, %s2943_s15  ;;  %1035 = vrot.lane.b32.xlu2 %v3241_v49, %s2943_s15 }
 0x326   : > { %1039 = vrot.lane.b32.xlu1 %v3290_v30, %s2943_s15 }
 0x32d   : > { %1041 = vrot.lane.b32.xlu2 %v3293_v31, %s2943_s15 }
 0x36f   : > { %v3503_v5 = vpop.permute.xlu2 %1007 }
 0x377   : > { %v3505_v10 = vpop.permute.xlu2 %1013 }
 0x37f   : > { %v1036_v14 = vpop.permute.xlu2 %1035 }
 0x380   : > { %2614 = vpush %v1036_v14 }
 0x387   : > { %v3511_v56 = vpop.permute.xlu0 %1009  ;;  %v1042_v38 = vpop.permute.xlu2 %1041 }
 0x388   : > { %v3513_v57 = vpop.permute.xlu1 %1011 }
 0x38f   : > { %v3515_v17 = vpop.permute.xlu0 %1015 }
 0x390   : > { %4464 = vst [vmem:[#allocation8_spill] sm:$0xff] %v3515_v17  ;;  %v3517_v22 = vpop.permute.xlu1 %1017 }
 0x391   : > { %4465 = vst [vmem:[#allocation9_spill] sm:$0xff] %v3517_v22 }
 0x397   : > { %v1038_v23 = vpop.permute.xlu0 %1037 }
 0x398   : > { %v1040_v45 = vpop.permute.xlu1 %1039  ;;  %2616 = vpush %v1038_v23 }
 0x399   : > { %2618 = vpush %v1040_v45 }
 0x39a   : > { %2620 = vpush %v1042_v38 }
 0x3b1   : > { %s2615_s9 = spop %2614 }
 0x3b2   : > { %v1044_v55 = vstv %s2615_s9 }
 0x3b3   : > { %v1055_v59 = vmul.f32 %v1044_v55, %v3405_v20  ;;  %v1056_v61 = vmul.f32 %v1044_v55, %v3407_v21 }
 0x3b5   : > { %1071 = vrot.lane.b32.xlu0 %v1055_v59, %s2943_s15  ;;  %1073 = vrot.lane.b32.xlu1 %v1056_v61, %s2943_s15 }
 0x3c9   : > { %s2617_s13 = spop %2616 }
 0x3ca   : > { %v1047_v62 = vstv %s2617_s13  ;;  %s2619_s7 = spop %2618 }
 0x3cb   : > { %v1057_v63 = vmul.f32 %v1047_v62, %v3475_v39  ;;  %v1058_v1 = vmul.f32 %v1047_v62, %v3477_v44  ;;  %v1050_v2 = vstv %s2619_s7  ;;  %s2621_s30 = spop %2620 }
 0x3cc   : > { %v1059_v3 = vmul.f32 %v1050_v2, %v3479_v54  ;;  %v1053_v14 = vstv %s2621_s30  ;;  %v1060_v23 = vmul.f32 %v1050_v2, %v3487_v0 }
 0x3cd   : > { %1075 = vrot.lane.b32.xlu2 %v1057_v63, %s2943_s15  ;;  %1077 = vrot.lane.b32.xlu0 %v1058_v1, %s2943_s15  ;;  %v1061_v38 = vmul.f32 %v1053_v14, %v3465_v11  ;;  %v1062_v45 = vmul.f32 %v1053_v14, %v3467_v12 }
 0x3ce   : > { %1079 = vrot.lane.b32.xlu1 %v1059_v3, %s2943_s15 }
 0x3d5   : > { %1083 = vrot.lane.b32.xlu0 %v1061_v38, %s2943_s15  ;;  %1081 = vrot.lane.b32.xlu2 %v1060_v23, %s2943_s15 }
 0x3d6   : > { %1085 = vrot.lane.b32.xlu1 %v1062_v45, %s2943_s15 }
 0x3dd   : > { %1105 = vrot.lane.b32.xlu0 %v3287_v29, %s2944_s16  ;;  %1103 = vrot.lane.b32.xlu2 %v3241_v49, %s2944_s16 }
 0x3de   : > { %1107 = vrot.lane.b32.xlu1 %v3290_v30, %s2944_s16 }
 0x3e5   : > { %1109 = vrot.lane.b32.xlu2 %v3293_v31, %s2944_s16 }
 0x427   : > { %v3543_v55 = vpop.permute.xlu2 %1075  ;;  %v3547_v61 = vpop.permute.xlu0 %1071 }
 0x428   : > { %v3549_v63 = vpop.permute.xlu1 %1073 }
 0x42f   : > { %v3545_v59 = vpop.permute.xlu2 %1081 }
 0x437   : > { %v1104_v62 = vpop.permute.xlu2 %1103 }
 0x438   : > { %2622 = vpush %v1104_v62 }
 0x43f   : > { %v3551_v1 = vpop.permute.xlu0 %1077  ;;  %v1110_v38 = vpop.permute.xlu2 %1109 }
 0x440   : > { %4466 = vst [vmem:[#allocation10_spill] sm:$0xff] %v3551_v1  ;;  %v3553_v2 = vpop.permute.xlu1 %1079 }
 0x441   : > { %4467 = vst [vmem:[#allocation11_spill] sm:$0xff] %v3553_v2 }
 0x447   : > { %v3555_v3 = vpop.permute.xlu0 %1083 }
 0x448   : > { %4468 = vst [vmem:[#allocation12_spill] sm:$0xff] %v3555_v3  ;;  %v3557_v14 = vpop.permute.xlu1 %1085 }
 0x449   : > { %4469 = vst [vmem:[#allocation13_spill] sm:$0xff] %v3557_v14 }
 0x44f   : > { %v1106_v23 = vpop.permute.xlu0 %1105 }
 0x450   : > { %v1108_v45 = vpop.permute.xlu1 %1107  ;;  %2624 = vpush %v1106_v23 }
 0x451   : > { %2626 = vpush %v1108_v45 }
 0x452   : > { %2628 = vpush %v1110_v38 }
 0x469   : > { %s2623_s11 = spop %2622 }
 0x46a   : > { %v1112_v22 = vstv %s2623_s11 }
 0x46b   : > { %v1123_v19 = vmul.f32 %v1112_v22, %v3405_v20  ;;  %v1124_v62 = vmul.f32 %v1112_v22, %v3407_v21 }
 0x46d   : > { %1139 = vrot.lane.b32.xlu0 %v1123_v19, %s2944_s16  ;;  %1141 = vrot.lane.b32.xlu1 %v1124_v62, %s2944_s16 }
 0x481   : > { %s2625_s8 = spop %2624 }
 0x482   : > { %v1115_v3 = vstv %s2625_s8  ;;  %s2627_s9 = spop %2626 }
 0x483   : > { %v1125_v14 = vmul.f32 %v1115_v3, %v3475_v39  ;;  %v1126_v17 = vmul.f32 %v1115_v3, %v3477_v44  ;;  %v1118_v23 = vstv %s2627_s9  ;;  %s2629_s13 = spop %2628 }
 0x484   : > { %v1127_v38 = vmul.f32 %v1118_v23, %v3479_v54  ;;  %v1121_v19 = vstv %s2629_s13  ;;  %v1128_v22 = vmul.f32 %v1118_v23, %v3487_v0 }
 0x485   : > { %1143 = vrot.lane.b32.xlu2 %v1125_v14, %s2944_s16  ;;  %1145 = vrot.lane.b32.xlu0 %v1126_v17, %s2944_s16  ;;  %v1129_v45 = vmul.f32 %v1121_v19, %v3465_v11  ;;  %v1130_v62 = vmul.f32 %v1121_v19, %v3467_v12 }
 0x486   : > { %1147 = vrot.lane.b32.xlu1 %v1127_v38, %s2944_s16 }
 0x48d   : > { %1151 = vrot.lane.b32.xlu0 %v1129_v45, %s2944_s16  ;;  %1149 = vrot.lane.b32.xlu2 %v1128_v22, %s2944_s16  ;;  %v3602_v45 = vld [vmem:[%s4448_s3] sm:$0x1f] }
 0x48e   : > { %1153 = vrot.lane.b32.xlu1 %v1130_v62, %s2944_s16  ;;  %4474 = vst [vmem:[#allocation18_spill] sm:$0xff] %v3602_v45  ;;  %v3605_v62 = vrot.slane %v3602_v45, 2 }
 0x495   : > { %1173 = vrot.lane.b32.xlu0 %v3287_v29, %s2945_s6  ;;  %1171 = vrot.lane.b32.xlu2 %v3241_v49, %s2945_s6 }
 0x496   : > { %1175 = vrot.lane.b32.xlu1 %v3290_v30, %s2945_s6 }
 0x49d   : > { %1177 = vrot.lane.b32.xlu2 %v3293_v31, %s2945_s6 }
 0x4df   : > { %v3583_v17 = vpop.permute.xlu2 %1143  ;;  %v3587_v14 = vpop.permute.xlu0 %1139 }
 0x4e0   : > { %v3589_v38 = vpop.permute.xlu1 %1141 }
 0x4e7   : > { %v3585_v3 = vpop.permute.xlu2 %1149 }
 0x4ef   : > { %v1172_v23 = vpop.permute.xlu2 %1171 }
 0x4f0   : > { %2630 = vpush %v1172_v23  ;;  %v3610_v23 = vld [vmem:[%s4448_s3 + $0x8] sm:$0x1f] }
 0x4f1   : > { %4475 = vst [vmem:[#allocation19_spill] sm:$0xff] %v3610_v23 }
 0x4f7   : > { %v3591_v29 = vpop.permute.xlu0 %1145  ;;  %v1178_v31 = vpop.permute.xlu2 %1177 }
 0x4f8   : > { %4470 = vst [vmem:[#allocation14_spill] sm:$0xff] %v3591_v29  ;;  %v3593_v19 = vpop.permute.xlu1 %1147 }
 0x4f9   : > { %4471 = vst [vmem:[#allocation15_spill] sm:$0xff] %v3593_v19 }
 0x4ff   : > { %v3595_v49 = vpop.permute.xlu0 %1151 }
 0x500   : > { %4472 = vst [vmem:[#allocation16_spill] sm:$0xff] %v3595_v49  ;;  %v3597_v30 = vpop.permute.xlu1 %1153  ;;  %v3613_v49 = vrot.slane %v3610_v23, 2 }
 0x501   : > { %4473 = vst [vmem:[#allocation17_spill] sm:$0xff] %v3597_v30  ;;  %v3618_v30 = vld [vmem:[%s4448_s3 + $0x10] sm:$0x1f] }
 0x502   : > { %4476 = vst [vmem:[#allocation20_spill] sm:$0xff] %v3618_v30  ;;  %v3621_v19 = vrot.slane %v3618_v30, 2 }
 0x504   : > { %4477 = vst [vmem:[#allocation21_spill] sm:$0xff] %v3621_v19 }
 0x507   : > { %v1174_v22 = vpop.permute.xlu0 %1173 }
 0x508   : > { %v1176_v18 = vpop.permute.xlu1 %1175  ;;  %2632 = vpush %v1174_v22  ;;  %v3626_v22 = vld [vmem:[%s4448_s3 + $0x18] sm:$0x1f] }
 0x509   : > { %2634 = vpush %v1176_v18  ;;  %v3629_v45 = vrot.slane %v3626_v22, 2 }
 0x50a   : > { %2636 = vpush %v1178_v31 }
 0x50b   : > { %4478 = vst [vmem:[#allocation22_spill] sm:$0xff] %v3626_v22 }
 0x50c   : > { %4479 = vst [vmem:[#allocation23_spill] sm:$0xff] %v3629_v45 }
 0x50d   : > { %2638 = vpush %v3605_v62 }
 0x50e   : > { %2640 = vpush %v3613_v49 }
 0x50f   : > { %2642 = vpush %v3621_v19 }
 0x510   : > { %2644 = vpush %v3629_v45 }
 0x521   : > { %s2631_s11 = spop %2630 }
 0x522   : > { %v1180_v18 = vstv %s2631_s11 }
 0x523   : > { %v1191_v31 = vmul.f32 %v1180_v18, %v3405_v20  ;;  %v1192_v30 = vmul.f32 %v1180_v18, %v3407_v21 }
 0x525   : > { %1207 = vrot.lane.b32.xlu0 %v1191_v31, %s2945_s6  ;;  %1209 = vrot.lane.b32.xlu1 %v1192_v30, %s2945_s6 }
 0x539   : > { %s2633_s8 = spop %2632 }
 0x53a   : > { %v1183_v22 = vstv %s2633_s8  ;;  %s2635_s9 = spop %2634 }
 0x53b   : > { %v1193_v23 = vmul.f32 %v1183_v22, %v3475_v39  ;;  %v1194_v29 = vmul.f32 %v1183_v22, %v3477_v44  ;;  %v1186_v2 = vstv %s2635_s9  ;;  %s2637_s13 = spop %2636 }
 0x53c   : > { %v1195_v1 = vmul.f32 %v1186_v2, %v3479_v54  ;;  %v1189_v30 = vstv %s2637_s13  ;;  %v1196_v18 = vmul.f32 %v1186_v2, %v3487_v0 }
 0x53d   : > { %1211 = vrot.lane.b32.xlu2 %v1193_v23, %s2945_s6  ;;  %1213 = vrot.lane.b32.xlu0 %v1194_v29, %s2945_s6  ;;  %v1197_v31 = vmul.f32 %v1189_v30, %v3465_v11  ;;  %v1198_v22 = vmul.f32 %v1189_v30, %v3467_v12  ;;  %v625_v11 = vstv %s3196_s17  ;;  %v4459_v12 = vstv %s3200_s25 }
 0x53e   : > { %1215 = vrot.lane.b32.xlu1 %v1195_v1, %s2945_s6  ;;  %v639_v1 = vmul.f32 %v625_v11, %v3214_v35  ;;  %v641_v2 = vmul.f32 %v4459_v12, %v3247_v53  ;;  %v640_v29 = vmul.f32 %v625_v11, %v3225_v41  ;;  %v940_v12 = vstv %s3391_s10  ;;  %s2639_s17 = spop %2638 }
 0x53f   : > { %v943_v41 = vstv %s3395_s14  ;;  %v951_v11 = vmul.f32 %v940_v12, %v3405_v20 }
 0x540   : > { %v715_v23 = vadd.f32 %v3413_v24, %v639_v1  ;;  %v717_v30 = vadd.f32 %v3425_v7, %v641_v2 }
 0x545   : > { %1219 = vrot.lane.b32.xlu0 %v1197_v31, %s2945_s6  ;;  %1217 = vrot.lane.b32.xlu2 %v1196_v18, %s2945_s6  ;;  %v716_v18 = vadd.f32 %v3415_v25, %v640_v29  ;;  %v783_v31 = vadd.f32 %v3417_v26, %v715_v23 }
 0x546   : > { %1221 = vrot.lane.b32.xlu1 %v1198_v22, %s2945_s6  ;;  %v785_v22 = vadd.f32 %v3437_v37, %v717_v30 }
 0x547   : > { %v851_v53 = vadd.f32 %v3421_v28, %v783_v31  ;;  %v953_v28 = vmul.f32 %v943_v41, %v3475_v39 }
 0x548   : > { %v853_v35 = vadd.f32 %v3445_v46, %v785_v22  ;;  %v952_v46 = vmul.f32 %v940_v12, %v3407_v21  ;;  %v1252_v12 = vstv %s2639_s17 }
 0x549   : > { %v919_v26 = vadd.f32 %v3427_v6, %v851_v53  ;;  %v946_v6 = vstv %s3397_s12 }
 0x54a   : > { %v921_v25 = vadd.f32 %v3453_v58, %v853_v35 }
 0x54c   : > { %v961_v2 = vadd.f32 %v953_v28, %v921_v25  ;;  %v4480_v25 = vstv %s3200_s25 }
 0x54d   : > { %1281 = vrot.lane.b32.xlu0 %v3613_v49, %s2933_s23  ;;  %1279 = vrot.lane.b32.xlu2 %v3605_v62, %s2933_s23 }
 0x54e   : > { %1283 = vrot.lane.b32.xlu1 %v3621_v19, %s2933_s23  ;;  %v633_v19 = vstv %s3203_s26  ;;  %s3693_s26 = spop %2640 }
 0x54f   : > { %v644_v24 = vmul.f32 %v633_v19, %v3277_v16  ;;  %v959_v16 = vadd.f32 %v951_v11, %v919_v26  ;;  %v1255_v29 = vstv %s3693_s26  ;;  %s3715_s10 = spop %2642  ;;  %v642_v26 = vmul.f32 %v4480_v25, %v3335_v48 }
 0x550   : > { %v1258_v11 = vstv %s3715_s10  ;;  %s3763_s25 = spop %2644 }
 0x551   : > { %v720_v37 = vadd.f32 %v3431_v9, %v644_v24  ;;  %v1027_v9 = vadd.f32 %v3507_v13, %v959_v16 }
 0x553   : > { %v788_v1 = vadd.f32 %v3439_v40, %v720_v37  ;;  %v1095_v40 = vadd.f32 %v3547_v61, %v1027_v9 }
 0x555   : > { %1285 = vrot.lane.b32.xlu2 %v3629_v45, %s2933_s23  ;;  %v784_v45 = vadd.f32 %v3419_v27, %v716_v18  ;;  %v1163_v13 = vadd.f32 %v3587_v14, %v1095_v40  ;;  %v3709_v18 = vld [vmem:[#allocation2 + $0xa] sm:$0xff] }
 0x557   : > { %v852_v7 = vadd.f32 %v3423_v32, %v784_v45  ;;  %v856_v32 = vadd.f32 %v3451_v52, %v788_v1  ;;  %v956_v45 = vmul.f32 %v946_v6, %v3487_v0  ;;  %v3732_v1 = vld [vmem:[#allocation2 + $0x3a] sm:$0xff] }
 0x559   : > { %v920_v27 = vadd.f32 %v3429_v33, %v852_v7  ;;  %v1029_v33 = vadd.f32 %v3503_v5, %v961_v2  ;;  %v924_v20 = vadd.f32 %v3463_v4, %v856_v32  ;;  %v3705_v4 = vld [vmem:[#allocation2 + $0x2] sm:$0xff]  ;;  %v1268_v32 = vmul.f32 %v1258_v11, %v3732_v1 }
 0x55a   : > { %v1263_v0 = vmul.f32 %v1252_v12, %v3705_v4 }
 0x55b   : > { %v960_v58 = vadd.f32 %v952_v46, %v920_v27  ;;  %v1097_v39 = vadd.f32 %v3543_v55, %v1029_v33  ;;  %v964_v23 = vadd.f32 %v956_v45, %v924_v20  ;;  %v643_v27 = vmul.f32 %v633_v19, %v3337_v50 }
 0x55d   : > { %v1028_v21 = vadd.f32 %v3509_v15, %v960_v58  ;;  %v1165_v5 = vadd.f32 %v3583_v17, %v1097_v39  ;;  %v3707_v15 = vld [vmem:[#allocation2 + $0x1a] sm:$0xff]  ;;  %v1264_v17 = vmul.f32 %v1252_v12, %v3709_v18  ;;  %v719_v46 = vadd.f32 %v3435_v36, %v643_v27  ;;  %v3753_v12 = vld [vmem:[#allocation2 + $0x22] sm:$0xff]  ;;  %v3777_v27 = vld [vmem:[#allocation2 + $0x52] sm:$0xff] }
 0x55e   : > { %v954_v58 = vmul.f32 %v943_v41, %v3477_v44  ;;  %v3756_v41 = vld [vmem:[#allocation2 + $0x32] sm:$0xff] }
 0x55f   : > { %v1096_v52 = vadd.f32 %v3549_v63, %v1028_v21  ;;  %v1265_v63 = vmul.f32 %v1255_v29, %v3707_v15  ;;  %v4481_v21 = vld [vmem:[#allocation10_spill] sm:$0xff] }
 0x561   : > { %v1164_v30 = vadd.f32 %v3589_v38, %v1096_v52  ;;  %v1032_v38 = vadd.f32 %v3505_v10, %v964_v23  ;;  %v718_v10 = vadd.f32 %v3433_v34, %v642_v26 }
 0x563   : > { %v1100_v37 = vadd.f32 %v3545_v59, %v1032_v38  ;;  %v786_v2 = vadd.f32 %v3441_v42, %v718_v10  ;;  %v787_v59 = vadd.f32 %v3443_v43, %v719_v46  ;;  %v955_v42 = vmul.f32 %v946_v6, %v3479_v54  ;;  %v4485_v46 = vld [vmem:[#allocation21_spill] sm:$0xff] }
 0x564   : > { %v1266_v54 = vmul.f32 %v1255_v29, %v3753_v12 }
 0x565   : > { %v1168_v28 = vadd.f32 %v3585_v3, %v1100_v37  ;;  %v854_v50 = vadd.f32 %v3447_v47, %v786_v2  ;;  %v855_v34 = vadd.f32 %v3449_v51, %v787_v59  ;;  %v4482_v51 = vld [vmem:[#allocation11_spill] sm:$0xff] }
 0x566   : > { %v3775_v37 = vld [vmem:[#allocation2 + $0x4a] sm:$0xff] }
 0x567   : > { %v922_v3 = vadd.f32 %v3456_v8, %v854_v50  ;;  %v923_v36 = vadd.f32 %v3458_v60, %v855_v34  ;;  %v4483_v8 = vld [vmem:[#allocation14_spill] sm:$0xff]  ;;  %v4484_v60 = vld [vmem:[#allocation15_spill] sm:$0xff] }
 0x569   : > { %v962_v33 = vadd.f32 %v954_v58, %v922_v3  ;;  %v963_v20 = vadd.f32 %v955_v42, %v923_v36  ;;  %v4487_v3 = vld [vmem:[#allocation6_spill] sm:$0xff]  ;;  %v4488_v36 = vld [vmem:[#allocation8_spill] sm:$0xff]  ;;  %v4489_v42 = vld [vmem:[#allocation7_spill] sm:$0xff] }
 0x56a   : > { %v1033_v58 = vadd.f32 %v4488_v36, %v4487_v3 }
 0x56b   : > { %v1030_v43 = vadd.f32 %v3511_v56, %v962_v33  ;;  %v1031_v47 = vadd.f32 %v3513_v57, %v963_v20  ;;  %v1267_v56 = vmul.f32 %v1258_v11, %v3756_v41  ;;  %v4491_v20 = vld [vmem:[#allocation12_spill] sm:$0xff] }
 0x56d   : > { %v1098_v40 = vadd.f32 %v4481_v21, %v1030_v43  ;;  %v1099_v39 = vadd.f32 %v4482_v51, %v1031_v47  ;;  %v1101_v43 = vadd.f32 %v4491_v20, %v1033_v58  ;;  %v4492_v47 = vld [vmem:[#allocation13_spill] sm:$0xff]  ;;  %v4493_v51 = vld [vmem:[#allocation16_spill] sm:$0xff] }
 0x56f   : > { %v1166_v45 = vadd.f32 %v4483_v8, %v1098_v40  ;;  %v1167_v52 = vadd.f32 %v4484_v60, %v1099_v39  ;;  %v1169_v39 = vadd.f32 %v4493_v51, %v1101_v43  ;;  %v1261_v60 = vstv %s3763_s25 }
 0x597   : > { %v1208_v61 = vpop.permute.xlu0 %1207  ;;  %v1212_v55 = vpop.permute.xlu2 %1211 }
 0x598   : > { %v1231_v31 = vadd.f32 %v1208_v61, %v1163_v13  ;;  %v1233_v14 = vadd.f32 %v1212_v55, %v1165_v5  ;;  %v1210_v22 = vpop.permute.xlu1 %1209 }
 0x599   : > { %v1232_v35 = vadd.f32 %v1210_v22, %v1164_v30 }
 0x59a   : > { %v3717_v53 = vadd.f32 %v1263_v0, %v1231_v31  ;;  %v3719_v24 = vadd.f32 %v1265_v63, %v1233_v14 }
 0x59b   : > { %v3721_v7 = vadd.f32 %v1264_v17, %v1232_v35 }
 0x59f   : > { %v1218_v16 = vpop.permute.xlu2 %1217 }
 0x5a0   : > { %v1236_v48 = vadd.f32 %v1218_v16, %v1168_v28  ;;  %v4486_v16 = vld [vmem:[#allocation23_spill] sm:$0xff] }
 0x5a2   : > { %v3738_v19 = vadd.f32 %v1268_v32, %v1236_v48 }
 0x5a7   : > { %v1280_v9 = vpop.permute.xlu2 %1279 }
 0x5a8   : > { %2646 = vpush %v1280_v9  ;;  %v4490_v9 = vld [vmem:[#allocation9_spill] sm:$0xff] }
 0x5a9   : > { %v1034_v33 = vadd.f32 %v4490_v9, %v4489_v42 }
 0x5ab   : > { %v1102_v21 = vadd.f32 %v4492_v47, %v1034_v33 }
 0x5af   : > { %v1214_v44 = vpop.permute.xlu0 %1213  ;;  %v1286_v0 = vpop.permute.xlu2 %1285 }
 0x5b0   : > { %v1234_v6 = vadd.f32 %v1214_v44, %v1166_v45  ;;  %v1216_v13 = vpop.permute.xlu1 %1215 }
 0x5b1   : > { %v1235_v57 = vadd.f32 %v1216_v13, %v1167_v52 }
 0x5b2   : > { %v3759_v5 = vadd.f32 %v1266_v54, %v1234_v6  ;;  %v1269_v54 = vmul.f32 %v1261_v60, %v3775_v37  ;;  %v1270_v6 = vmul.f32 %v1261_v60, %v3777_v27 }
 0x5b3   : > { %v3761_v23 = vadd.f32 %v1267_v56, %v1235_v57 }
 0x5b7   : > { %v1220_v30 = vpop.permute.xlu0 %1219 }
 0x5b8   : > { %v1222_v61 = vpop.permute.xlu1 %1221  ;;  %v1237_v52 = vadd.f32 %v1220_v30, %v1169_v39 }
 0x5ba   : > { %v1277_v13 = vadd.f32 %v1269_v54, %v1237_v52 }
 0x5bf   : > { %v1282_v55 = vpop.permute.xlu0 %1281 }
 0x5c0   : > { %v1284_v63 = vpop.permute.xlu1 %1283  ;;  %2648 = vpush %v1282_v55 }
 0x5c1   : > { %2650 = vpush %v1284_v63 }
 0x5c2   : > { %2652 = vpush %v1286_v0 }
 0x5d9   : > { %s2647_s14 = spop %2646 }
 0x5da   : > { %v1288_v29 = vstv %s2647_s14 }
 0x5db   : > { %v1299_v31 = vmul.f32 %v1288_v29, %v3705_v4  ;;  %v1300_v14 = vmul.f32 %v1288_v29, %v3709_v18 }
 0x5dd   : > { %1315 = vrot.lane.b32.xlu0 %v1299_v31, %s2933_s23  ;;  %1317 = vrot.lane.b32.xlu1 %v1300_v14, %s2933_s23 }
 0x5f1   : > { %s2649_s12 = spop %2648 }
 0x5f2   : > { %v1291_v22 = vstv %s2649_s12  ;;  %s2651_s7 = spop %2650 }
 0x5f3   : > { %v1301_v17 = vmul.f32 %v1291_v22, %v3707_v15  ;;  %v1302_v35 = vmul.f32 %v1291_v22, %v3753_v12  ;;  %v1294_v38 = vstv %s2651_s7  ;;  %s2653_s30 = spop %2652 }
 0x5f4   : > { %v1303_v25 = vmul.f32 %v1294_v38, %v3756_v41  ;;  %v1297_v26 = vstv %s2653_s30  ;;  %v1304_v11 = vmul.f32 %v1294_v38, %v3732_v1 }
 0x5f5   : > { %1319 = vrot.lane.b32.xlu2 %v1301_v17, %s2933_s23  ;;  %1321 = vrot.lane.b32.xlu0 %v1302_v35, %s2933_s23  ;;  %v1305_v10 = vmul.f32 %v1297_v26, %v3775_v37  ;;  %v1306_v28 = vmul.f32 %v1297_v26, %v3777_v27 }
 0x5f6   : > { %1323 = vrot.lane.b32.xlu1 %v1303_v25, %s2933_s23 }
 0x5fd   : > { %1327 = vrot.lane.b32.xlu0 %v1305_v10, %s2933_s23  ;;  %1325 = vrot.lane.b32.xlu2 %v1304_v11, %s2933_s23 }
 0x5fe   : > { %1329 = vrot.lane.b32.xlu1 %v1306_v28, %s2933_s23 }
 0x605   : > { %1349 = vrot.lane.b32.xlu0 %v3613_v49, %s2943_s15  ;;  %1347 = vrot.lane.b32.xlu2 %v3605_v62, %s2943_s15 }
 0x606   : > { %1351 = vrot.lane.b32.xlu1 %v4485_v46, %s2943_s15 }
 0x60d   : > { %1353 = vrot.lane.b32.xlu2 %v4486_v16, %s2943_s15 }
 0x64f   : > { %v1320_v2 = vpop.permute.xlu2 %1319  ;;  %v1316_v59 = vpop.permute.xlu0 %1315 }
 0x650   : > { %v1318_v34 = vpop.permute.xlu1 %1317  ;;  %v1341_v3 = vadd.f32 %v1320_v2, %v3719_v24 }
 0x651   : > { %v1340_v36 = vadd.f32 %v1318_v34, %v3721_v7 }
 0x657   : > { %v1326_v32 = vpop.permute.xlu2 %1325 }
 0x658   : > { %v3794_v48 = vadd.f32 %v1326_v32, %v3738_v19  ;;  %v4494_v19 = vld [vmem:[#allocation17_spill] sm:$0xff] }
 0x659   : > { %v1170_v45 = vadd.f32 %v4494_v19, %v1102_v21 }
 0x65b   : > { %v1238_v44 = vadd.f32 %v1222_v61, %v1170_v45 }
 0x65d   : > { %v1278_v57 = vadd.f32 %v1270_v6, %v1238_v44 }
 0x65f   : > { %v1348_v50 = vpop.permute.xlu2 %1347 }
 0x660   : > { %2654 = vpush %v1348_v50  ;;  %v1339_v50 = vadd.f32 %v1316_v59, %v3717_v53 }
 0x667   : > { %v1322_v40 = vpop.permute.xlu0 %1321  ;;  %v1354_v31 = vpop.permute.xlu2 %1353 }
 0x668   : > { %v1324_v8 = vpop.permute.xlu1 %1323  ;;  %v1342_v39 = vadd.f32 %v1322_v40, %v3759_v5 }
 0x669   : > { %v1343_v19 = vadd.f32 %v1324_v8, %v3761_v23 }
 0x66f   : > { %v1328_v56 = vpop.permute.xlu0 %1327 }
 0x670   : > { %v1345_v55 = vadd.f32 %v1328_v56, %v1277_v13  ;;  %v1330_v0 = vpop.permute.xlu1 %1329 }
 0x671   : > { %v1346_v63 = vadd.f32 %v1330_v0, %v1278_v57 }
 0x677   : > { %v1350_v29 = vpop.permute.xlu0 %1349 }
 0x678   : > { %v1352_v14 = vpop.permute.xlu1 %1351  ;;  %2656 = vpush %v1350_v29 }
 0x679   : > { %2658 = vpush %v1352_v14 }
 0x67a   : > { %2660 = vpush %v1354_v31 }
 0x691   : > { %s2655_s11 = spop %2654 }
 0x692   : > { %v1356_v22 = vstv %s2655_s11 }
 0x693   : > { %v1367_v30 = vmul.f32 %v1356_v22, %v3705_v4  ;;  %v1368_v61 = vmul.f32 %v1356_v22, %v3709_v18 }
 0x695   : > { %1383 = vrot.lane.b32.xlu0 %v1367_v30, %s2943_s15  ;;  %1385 = vrot.lane.b32.xlu1 %v1368_v61, %s2943_s15 }
 0x6a9   : > { %s2657_s8 = spop %2656 }
 0x6aa   : > { %v1359_v17 = vstv %s2657_s8  ;;  %s2659_s9 = spop %2658 }
 0x6ab   : > { %v1369_v35 = vmul.f32 %v1359_v17, %v3707_v15  ;;  %v1370_v38 = vmul.f32 %v1359_v17, %v3753_v12  ;;  %v1362_v25 = vstv %s2659_s9  ;;  %s2661_s13 = spop %2660 }
 0x6ac   : > { %v1371_v26 = vmul.f32 %v1362_v25, %v3756_v41  ;;  %v1365_v11 = vstv %s2661_s13  ;;  %v1372_v10 = vmul.f32 %v1362_v25, %v3732_v1 }
 0x6ad   : > { %1387 = vrot.lane.b32.xlu2 %v1369_v35, %s2943_s15  ;;  %1389 = vrot.lane.b32.xlu0 %v1370_v38, %s2943_s15  ;;  %v1373_v28 = vmul.f32 %v1365_v11, %v3775_v37  ;;  %v1374_v32 = vmul.f32 %v1365_v11, %v3777_v27 }
 0x6ae   : > { %1391 = vrot.lane.b32.xlu1 %v1371_v26, %s2943_s15 }
 0x6b5   : > { %1395 = vrot.lane.b32.xlu0 %v1373_v28, %s2943_s15  ;;  %1393 = vrot.lane.b32.xlu2 %v1372_v10, %s2943_s15 }
 0x6b6   : > { %1397 = vrot.lane.b32.xlu1 %v1374_v32, %s2943_s15 }
 0x6bd   : > { %1417 = vrot.lane.b32.xlu0 %v3613_v49, %s2944_s16  ;;  %1415 = vrot.lane.b32.xlu2 %v3605_v62, %s2944_s16 }
 0x6be   : > { %1419 = vrot.lane.b32.xlu1 %v4485_v46, %s2944_s16 }
 0x6c5   : > { %1421 = vrot.lane.b32.xlu2 %v4486_v16, %s2944_s16 }
 0x707   : > { %v1384_v58 = vpop.permute.xlu0 %1383  ;;  %v1388_v42 = vpop.permute.xlu2 %1387 }
 0x708   : > { %v1407_v9 = vadd.f32 %v1384_v58, %v1339_v50  ;;  %v1409_v33 = vadd.f32 %v1388_v42, %v1341_v3  ;;  %v1386_v20 = vpop.permute.xlu1 %1385  ;;  %v4495_v50 = vld [vmem:[#allocation18_spill] sm:$0xff]  ;;  %v4496_v58 = vld [vmem:[#allocation19_spill] sm:$0xff] }
 0x709   : > { %v1408_v43 = vadd.f32 %v1386_v20, %v1340_v36  ;;  %v3878_v3 = vrot.slane %v4495_v50, 3  ;;  %v3881_v42 = vrot.slane %v4496_v58, 3  ;;  %v4498_v20 = vld [vmem:[#allocation22_spill] sm:$0xff] }
 0x70f   : > { %v1394_v47 = vpop.permute.xlu2 %1393 }
 0x710   : > { %v1412_v21 = vadd.f32 %v1394_v47, %v3794_v48 }
 0x717   : > { %v1416_v51 = vpop.permute.xlu2 %1415 }
 0x718   : > { %2662 = vpush %v1416_v51 }
 0x71f   : > { %v1390_v53 = vpop.permute.xlu0 %1389  ;;  %v1422_v44 = vpop.permute.xlu2 %1421 }
 0x720   : > { %v1410_v59 = vadd.f32 %v1390_v53, %v1342_v39  ;;  %v1392_v24 = vpop.permute.xlu1 %1391 }
 0x721   : > { %v1411_v2 = vadd.f32 %v1392_v24, %v1343_v19 }
 0x727   : > { %v1396_v7 = vpop.permute.xlu0 %1395 }
 0x728   : > { %v1413_v34 = vadd.f32 %v1396_v7, %v1345_v55  ;;  %v1398_v45 = vpop.permute.xlu1 %1397 }
 0x729   : > { %v1414_v60 = vadd.f32 %v1398_v45, %v1346_v63 }
 0x72f   : > { %v1418_v52 = vpop.permute.xlu0 %1417 }
 0x730   : > { %v1420_v54 = vpop.permute.xlu1 %1419  ;;  %2664 = vpush %v1418_v52 }
 0x731   : > { %2666 = vpush %v1420_v54 }
 0x732   : > { %2668 = vpush %v1422_v44 }
 0x749   : > { %s2663_s17 = spop %2662 }
 0x74a   : > { %v1424_v48 = vstv %s2663_s17 }
 0x74b   : > { %v1435_v5 = vmul.f32 %v1424_v48, %v3705_v4  ;;  %v1436_v23 = vmul.f32 %v1424_v48, %v3709_v18 }
 0x74d   : > { %1451 = vrot.lane.b32.xlu0 %v1435_v5, %s2944_s16  ;;  %1453 = vrot.lane.b32.xlu1 %v1436_v23, %s2944_s16 }
 0x761   : > { %s2665_s26 = spop %2664 }
 0x762   : > { %v1427_v40 = vstv %s2665_s26  ;;  %s2667_s10 = spop %2666 }
 0x763   : > { %v1437_v8 = vmul.f32 %v1427_v40, %v3707_v15  ;;  %v1438_v6 = vmul.f32 %v1427_v40, %v3753_v12  ;;  %v1430_v13 = vstv %s2667_s10  ;;  %s2669_s25 = spop %2668 }
 0x764   : > { %v1439_v56 = vmul.f32 %v1430_v13, %v3756_v41  ;;  %v1433_v57 = vstv %s2669_s25  ;;  %v1440_v55 = vmul.f32 %v1430_v13, %v3732_v1  ;;  %v3935_v13 = vld [vmem:[#allocation2 + $0x3b] sm:$0xff] }
 0x765   : > { %1455 = vrot.lane.b32.xlu2 %v1437_v8, %s2944_s16  ;;  %1457 = vrot.lane.b32.xlu0 %v1438_v6, %s2944_s16  ;;  %v1441_v0 = vmul.f32 %v1433_v57, %v3775_v37  ;;  %v1442_v63 = vmul.f32 %v1433_v57, %v3777_v27 }
 0x766   : > { %1459 = vrot.lane.b32.xlu1 %v1439_v56, %s2944_s16 }
 0x76d   : > { %1463 = vrot.lane.b32.xlu0 %v1441_v0, %s2944_s16  ;;  %1461 = vrot.lane.b32.xlu2 %v1440_v55, %s2944_s16 }
 0x76e   : > { %1465 = vrot.lane.b32.xlu1 %v1442_v63, %s2944_s16 }
 0x775   : > { %1485 = vrot.lane.b32.xlu0 %v3613_v49, %s2945_s6  ;;  %1483 = vrot.lane.b32.xlu2 %v3605_v62, %s2945_s6 }
 0x776   : > { %1487 = vrot.lane.b32.xlu1 %v4485_v46, %s2945_s6 }
 0x77d   : > { %1489 = vrot.lane.b32.xlu2 %v4486_v16, %s2945_s6 }
 0x7bf   : > { %v1452_v29 = vpop.permute.xlu0 %1451  ;;  %v1456_v31 = vpop.permute.xlu2 %1455 }
 0x7c0   : > { %v3861_v14 = vadd.f32 %v1452_v29, %v1407_v9  ;;  %v3863_v22 = vadd.f32 %v1456_v31, %v1409_v33  ;;  %v1454_v30 = vpop.permute.xlu1 %1453  ;;  %v4497_v9 = vld [vmem:[#allocation20_spill] sm:$0xff]  ;;  %v3939_v29 = vld [vmem:[#allocation2 + $0x23] sm:$0xff] }
 0x7c1   : > { %v3865_v61 = vadd.f32 %v1454_v30, %v1408_v43  ;;  %v3884_v33 = vrot.slane %v4497_v9, 3  ;;  %v3887_v43 = vrot.slane %v4498_v20, 3 }
 0x7c7   : > { %v1462_v17 = vpop.permute.xlu2 %1461 }
 0x7c8   : > { %v3867_v49 = vadd.f32 %v1462_v17, %v1412_v21 }
 0x7cf   : > { %v1484_v35 = vpop.permute.xlu2 %1483 }
 0x7d0   : > { %2670 = vpush %v1484_v35 }
 0x7d7   : > { %v1458_v62 = vpop.permute.xlu0 %1457  ;;  %v1490_v32 = vpop.permute.xlu2 %1489 }
 0x7d8   : > { %v3869_v38 = vadd.f32 %v1458_v62, %v1410_v59  ;;  %v1460_v46 = vpop.permute.xlu1 %1459 }
 0x7d9   : > { %v3871_v25 = vadd.f32 %v1460_v46, %v1411_v2 }
 0x7df   : > { %v1464_v16 = vpop.permute.xlu0 %1463 }
 0x7e0   : > { %v3873_v26 = vadd.f32 %v1464_v16, %v1413_v34  ;;  %v1466_v11 = vpop.permute.xlu1 %1465  ;;  %v3921_v34 = vld [vmem:[#allocation2 + $0xb] sm:$0xff] }
 0x7e1   : > { %v3875_v10 = vadd.f32 %v1466_v11, %v1414_v60 }
 0x7e7   : > { %v1486_v28 = vpop.permute.xlu0 %1485 }
 0x7e8   : > { %v1488_v36 = vpop.permute.xlu1 %1487  ;;  %2672 = vpush %v1486_v28 }
 0x7e9   : > { %2674 = vpush %v1488_v36 }
 0x7ea   : > { %2676 = vpush %v1490_v32 }
 0x7eb   : > { %2678 = vpush %v3878_v3 }
 0x7ec   : > { %2680 = vpush %v3881_v42 }
 0x7ed   : > { %2682 = vpush %v3884_v33 }
 0x7ee   : > { %2684 = vpush %v3887_v43 }
 0x801   : > { %s2671_s14 = spop %2670 }
 0x802   : > { %v1492_v47 = vstv %s2671_s14 }
 0x803   : > { %v1503_v21 = vmul.f32 %v1492_v47, %v3705_v4  ;;  %v1504_v51 = vmul.f32 %v1492_v47, %v3709_v18 }
 0x805   : > { %1519 = vrot.lane.b32.xlu0 %v1503_v21, %s2945_s6  ;;  %1521 = vrot.lane.b32.xlu1 %v1504_v51, %s2945_s6  ;;  %v3961_v51 = vld [vmem:[#allocation2 + $0x4b] sm:$0xff] }
 0x819   : > { %s2673_s12 = spop %2672 }
 0x81a   : > { %v1495_v39 = vstv %s2673_s12  ;;  %s2675_s7 = spop %2674 }
 0x81b   : > { %v1505_v19 = vmul.f32 %v1495_v39, %v3707_v15  ;;  %v1506_v53 = vmul.f32 %v1495_v39, %v3753_v12  ;;  %v1498_v59 = vstv %s2675_s7  ;;  %s2677_s30 = spop %2676  ;;  %v3917_v12 = vld [vmem:[#allocation2 + $0x3] sm:$0xff]  ;;  %v3963_v39 = vld [vmem:[#allocation2 + $0x53] sm:$0xff] }
 0x81c   : > { %v1507_v24 = vmul.f32 %v1498_v59, %v3756_v41  ;;  %v1501_v4 = vstv %s2677_s30  ;;  %v1508_v18 = vmul.f32 %v1498_v59, %v3732_v1  ;;  %s2679_s11 = spop %2678  ;;  %v3919_v41 = vld [vmem:[#allocation2 + $0x1b] sm:$0xff] }
 0x81d   : > { %1523 = vrot.lane.b32.xlu2 %v1505_v19, %s2945_s6  ;;  %1525 = vrot.lane.b32.xlu0 %v1506_v53, %s2945_s6  ;;  %v1509_v2 = vmul.f32 %v1501_v4, %v3775_v37  ;;  %v1510_v7 = vmul.f32 %v1501_v4, %v3777_v27  ;;  %s2681_s8 = spop %2680  ;;  %v1564_v15 = vstv %s2679_s11 }
 0x81e   : > { %1527 = vrot.lane.b32.xlu1 %v1507_v24, %s2945_s6  ;;  %v1567_v1 = vstv %s2681_s8  ;;  %v1575_v45 = vmul.f32 %v1564_v15, %v3917_v12  ;;  %v1576_v48 = vmul.f32 %v1564_v15, %v3921_v34  ;;  %s2683_s9 = spop %2682 }
 0x81f   : > { %v1577_v60 = vmul.f32 %v1567_v1, %v3919_v41  ;;  %v1570_v6 = vstv %s2683_s9  ;;  %s3949_s13 = spop %2684 }
 0x820   : > { %v1580_v57 = vmul.f32 %v1570_v6, %v3935_v13 }
 0x825   : > { %1531 = vrot.lane.b32.xlu0 %v1509_v2, %s2945_s6  ;;  %1529 = vrot.lane.b32.xlu2 %v1508_v18, %s2945_s6 }
 0x826   : > { %1533 = vrot.lane.b32.xlu1 %v1510_v7, %s2945_s6 }
 0x82d   : > { %1593 = vrot.lane.b32.xlu0 %v3881_v42, %s2933_s23  ;;  %1591 = vrot.lane.b32.xlu2 %v3878_v3, %s2933_s23 }
 0x82e   : > { %1595 = vrot.lane.b32.xlu1 %v3884_v33, %s2933_s23 }
 0x835   : > { %1597 = vrot.lane.b32.xlu2 %v3887_v43, %s2933_s23 }
 0x877   : > { %v1520_v37 = vpop.permute.xlu0 %1519  ;;  %v1524_v27 = vpop.permute.xlu2 %1523 }
 0x878   : > { %v1543_v52 = vadd.f32 %v1520_v37, %v3861_v14  ;;  %v1545_v44 = vadd.f32 %v1524_v27, %v3863_v22  ;;  %v1522_v54 = vpop.permute.xlu1 %1521  ;;  %v1578_v14 = vmul.f32 %v1567_v1, %v3939_v29  ;;  %v3942_v22 = vld [vmem:[#allocation2 + $0x33] sm:$0xff] }
 0x879   : > { %v1544_v5 = vadd.f32 %v1522_v54, %v3865_v61  ;;  %v1579_v17 = vmul.f32 %v1570_v6, %v3942_v22 }
 0x87a   : > { %v3929_v23 = vadd.f32 %v1575_v45, %v1543_v52  ;;  %v3931_v40 = vadd.f32 %v1577_v60, %v1545_v44  ;;  %v1573_v44 = vstv %s3949_s13 }
 0x87b   : > { %v3933_v8 = vadd.f32 %v1576_v48, %v1544_v5  ;;  %v1581_v48 = vmul.f32 %v1573_v44, %v3961_v51  ;;  %v1582_v5 = vmul.f32 %v1573_v44, %v3963_v39 }
 0x87f   : > { %v1530_v56 = vpop.permute.xlu2 %1529 }
 0x880   : > { %v1548_v55 = vadd.f32 %v1530_v56, %v3867_v49 }
 0x882   : > { %v1588_v0 = vadd.f32 %v1580_v57, %v1548_v55 }
 0x887   : > { %v1592_v63 = vpop.permute.xlu2 %1591 }
 0x888   : > { %2686 = vpush %v1592_v63 }
 0x88f   : > { %v1526_v31 = vpop.permute.xlu0 %1525  ;;  %v1598_v50 = vpop.permute.xlu2 %1597 }
 0x890   : > { %v1546_v30 = vadd.f32 %v1526_v31, %v3869_v38  ;;  %v1528_v61 = vpop.permute.xlu1 %1527 }
 0x891   : > { %v1547_v35 = vadd.f32 %v1528_v61, %v3871_v25 }
 0x892   : > { %v1586_v62 = vadd.f32 %v1578_v14, %v1546_v30 }
 0x893   : > { %v1587_v46 = vadd.f32 %v1579_v17, %v1547_v35 }
 0x897   : > { %v1532_v49 = vpop.permute.xlu0 %1531 }
 0x898   : > { %v1549_v16 = vadd.f32 %v1532_v49, %v3873_v26  ;;  %v1534_v11 = vpop.permute.xlu1 %1533 }
 0x899   : > { %v1550_v28 = vadd.f32 %v1534_v11, %v3875_v10 }
 0x89a   : > { %v1589_v6 = vadd.f32 %v1581_v48, %v1549_v16 }
 0x89b   : > { %v1590_v56 = vadd.f32 %v1582_v5, %v1550_v28 }
 0x89f   : > { %v1594_v32 = vpop.permute.xlu0 %1593 }
 0x8a0   : > { %v1596_v36 = vpop.permute.xlu1 %1595  ;;  %2688 = vpush %v1594_v32 }
 0x8a1   : > { %2690 = vpush %v1596_v36 }
 0x8a2   : > { %2692 = vpush %v1598_v50 }
 0x8b9   : > { %s2687_s17 = spop %2686 }
 0x8ba   : > { %v1600_v38 = vstv %s2687_s17 }
 0x8bb   : > { %v1611_v25 = vmul.f32 %v1600_v38, %v3917_v12  ;;  %v1612_v58 = vmul.f32 %v1600_v38, %v3921_v34 }
 0x8bd   : > { %1627 = vrot.lane.b32.xlu0 %v1611_v25, %s2933_s23  ;;  %1629 = vrot.lane.b32.xlu1 %v1612_v58, %s2933_s23 }
 0x8d1   : > { %s2689_s26 = spop %2688 }
 0x8d2   : > { %v1603_v26 = vstv %s2689_s26  ;;  %s2691_s10 = spop %2690 }
 0x8d3   : > { %v1613_v10 = vmul.f32 %v1603_v26, %v3919_v41  ;;  %v1614_v9 = vmul.f32 %v1603_v26, %v3939_v29  ;;  %v1606_v20 = vstv %s2691_s10  ;;  %s2693_s25 = spop %2692 }
 0x8d4   : > { %v1615_v47 = vmul.f32 %v1606_v20, %v3942_v22  ;;  %v1609_v21 = vstv %s2693_s25  ;;  %v1616_v19 = vmul.f32 %v1606_v20, %v3935_v13 }
 0x8d5   : > { %1631 = vrot.lane.b32.xlu2 %v1613_v10, %s2933_s23  ;;  %1633 = vrot.lane.b32.xlu0 %v1614_v9, %s2933_s23  ;;  %v1617_v53 = vmul.f32 %v1609_v21, %v3961_v51  ;;  %v1618_v59 = vmul.f32 %v1609_v21, %v3963_v39 }
 0x8d6   : > { %1635 = vrot.lane.b32.xlu1 %v1615_v47, %s2933_s23 }
 0x8dd   : > { %1639 = vrot.lane.b32.xlu0 %v1617_v53, %s2933_s23  ;;  %1637 = vrot.lane.b32.xlu2 %v1616_v19, %s2933_s23 }
 0x8de   : > { %1641 = vrot.lane.b32.xlu1 %v1618_v59, %s2933_s23 }
 0x8e5   : > { %1661 = vrot.lane.b32.xlu0 %v3881_v42, %s2943_s15  ;;  %1659 = vrot.lane.b32.xlu2 %v3878_v3, %s2943_s15 }
 0x8e6   : > { %1663 = vrot.lane.b32.xlu1 %v3884_v33, %s2943_s15 }
 0x8ed   : > { %1665 = vrot.lane.b32.xlu2 %v3887_v43, %s2943_s15 }
 0x92f   : > { %v1628_v24 = vpop.permute.xlu0 %1627  ;;  %v1632_v4 = vpop.permute.xlu2 %1631 }
 0x930   : > { %v1651_v18 = vadd.f32 %v1628_v24, %v3929_v23  ;;  %v1653_v2 = vadd.f32 %v1632_v4, %v3931_v40  ;;  %v1630_v7 = vpop.permute.xlu1 %1629 }
 0x931   : > { %v1652_v15 = vadd.f32 %v1630_v7, %v3933_v8 }
 0x937   : > { %v1638_v1 = vpop.permute.xlu2 %1637 }
 0x938   : > { %v1656_v37 = vadd.f32 %v1638_v1, %v1588_v0 }
 0x93f   : > { %v1660_v27 = vpop.permute.xlu2 %1659 }
 0x940   : > { %2694 = vpush %v1660_v27 }
 0x947   : > { %v1634_v45 = vpop.permute.xlu0 %1633  ;;  %v1666_v63 = vpop.permute.xlu2 %1665 }
 0x948   : > { %v1654_v60 = vadd.f32 %v1634_v45, %v1586_v62  ;;  %v1636_v52 = vpop.permute.xlu1 %1635 }
 0x949   : > { %v1655_v54 = vadd.f32 %v1636_v52, %v1587_v46 }
 0x94f   : > { %v1640_v23 = vpop.permute.xlu0 %1639 }
 0x950   : > { %v1657_v40 = vadd.f32 %v1640_v23, %v1589_v6  ;;  %v1642_v57 = vpop.permute.xlu1 %1641 }
 0x951   : > { %v1658_v55 = vadd.f32 %v1642_v57, %v1590_v56 }
 0x957   : > { %v1662_v8 = vpop.permute.xlu0 %1661 }
 0x958   : > { %v1664_v0 = vpop.permute.xlu1 %1663  ;;  %2696 = vpush %v1662_v8 }
 0x959   : > { %2698 = vpush %v1664_v0 }
 0x95a   : > { %2700 = vpush %v1666_v63 }
 0x971   : > { %s2695_s14 = spop %2694 }
 0x972   : > { %v1668_v31 = vstv %s2695_s14 }
 0x973   : > { %v1679_v14 = vmul.f32 %v1668_v31, %v3917_v12  ;;  %v1680_v30 = vmul.f32 %v1668_v31, %v3921_v34 }
 0x975   : > { %1695 = vrot.lane.b32.xlu0 %v1679_v14, %s2943_s15  ;;  %1697 = vrot.lane.b32.xlu1 %v1680_v30, %s2943_s15 }
 0x989   : > { %s2697_s12 = spop %2696 }
 0x98a   : > { %v1671_v61 = vstv %s2697_s12  ;;  %s2699_s7 = spop %2698 }
 0x98b   : > { %v1681_v17 = vmul.f32 %v1671_v61, %v3919_v41  ;;  %v1682_v35 = vmul.f32 %v1671_v61, %v3939_v29  ;;  %v1674_v62 = vstv %s2699_s7  ;;  %s2701_s30 = spop %2700 }
 0x98c   : > { %v1683_v46 = vmul.f32 %v1674_v62, %v3942_v22  ;;  %v1677_v49 = vstv %s2701_s30  ;;  %v1684_v16 = vmul.f32 %v1674_v62, %v3935_v13 }
 0x98d   : > { %1699 = vrot.lane.b32.xlu2 %v1681_v17, %s2943_s15  ;;  %1701 = vrot.lane.b32.xlu0 %v1682_v35, %s2943_s15  ;;  %v1685_v11 = vmul.f32 %v1677_v49, %v3961_v51  ;;  %v1686_v28 = vmul.f32 %v1677_v49, %v3963_v39 }
 0x98e   : > { %1703 = vrot.lane.b32.xlu1 %v1683_v46, %s2943_s15  ;;  %v2864_v46 = vld [vmem:[%s4448_s3] sm:$0x1f] }
 0x98f   : > { %v4052_v49 = vrot.slane %v2864_v46, 4 }
 0x995   : > { %1707 = vrot.lane.b32.xlu0 %v1685_v11, %s2943_s15  ;;  %1705 = vrot.lane.b32.xlu2 %v1684_v16, %s2943_s15  ;;  %v2865_v11 = vld [vmem:[%s4448_s3 + $0x8] sm:$0x1f] }
 0x996   : > { %1709 = vrot.lane.b32.xlu1 %v1686_v28, %s2943_s15  ;;  %v4057_v28 = vrot.slane %v2865_v11, 4 }
 0x99d   : > { %1729 = vrot.lane.b32.xlu0 %v3881_v42, %s2944_s16  ;;  %1727 = vrot.lane.b32.xlu2 %v3878_v3, %s2944_s16 }
 0x99e   : > { %1731 = vrot.lane.b32.xlu1 %v3884_v33, %s2944_s16 }
 0x9a5   : > { %1733 = vrot.lane.b32.xlu2 %v3887_v43, %s2944_s16 }
 0x9e7   : > { %v1696_v32 = vpop.permute.xlu0 %1695  ;;  %v1700_v50 = vpop.permute.xlu2 %1699 }
 0x9e8   : > { %v1719_v36 = vadd.f32 %v1696_v32, %v1651_v18  ;;  %v1721_v38 = vadd.f32 %v1700_v50, %v1653_v2  ;;  %v1698_v25 = vpop.permute.xlu1 %1697  ;;  %v2866_v32 = vld [vmem:[%s4448_s3 + $0x10] sm:$0x1f] }
 0x9e9   : > { %v1720_v58 = vadd.f32 %v1698_v25, %v1652_v15  ;;  %v4062_v50 = vrot.slane %v2866_v32, 4 }
 0x9ef   : > { %v1706_v26 = vpop.permute.xlu2 %1705 }
 0x9f0   : > { %v1724_v10 = vadd.f32 %v1706_v26, %v1656_v37 }
 0x9f7   : > { %v1728_v9 = vpop.permute.xlu2 %1727 }
 0x9f8   : > { %2702 = vpush %v1728_v9 }
 0x9ff   : > { %v1702_v20 = vpop.permute.xlu0 %1701  ;;  %v1734_v1 = vpop.permute.xlu2 %1733 }
 0xa00   : > { %v1722_v47 = vadd.f32 %v1702_v20, %v1654_v60  ;;  %v1704_v21 = vpop.permute.xlu1 %1703 }
 0xa01   : > { %v1723_v19 = vadd.f32 %v1704_v21, %v1655_v54 }
 0xa07   : > { %v1708_v53 = vpop.permute.xlu0 %1707 }
 0xa08   : > { %v1725_v59 = vadd.f32 %v1708_v53, %v1657_v40  ;;  %v1710_v24 = vpop.permute.xlu1 %1709 }
 0xa09   : > { %v1726_v4 = vadd.f32 %v1710_v24, %v1658_v55 }
 0xa0f   : > { %v1730_v7 = vpop.permute.xlu0 %1729 }
 0xa10   : > { %v1732_v27 = vpop.permute.xlu1 %1731  ;;  %2704 = vpush %v1730_v7 }
 0xa11   : > { %2706 = vpush %v1732_v27 }
 0xa12   : > { %2708 = vpush %v1734_v1 }
 0xa29   : > { %s2703_s11 = spop %2702 }
 0xa2a   : > { %v1736_v18 = vstv %s2703_s11 }
 0xa2b   : > { %v1747_v2 = vmul.f32 %v1736_v18, %v3917_v12  ;;  %v1748_v15 = vmul.f32 %v1736_v18, %v3921_v34 }
 0xa2d   : > { %1763 = vrot.lane.b32.xlu0 %v1747_v2, %s2944_s16  ;;  %1765 = vrot.lane.b32.xlu1 %v1748_v15, %s2944_s16 }
 0xa41   : > { %s2705_s8 = spop %2704 }
 0xa42   : > { %v1739_v37 = vstv %s2705_s8  ;;  %s2707_s9 = spop %2706 }
 0xa43   : > { %v1749_v45 = vmul.f32 %v1739_v37, %v3919_v41  ;;  %v1750_v60 = vmul.f32 %v1739_v37, %v3939_v29  ;;  %v1742_v52 = vstv %s2707_s9  ;;  %s2709_s13 = spop %2708 }
 0xa44   : > { %v1751_v44 = vmul.f32 %v1742_v52, %v3942_v22  ;;  %v1745_v54 = vstv %s2709_s13  ;;  %v1752_v48 = vmul.f32 %v1742_v52, %v3935_v13  ;;  %v4115_v52 = vld [vmem:[#allocation2 + $0x3c] sm:$0xff] }
 0xa45   : > { %1767 = vrot.lane.b32.xlu2 %v1749_v45, %s2944_s16  ;;  %1769 = vrot.lane.b32.xlu0 %v1750_v60, %s2944_s16  ;;  %v1753_v5 = vmul.f32 %v1745_v54, %v3961_v51  ;;  %v1754_v6 = vmul.f32 %v1745_v54, %v3963_v39 }
 0xa46   : > { %1771 = vrot.lane.b32.xlu1 %v1751_v44, %s2944_s16 }
 0xa4d   : > { %1775 = vrot.lane.b32.xlu0 %v1753_v5, %s2944_s16  ;;  %1773 = vrot.lane.b32.xlu2 %v1752_v48, %s2944_s16 }
 0xa4e   : > { %1777 = vrot.lane.b32.xlu1 %v1754_v6, %s2944_s16 }
 0xa55   : > { %1797 = vrot.lane.b32.xlu0 %v3881_v42, %s2945_s6  ;;  %1795 = vrot.lane.b32.xlu2 %v3878_v3, %s2945_s6 }
 0xa56   : > { %1799 = vrot.lane.b32.xlu1 %v3884_v33, %s2945_s6 }
 0xa5d   : > { %1801 = vrot.lane.b32.xlu2 %v3887_v43, %s2945_s6 }
 0xa9f   : > { %v1764_v23 = vpop.permute.xlu0 %1763  ;;  %v1768_v56 = vpop.permute.xlu2 %1767 }
 0xaa0   : > { %v4033_v40 = vadd.f32 %v1764_v23, %v1719_v36  ;;  %v4035_v57 = vadd.f32 %v1768_v56, %v1721_v38  ;;  %v1766_v55 = vpop.permute.xlu1 %1765  ;;  %v2867_v36 = vld [vmem:[%s4448_s3 + $0x18] sm:$0x1f]  ;;  %v4121_v23 = vld [vmem:[#allocation2 + $0x24] sm:$0xff] }
 0xaa1   : > { %v4037_v8 = vadd.f32 %v1766_v55, %v1720_v58  ;;  %v4067_v38 = vrot.slane %v2867_v36, 4 }
 0xaa7   : > { %v1774_v63 = vpop.permute.xlu2 %1773 }
 0xaa8   : > { %v4039_v42 = vadd.f32 %v1774_v63, %v1724_v10 }
 0xaaf   : > { %v1796_v0 = vpop.permute.xlu2 %1795 }
 0xab0   : > { %2710 = vpush %v1796_v0 }
 0xab7   : > { %v1770_v3 = vpop.permute.xlu0 %1769  ;;  %v1802_v62 = vpop.permute.xlu2 %1801 }
 0xab8   : > { %v4041_v31 = vadd.f32 %v1770_v3, %v1722_v47  ;;  %v1772_v33 = vpop.permute.xlu1 %1771 }
 0xab9   : > { %v4043_v14 = vadd.f32 %v1772_v33, %v1723_v19 }
 0xabf   : > { %v1776_v43 = vpop.permute.xlu0 %1775 }
 0xac0   : > { %v4045_v30 = vadd.f32 %v1776_v43, %v1725_v59  ;;  %v1778_v61 = vpop.permute.xlu1 %1777  ;;  %v4101_v59 = vld [vmem:[#allocation2 + $0xc] sm:$0xff] }
 0xac1   : > { %v4047_v17 = vadd.f32 %v1778_v61, %v1726_v4 }
 0xac7   : > { %v1798_v35 = vpop.permute.xlu0 %1797 }
 0xac8   : > { %v1800_v16 = vpop.permute.xlu1 %1799  ;;  %2712 = vpush %v1798_v35 }
 0xac9   : > { %2714 = vpush %v1800_v16 }
 0xaca   : > { %2716 = vpush %v1802_v62 }
 0xacb   : > { %2718 = vpush %v4052_v49 }
 0xacc   : > { %2720 = vpush %v4057_v28 }
 0xacd   : > { %2722 = vpush %v4062_v50 }
 0xace   : > { %2724 = vpush %v4067_v38 }
 0xae1   : > { %s2711_s11 = spop %2710 }
 0xae2   : > { %v1804_v25 = vstv %s2711_s11 }
 0xae3   : > { %v1815_v58 = vmul.f32 %v1804_v25, %v3917_v12  ;;  %v1816_v26 = vmul.f32 %v1804_v25, %v3921_v34 }
 0xae5   : > { %1831 = vrot.lane.b32.xlu0 %v1815_v58, %s2945_s6  ;;  %1833 = vrot.lane.b32.xlu1 %v1816_v26, %s2945_s6  ;;  %v4167_v26 = vld [vmem:[#allocation2 + $0x54] sm:$0xff] }
 0xaf9   : > { %s2713_s8 = spop %2712 }
 0xafa   : > { %v1807_v10 = vstv %s2713_s8  ;;  %s2715_s9 = spop %2714 }
 0xafb   : > { %v1817_v9 = vmul.f32 %v1807_v10, %v3919_v41  ;;  %v1818_v20 = vmul.f32 %v1807_v10, %v3939_v29  ;;  %v1810_v47 = vstv %s2715_s9  ;;  %s2717_s13 = spop %2716  ;;  %v4097_v29 = vld [vmem:[#allocation2 + $0x4] sm:$0xff] }
 0xafc   : > { %v1819_v21 = vmul.f32 %v1810_v47, %v3942_v22  ;;  %v1813_v12 = vstv %s2717_s13  ;;  %v1820_v34 = vmul.f32 %v1810_v47, %v3935_v13  ;;  %s2719_s17 = spop %2718  ;;  %v4099_v22 = vld [vmem:[#allocation2 + $0x1c] sm:$0xff] }
 0xafd   : > { %1835 = vrot.lane.b32.xlu2 %v1817_v9, %s2945_s6  ;;  %1837 = vrot.lane.b32.xlu0 %v1818_v20, %s2945_s6  ;;  %v1821_v19 = vmul.f32 %v1813_v12, %v3961_v51  ;;  %v1822_v53 = vmul.f32 %v1813_v12, %v3963_v39  ;;  %s2721_s26 = spop %2720  ;;  %v1876_v41 = vstv %s2719_s17 }
 0xafe   : > { %1839 = vrot.lane.b32.xlu1 %v1819_v21, %s2945_s6  ;;  %v1879_v13 = vstv %s2721_s26  ;;  %v1887_v24 = vmul.f32 %v1876_v41, %v4097_v29  ;;  %v1888_v18 = vmul.f32 %v1876_v41, %v4101_v59  ;;  %s2723_s10 = spop %2722 }
 0xaff   : > { %v1889_v4 = vmul.f32 %v1879_v13, %v4099_v22  ;;  %v1882_v60 = vstv %s2723_s10  ;;  %s4139_s25 = spop %2724 }
 0xb00   : > { %v1892_v54 = vmul.f32 %v1882_v60, %v4115_v52 }
 0xb05   : > { %1843 = vrot.lane.b32.xlu0 %v1821_v19, %s2945_s6  ;;  %1841 = vrot.lane.b32.xlu2 %v1820_v34, %s2945_s6 }
 0xb06   : > { %1845 = vrot.lane.b32.xlu1 %v1822_v53, %s2945_s6 }
 0xb0d   : > { %1905 = vrot.lane.b32.xlu0 %v4057_v28, %s2933_s23  ;;  %1903 = vrot.lane.b32.xlu2 %v4052_v49, %s2933_s23 }
 0xb0e   : > { %1907 = vrot.lane.b32.xlu1 %v4062_v50, %s2933_s23 }
 0xb15   : > { %1909 = vrot.lane.b32.xlu2 %v4067_v38, %s2933_s23 }
 0xb57   : > { %v1832_v51 = vpop.permute.xlu0 %1831  ;;  %v1836_v39 = vpop.permute.xlu2 %1835 }
 0xb58   : > { %v1855_v7 = vadd.f32 %v1832_v51, %v4033_v40  ;;  %v1857_v1 = vadd.f32 %v1836_v39, %v4035_v57  ;;  %v1834_v27 = vpop.permute.xlu1 %1833  ;;  %v1890_v40 = vmul.f32 %v1879_v13, %v4121_v23  ;;  %v4124_v57 = vld [vmem:[#allocation2 + $0x34] sm:$0xff] }
 0xb59   : > { %v1856_v2 = vadd.f32 %v1834_v27, %v4037_v8  ;;  %v1891_v63 = vmul.f32 %v1882_v60, %v4124_v57 }
 0xb5a   : > { %v4109_v15 = vadd.f32 %v1887_v24, %v1855_v7  ;;  %v4111_v37 = vadd.f32 %v1889_v4, %v1857_v1 }
 0xb5b   : > { %v4113_v45 = vadd.f32 %v1888_v18, %v1856_v2 }
 0xb5f   : > { %v1842_v44 = vpop.permute.xlu2 %1841 }
 0xb60   : > { %v1860_v48 = vadd.f32 %v1842_v44, %v4039_v42 }
 0xb62   : > { %v4119_v5 = vadd.f32 %v1892_v54, %v1860_v48 }
 0xb67   : > { %v1904_v6 = vpop.permute.xlu2 %1903 }
 0xb68   : > { %2726 = vpush %v1904_v6 }
 0xb6f   : > { %v1838_v56 = vpop.permute.xlu0 %1837  ;;  %v1910_v46 = vpop.permute.xlu2 %1909 }
 0xb70   : > { %v1858_v55 = vadd.f32 %v1838_v56, %v4041_v31  ;;  %v1840_v8 = vpop.permute.xlu1 %1839 }
 0xb71   : > { %v1859_v0 = vadd.f32 %v1840_v8, %v4043_v14 }
 0xb72   : > { %v4129_v3 = vadd.f32 %v1890_v40, %v1858_v55 }
 0xb73   : > { %v4131_v42 = vadd.f32 %v1891_v63, %v1859_v0 }
 0xb77   : > { %v1844_v33 = vpop.permute.xlu0 %1843 }
 0xb78   : > { %v4134_v43 = vadd.f32 %v1844_v33, %v4045_v30  ;;  %v1846_v61 = vpop.permute.xlu1 %1845 }
 0xb79   : > { %v4137_v35 = vadd.f32 %v1846_v61, %v4047_v17 }
 0xb7f   : > { %v1906_v62 = vpop.permute.xlu0 %1905 }
 0xb80   : > { %v1908_v31 = vpop.permute.xlu1 %1907  ;;  %2728 = vpush %v1906_v62 }
 0xb81   : > { %2730 = vpush %v1908_v31 }
 0xb82   : > { %2732 = vpush %v1910_v46 }
 0xb99   : > { %s2727_s14 = spop %2726 }
 0xb9a   : > { %v1912_v14 = vstv %s2727_s14 }
 0xb9b   : > { %v1923_v16 = vmul.f32 %v1912_v14, %v4097_v29  ;;  %v1924_v11 = vmul.f32 %v1912_v14, %v4101_v59 }
 0xb9d   : > { %1939 = vrot.lane.b32.xlu0 %v1923_v16, %s2933_s23  ;;  %1941 = vrot.lane.b32.xlu1 %v1924_v11, %s2933_s23 }
 0xba5   : > { %1971 = vrot.lane.b32.xlu1 %v4052_v49, %s2943_s15 }
 0xbad   : > { %1977 = vrot.lane.b32.xlu1 %v4067_v38, %s2943_s15 }
 0xbb1   : > { %s2729_s12 = spop %2728 }
 0xbb2   : > { %v1915_v30 = vstv %s2729_s12  ;;  %s2731_s7 = spop %2730 }
 0xbb3   : > { %v1925_v17 = vmul.f32 %v1915_v30, %v4099_v22  ;;  %v1926_v32 = vmul.f32 %v1915_v30, %v4121_v23  ;;  %v1918_v36 = vstv %s2731_s7  ;;  %s2733_s30 = spop %2732 }
 0xbb4   : > { %v1927_v25 = vmul.f32 %v1918_v36, %v4124_v57  ;;  %v1921_v58 = vstv %s2733_s30  ;;  %v1928_v9 = vmul.f32 %v1918_v36, %v4115_v52 }
 0xbb5   : > { %1943 = vrot.lane.b32.xlu2 %v1925_v17, %s2933_s23  ;;  %1945 = vrot.lane.b32.xlu0 %v1926_v32, %s2933_s23  ;;  %v1930_v10 = vmul.f32 %v1921_v58, %v4167_v26 }
 0xbb6   : > { %2043 = vrot.lane.b32.xlu1 %v4062_v50, %s2944_s16 }
 0xbbd   : > { %1973 = vrot.lane.b32.xlu2 %v4057_v28, %s2943_s15  ;;  %1975 = vrot.lane.b32.xlu0 %v4062_v50, %s2943_s15 }
 0xbbe   : > { %2109 = vrot.lane.b32.xlu1 %v4057_v28, %s2945_s6 }
 0xbc5   : > { %2039 = vrot.lane.b32.xlu2 %v4052_v49, %s2944_s16  ;;  %2041 = vrot.lane.b32.xlu0 %v4057_v28, %s2944_s16  ;;  %v4179_v28 = vld [vmem:[#allocation2 + $0x4c] sm:$0xff] }
 0xbc6   : > { %1947 = vrot.lane.b32.xlu1 %v1927_v25, %s2933_s23  ;;  %v1929_v20 = vmul.f32 %v1921_v58, %v4179_v28 }
 0xbcd   : > { %2045 = vrot.lane.b32.xlu2 %v4067_v38, %s2944_s16  ;;  %2107 = vrot.lane.b32.xlu0 %v4052_v49, %s2945_s6 }
 0xbce   : > { %1953 = vrot.lane.b32.xlu1 %v1930_v10, %s2933_s23 }
 0xbd5   : > { %2111 = vrot.lane.b32.xlu2 %v4062_v50, %s2945_s6  ;;  %2113 = vrot.lane.b32.xlu0 %v4067_v38, %s2945_s6 }
 0xbdd   : > { %1951 = vrot.lane.b32.xlu0 %v1929_v20, %s2933_s23  ;;  %1949 = vrot.lane.b32.xlu2 %v1928_v9, %s2933_s23 }
 0xc0f   : > { %v1940_v47 = vpop.permute.xlu0 %1939  ;;  %v1944_v49 = vpop.permute.xlu2 %1943 }
 0xc10   : > { %v4186_v21 = vadd.f32 %v1940_v47, %v4109_v15  ;;  %v4189_v50 = vadd.f32 %v1944_v49, %v4111_v37  ;;  %v1942_v12 = vpop.permute.xlu1 %1941 }
 0xc11   : > { %v4192_v38 = vadd.f32 %v1942_v12, %v4113_v45  ;;  %v2819_v12 = vld [vmem:[%s4449_s4 + $0x3] ss:$0 sm:$0xff] }
 0xc17   : > { %v1974_v34 = vpop.permute.xlu2 %1973 }
 0xc18   : > { %v1972_v19 = vpop.permute.xlu1 %1971 }
 0xc19   : > { %2734 = vpush %v1972_v19  ;;  %v2372_v19 = vld [vmem:[#allocation2 + $0xa] sm:$0xff] }
 0xc1a   : > { %2736 = vpush %v1974_v34 }
 0xc1f   : > { %v2040_v39 = vpop.permute.xlu2 %2039 }
 0xc20   : > { %v1978_v53 = vpop.permute.xlu1 %1977 }
 0xc27   : > { %v1946_v41 = vpop.permute.xlu0 %1945  ;;  %v2046_v7 = vpop.permute.xlu2 %2045 }
 0xc28   : > { %v4195_v13 = vadd.f32 %v1946_v41, %v4129_v3  ;;  %v2044_v51 = vpop.permute.xlu1 %2043  ;;  %v2385_v41 = vld [vmem:[#allocation2 + $0x1a] sm:$0xff] }
 0xc2f   : > { %v1976_v24 = vpop.permute.xlu0 %1975  ;;  %v2112_v15 = vpop.permute.xlu2 %2111 }
 0xc30   : > { %v2110_v4 = vpop.permute.xlu1 %2109  ;;  %2738 = vpush %v1976_v24  ;;  %v2399_v24 = vld [vmem:[#allocation2 + $0x32] sm:$0xff] }
 0xc31   : > { %2740 = vpush %v1978_v53  ;;  %v2371_v53 = vld [vmem:[#allocation2 + $0x2] sm:$0xff] }
 0xc32   : > { %2742 = vpush %v2040_v39 }
 0xc37   : > { %v2042_v1 = vpop.permute.xlu0 %2041  ;;  %v4260_v34 = vpop.permute.xlu2 %1949 }
 0xc38   : > { %v1948_v27 = vpop.permute.xlu1 %1947  ;;  %2744 = vpush %v2042_v1 }
 0xc39   : > { %v4198_v18 = vadd.f32 %v1948_v27, %v4131_v42  ;;  %2746 = vpush %v2044_v51 }
 0xc3a   : > { %2748 = vpush %v2046_v7  ;;  %v2400_v7 = vld [vmem:[#allocation2 + $0x3a] sm:$0xff] }
 0xc3f   : > { %v2108_v2 = vpop.permute.xlu0 %2107 }
 0xc40   : > { %2750 = vpush %v2108_v2  ;;  %v2414_v2 = vld [vmem:[#allocation2 + $0x52] sm:$0xff] }
 0xc41   : > { %2752 = vpush %v2110_v4  ;;  %v2386_v4 = vld [vmem:[#allocation2 + $0x22] sm:$0xff] }
 0xc42   : > { %2754 = vpush %v2112_v15  ;;  %v2413_v15 = vld [vmem:[#allocation2 + $0x4a] sm:$0xff] }
 0xc47   : > { %v2114_v37 = vpop.permute.xlu0 %2113 }
 0xc48   : > { %2756 = vpush %v2114_v37 }
 0xc4a   : > { %s2735_s23 = spop %2734 }
 0xc4b   : > { %v1980_v45 = vstv %s2735_s23  ;;  %s2737_s11 = spop %2736 }
 0xc4c   : > { %v1991_v60 = vmul.f32 %v1980_v45, %v4097_v29  ;;  %v1992_v44 = vmul.f32 %v1980_v45, %v4101_v59  ;;  %v1983_v54 = vstv %s2737_s11 }
 0xc4d   : > { %v1993_v48 = vmul.f32 %v1983_v54, %v4099_v22  ;;  %v1994_v6 = vmul.f32 %v1983_v54, %v4121_v23 }
 0xc4e   : > { %2009 = vrot.lane.b32.xlu0 %v1992_v44, %s2943_s15  ;;  %2007 = vrot.lane.b32.xlu2 %v1991_v60, %s2943_s15 }
 0xc4f   : > { %2011 = vrot.lane.b32.xlu1 %v1993_v48, %s2943_s15  ;;  %v1952_v45 = vpop.permute.xlu0 %1951 }
 0xc56   : > { %2013 = vrot.lane.b32.xlu2 %v1994_v6, %s2943_s15  ;;  %v1954_v6 = vpop.permute.xlu1 %1953 }
 0xc61   : > { %s2739_s8 = spop %2738 }
 0xc62   : > { %v1986_v56 = vstv %s2739_s8  ;;  %s2741_s9 = spop %2740 }
 0xc63   : > { %v1995_v40 = vmul.f32 %v1986_v56, %v4124_v57  ;;  %v1996_v55 = vmul.f32 %v1986_v56, %v4115_v52  ;;  %v1989_v8 = vstv %s2741_s9  ;;  %s2743_s13 = spop %2742 }
 0xc64   : > { %v1997_v63 = vmul.f32 %v1989_v8, %v4179_v28  ;;  %v2048_v0 = vstv %s2743_s13  ;;  %v1998_v3 = vmul.f32 %v1989_v8, %v4167_v26  ;;  %s2888_s13 = scalar_lea.hbm %s4450_s5, 256 }
 0xc65   : > { %2017 = vrot.lane.b32.xlu1 %v1996_v55, %s2943_s15  ;;  %2015 = vrot.lane.b32.xlu0 %v1995_v40, %s2943_s15  ;;  %v2059_v42 = vmul.f32 %v2048_v0, %v4097_v29  ;;  %v2060_v33 = vmul.f32 %v2048_v0, %v4101_v59 }
 0xc66   : > { %2019 = vrot.lane.b32.xlu2 %v1997_v63, %s2943_s15 }
 0xc69   : > { %s2745_s17 = spop %2744 }
 0xc6a   : > { %s2747_s26 = spop %2746  ;;  %v2051_v61 = vstv %s2745_s17 }
 0xc6b   : > { %v2054_v62 = vstv %s2747_s26  ;;  %v2061_v46 = vmul.f32 %v2051_v61, %v4099_v22  ;;  %v2062_v31 = vmul.f32 %v2051_v61, %v4121_v23  ;;  %s2749_s10 = spop %2748 }
 0xc6c   : > { %v2063_v14 = vmul.f32 %v2054_v62, %v4124_v57  ;;  %v2057_v16 = vstv %s2749_s10  ;;  %v2064_v11 = vmul.f32 %v2054_v62, %v4115_v52  ;;  %s2557_s10 = sshll.u32 %s2999_s22, 7 }
 0xc6d   : > { %2075 = vrot.lane.b32.xlu1 %v2059_v42, %s2944_s16  ;;  %2021 = vrot.lane.b32.xlu0 %v1998_v3, %s2943_s15  ;;  %v2065_v30 = vmul.f32 %v2057_v16, %v4179_v28  ;;  %v2066_v17 = vmul.f32 %v2057_v16, %v4167_v26 }
 0xc6e   : > { %2077 = vrot.lane.b32.xlu2 %v2060_v33, %s2944_s16 }
 0xc71   : > { %s2751_s14 = spop %2750 }
 0xc72   : > { %s2753_s12 = spop %2752  ;;  %v2116_v32 = vstv %s2751_s14 }
 0xc73   : > { %v2119_v36 = vstv %s2753_s12  ;;  %v2127_v25 = vmul.f32 %v2116_v32, %v4097_v29  ;;  %v2128_v58 = vmul.f32 %v2116_v32, %v4101_v59  ;;  %s2755_s7 = spop %2754  ;;  %s2450_s12 = scalar_lea.hbm %s4450_s5, %s2557_s10 }
 0xc74   : > { %v2129_v10 = vmul.f32 %v2119_v36, %v4099_v22  ;;  %v2122_v9 = vstv %s2755_s7  ;;  %v2130_v20 = vmul.f32 %v2119_v36, %v4121_v23  ;;  %v2816_v22 = vld [vmem:[%s4449_s4] ss:$0 sm:$0xff] }
 0xc75   : > { %2081 = vrot.lane.b32.xlu1 %v2062_v31, %s2944_s16  ;;  %2079 = vrot.lane.b32.xlu0 %v2061_v46, %s2944_s16  ;;  %v2131_v47 = vmul.f32 %v2122_v9, %v4124_v57  ;;  %v2132_v49 = vmul.f32 %v2122_v9, %v4115_v52  ;;  %v2817_v52 = vld [vmem:[%s4449_s4 + $0x2] ss:$0 sm:$0xff]  ;;  %v2818_v57 = vld [vmem:[%s4449_s4 + $0x1] ss:$0 sm:$0xff] }
 0xc76   : > { %2083 = vrot.lane.b32.xlu2 %v2063_v14, %s2944_s16 }
 0xc7d   : > { %2087 = vrot.lane.b32.xlu1 %v2065_v30, %s2944_s16  ;;  %2085 = vrot.lane.b32.xlu0 %v2064_v11, %s2944_s16 }
 0xc7e   : > { %2089 = vrot.lane.b32.xlu2 %v2066_v17, %s2944_s16  ;;  %s2757_s16 = spop %2756 }
 0xc7f   : > { %v2125_v29 = vstv %s2757_s16  ;;  %s2453_s16 = sshll.u32 %s2450_s12, 4  ;;  %s2454_s16 = int_to_ptr.hbm [resolvable:$true] %s2453_s16 }
 0xc80   : > { %v2133_v59 = vmul.f32 %v2125_v29, %v4179_v28  ;;  %v2134_v23 = vmul.f32 %v2125_v29, %v4167_v26  ;;  %s2882_s23 = sshra.s32 %s2454_s16, 4  ;;  %s2883_s23 = int_to_ptr.hbm [resolvable:$true] %s2882_s23 }
 0xc81   : > { %s2884_s11 = scalar_lea.hbm %s2883_s23, 128  ;;  %p2889_p0 = scmp.lt.s32.totalorder %s2883_s23, %s4450_s5 }
 0xc82   : > { %p2885_p11 = scmp.ne.s32.totalorder %s2883_s23, %s2884_s11  ;;  %p2890_p1 = scmp.lt.s32.totalorder %s2888_s13, %s2884_s11 }
 0xc84   : > { %p2886_p12 = pnand %p2885_p11, %p3016_p5  ;;  %p2891_p2 = por %p2890_p1, %p2889_p0 }
 0xc85   : > { %2145 = vrot.lane.b32.xlu1 %v2128_v58, %s2945_s6  ;;  %2143 = vrot.lane.b32.xlu0 %v2127_v25, %s2945_s6 }
 0xc86   : > { %2147 = vrot.lane.b32.xlu2 %v2129_v10, %s2945_s6  ;;  %p2887_p13 = pneg %p2886_p12 }
 0xc88   : > { %p2892_p3 = pnand %p2891_p2, %p2887_p13 }
 0xc8d   : > { %2151 = vrot.lane.b32.xlu1 %v2131_v47, %s2945_s6  ;;  %2149 = vrot.lane.b32.xlu0 %v2130_v20, %s2945_s6 }
 0xc8e   : > { %2153 = vrot.lane.b32.xlu2 %v2132_v49, %s2945_s6 }
 0xc95   : > { %2157 = vrot.lane.b32.xlu1 %v2134_v23, %s2945_s6  ;;  %2155 = vrot.lane.b32.xlu0 %v2133_v59, %s2945_s6 }
 0xc96   : > { %2188 = vperm.xlu2 %2814, %v2816_v22  }
 0xc9d   : > { %2196 = vperm.xlu1 %2815, %v2817_v52   ;;  %2192 = vperm.xlu0 %2813, %v2818_v57  }
 0xc9e   : > { %2200 = vperm.xlu2 %2814, %v2819_v12  }
 0xca5   : > { %2377 = vrot.lane.b32.xlu1 %v2372_v19, %s2943_s15  ;;  %2375 = vrot.lane.b32.xlu0 %v2371_v53, %s2943_s15 }
 0xca6   : > { %2389 = vrot.lane.b32.xlu2 %v2385_v41, %s2943_s15 }
 0xca8   : > { %v2008_v51 = vpop.permute.xlu2 %2007 }
 0xca9   : > { %v2031_v39 = vadd.f32 %v2008_v51, %v4186_v21  ;;  %v1885_v21 = vstv %s4139_s25 }
 0xcaa   : > { %v1893_v37 = vmul.f32 %v1885_v21, %v4179_v28 }
 0xcac   : > { %v1901_v60 = vadd.f32 %v1893_v37, %v4134_v43 }
 0xcad   : > { %2403 = vrot.lane.b32.xlu1 %v2399_v24, %s2943_s15  ;;  %2391 = vrot.lane.b32.xlu0 %v2386_v4, %s2943_s15 }
 0xcae   : > { %2405 = vrot.lane.b32.xlu2 %v2400_v7, %s2943_s15  ;;  %v1969_v44 = vadd.f32 %v1952_v45, %v1901_v60 }
 0xcb0   : > { %v2014_v1 = vpop.permute.xlu2 %2013 }
 0xcb1   : > { %v4270_v27 = vadd.f32 %v2014_v1, %v4195_v13 }
 0xcb5   : > { %2419 = vrot.lane.b32.xlu1 %v2414_v2, %s2943_s15  ;;  %2417 = vrot.lane.b32.xlu0 %v2413_v15, %s2943_s15  ;;  %s215_s15 = sand.u32 1, %s2922_s19  }
 0xcb6   : > { %s2520_s6 = sshll.u32 %s215_s15, 7  ;;  %s2439_s30 = scalar_lea.sflag [#allocation4], %s215_s15 }
 0xcb7   : > { %s4292_s25 = scalar_lea.vmem [#allocation3], %s2520_s6 }
 0xcb8   : > { %s2451_s7 = sshll.u32 %s4292_s25, 4  ;;  %s2452_s7 = int_to_ptr.vmem [resolvable:$true] %s2451_s7 }
 0xcc0   : > { %v2020_v54 = vpop.permute.xlu2 %2019  ;;  %v2010_v40 = vpop.permute.xlu0 %2009 }
 0xcc1   : > { %v2037_v48 = vadd.f32 %v2020_v54, %v1969_v44  ;;  %v2012_v13 = vpop.permute.xlu1 %2011  ;;  %v2032_v11 = vadd.f32 %v2010_v40, %v4192_v38  ;;  %v1894_v38 = vmul.f32 %v1885_v21, %v4167_v26  ;;  %v1968_v26 = vadd.f32 %v4260_v34, %v4119_v5 }
 0xcc3   : > { %v1902_v49 = vadd.f32 %v1894_v38, %v4137_v35  ;;  %v2033_v35 = vadd.f32 %v2012_v13, %v4189_v50 }
 0xcc5   : > { %v1970_v23 = vadd.f32 %v1954_v6, %v1902_v49 }
 0xcc8   : > { %v2078_v56 = vpop.permute.xlu2 %2077 }
 0xcc9   : > { %v2100_v30 = vadd.f32 %v2078_v56, %v2032_v11 }
 0xcd0   : > { %v2084_v55 = vpop.permute.xlu2 %2083 }
 0xcd7   : > { %v2016_v8 = vpop.permute.xlu0 %2015  ;;  %v2018_v63 = vpop.permute.xlu1 %2017 }
 0xcd8   : > { %v2035_v0 = vadd.f32 %v2016_v8, %v4198_v18  ;;  %v2090_v3 = vpop.permute.xlu2 %2089  ;;  %v2036_v41 = vadd.f32 %v2018_v63, %v1968_v26 }
 0xcda   : > { %v4278_v42 = vadd.f32 %v2084_v55, %v2035_v0 }
 0xcdf   : > { %v2022_v28 = vpop.permute.xlu0 %2021  ;;  %v2076_v33 = vpop.permute.xlu1 %2075 }
 0xce0   : > { %v2148_v61 = vpop.permute.xlu2 %2147  ;;  %v2099_v17 = vadd.f32 %v2076_v33, %v2031_v39  ;;  %v2038_v52 = vadd.f32 %v2022_v28, %v1970_v23 }
 0xce2   : > { %v2106_v24 = vadd.f32 %v2090_v3, %v2038_v52 }
 0xce7   : > { %v2080_v43 = vpop.permute.xlu0 %2079  ;;  %v2082_v62 = vpop.permute.xlu1 %2081 }
 0xce8   : > { %v2154_v46 = vpop.permute.xlu2 %2153  ;;  %v2101_v7 = vadd.f32 %v2080_v43, %v2033_v35  ;;  %v2102_v34 = vadd.f32 %v2082_v62, %v4270_v27 }
 0xcea   : > { %v2169_v37 = vadd.f32 %v2148_v61, %v2101_v7 }
 0xcef   : > { %v2086_v31 = vpop.permute.xlu0 %2085  ;;  %v2088_v14 = vpop.permute.xlu1 %2087 }
 0xcf0   : > { %v2189_v16 = vpop.permute.xlu2 %2188  ;;  %v2105_v51 = vadd.f32 %v2088_v14, %v2037_v48  ;;  %v2104_v2 = vadd.f32 %v2086_v31, %v2036_v41 }
 0xcf2   : > { %v2172_v60 = vadd.f32 %v2154_v46, %v2104_v2 }
 0xcf7   : > { %v2144_v32 = vpop.permute.xlu0 %2143  ;;  %v2146_v18 = vpop.permute.xlu1 %2145 }
 0xcf8   : > { %v2167_v36 = vadd.f32 %v2144_v32, %v2099_v17  ;;  %v2201_v25 = vpop.permute.xlu2 %2200  ;;  %v2168_v58 = vadd.f32 %v2146_v18, %v2100_v30 }
 0xcfa   : > { %v4282_v10 = vadd.f32 %v2189_v16, %v2167_v36  ;;  %v4284_v9 = vadd.f32 %v2189_v16, %v2168_v58 }
 0xcfc   : > { %v2529_v20 = vmul.f32 -1.442695, %v4282_v10  ;;  %v2530_v47 = vmul.f32 -1.442695, %v4284_v9 }
 0xcfe   : > { %2828 = vpow2.f32 %v2529_v20 }
 0xcff   : > { %2830 = vpow2.f32 %v2530_v47  ;;  %v2150_v29 = vpop.permute.xlu0 %2149  ;;  %v2152_v22 = vpop.permute.xlu1 %2151 }
 0xd00   : > { %v2390_v59 = vpop.permute.xlu2 %2389  ;;  %v2170_v44 = vadd.f32 %v2150_v29, %v2102_v34  ;;  %v2171_v13 = vadd.f32 %v2152_v22, %v4278_v42 }
 0xd01   : > { %2537 = vst.msk [vmem:[%s4292_s25 + $0x40] sm:$0xff] %vm2381_vm13, %v2390_v59 }
 0xd04   : > { %v2829_v57 = vpop.eup %2828 }
 0xd05   : > { %v2831_v12 = vpop.eup %2830  ;;  %v2235_v19 = vadd.f32 1.0, %v2829_v57 }
 0xd06   : > { %v4299_v53 = vadd.f32 1.0, %v2831_v12 }
 0xd07   : > { %2832 = vrcp.f32 %v2235_v19  ;;  %v2156_v39 = vpop.permute.xlu0 %2155  ;;  %v2158_v4 = vpop.permute.xlu1 %2157  ;;  %vm2248_vm14 = vweird.f32 %v2235_v19  ;;  %v2252_v40 = vand.u32 2147483647, %v2235_v19  ;;  %v2254_v55 = vand.u32 2147483648, %v2235_v19 }
 0xd08   : > { %2834 = vrcp.f32 %v4299_v53  ;;  %v2406_v1 = vpop.permute.xlu2 %2405  ;;  %v2173_v15 = vadd.f32 %v2156_v39, %v2105_v51  ;;  %v2174_v5 = vadd.f32 %v2158_v4, %v2106_v24  ;;  %v2267_v8 = vand.u32 2147483647, %v4299_v53 }
 0xd09   : > { %2540 = vst.msk [vmem:[%s4292_s25 + $0x18] sm:$0xff] %vm2381_vm13, %v2406_v1  ;;  %v2269_v43 = vand.u32 2147483648, %v4299_v53  ;;  %vm2253_vm1 = vcmp.eq.f32.partialorder %v2252_v40, 8.507059e+37  ;;  %vm2263_vm2 = vweird.f32 %v4299_v53  ;;  %v2255_v18 = vor.u32 1.1754944e-38, %v2254_v55 }
 0xd0a   : > { %v4305_v50 = vadd.f32 %v2201_v25, %v2173_v15  ;;  %v4307_v21 = vadd.f32 %v2201_v25, %v2174_v5  ;;  %vm2268_vm4 = vcmp.eq.f32.partialorder %v2267_v8, 8.507059e+37 }
 0xd0b   : > { %v2270_v20 = vor.u32 1.1754944e-38, %v2269_v43 }
 0xd0c   : > { %v2535_v54 = vmul.f32 -1.442695, %v4305_v50  ;;  %v2536_v48 = vmul.f32 -1.442695, %v4307_v21 }
 0xd0d   : > { %v2833_v45 = vpop.eup %2832 }
 0xd0e   : > { %v2835_v6 = vpop.eup %2834  ;;  %v2244_v56 = vmul.f32 %v2833_v45, %v2235_v19  ;;  %2836 = vpow2.f32 %v2535_v54  ;;  %vm2249_vm15 = vweird.f32 %v2833_v45 }
 0xd0f   : > { %v2259_v27 = vmul.f32 %v2835_v6, %v4299_v53  ;;  %v2193_v63 = vpop.permute.xlu0 %2192  ;;  %v2197_v0 = vpop.permute.xlu1 %2196  ;;  %2838 = vpow2.f32 %v2536_v48  ;;  %vm2264_vm0 = vweird.f32 %v2835_v6  ;;  %vm2250_vm3 = vmor %vm2248_vm14, %vm2249_vm15 }
 0xd10   : > { %v2245_v3 = vsub.f32 1.0, %v2244_v56  ;;  %v4314_v28 = vadd.f32 %v2193_v63, %v2169_v37  ;;  %v4316_v33 = vadd.f32 %v2193_v63, %v2170_v44  ;;  %v4319_v62 = vadd.f32 %v2197_v0, %v2171_v13  ;;  %vm2265_vm5 = vmor %vm2263_vm2, %vm2264_vm0 }
 0xd11   : > { %v2260_v61 = vsub.f32 1.0, %v2259_v27  ;;  %v4321_v42 = vadd.f32 %v2197_v0, %v2172_v60 }
 0xd12   : > { %v2246_v46 = vmul.f32 %v2833_v45, %v2245_v3  ;;  %v2531_v31 = vmul.f32 -1.442695, %v4314_v28  ;;  %v2532_v14 = vmul.f32 -1.442695, %v4316_v33  ;;  %v2533_v11 = vmul.f32 -1.442695, %v4319_v62 }
 0xd13   : > { %v2261_v16 = vmul.f32 %v2835_v6, %v2260_v61  ;;  %v2534_v30 = vmul.f32 -1.442695, %v4321_v42 }
 0xd14   : > { %v2247_v17 = vadd.f32 %v2833_v45, %v2246_v46  ;;  %2840 = vpow2.f32 %v2531_v31  ;;  %v2837_v32 = vpop.eup %2836 }
 0xd15   : > { %v2262_v36 = vadd.f32 %v2835_v6, %v2261_v16  ;;  %2842 = vpow2.f32 %v2532_v14  ;;  %v2839_v25 = vpop.eup %2838  ;;  %v2241_v47 = vadd.f32 1.0, %v2837_v32 }
 0xd16   : > { %v2251_v58 = vsel %vm2250_vm3, %v2833_v45, %v2247_v17  ;;  %2844 = vpow2.f32 %v2533_v11  ;;  %v2242_v29 = vadd.f32 1.0, %v2839_v25 }
 0xd17   : > { %v2256_v38 = vsel %vm2253_vm1, %v2255_v18, %v2251_v58  ;;  %v2266_v49 = vsel %vm2265_vm5, %v2835_v6, %v2262_v36  ;;  %2846 = vpow2.f32 %v2534_v30  ;;  %v2376_v22 = vpop.permute.xlu0 %2375  ;;  %v2378_v59 = vpop.permute.xlu1 %2377  ;;  %v2344_v51 = vand.u32 2147483648, %v2241_v47 }
 0xd18   : > { %v2363_v23 = vmul.f32 %v2256_v38, %v4282_v10  ;;  %v2271_v52 = vsel %vm2268_vm4, %v2270_v20, %v2266_v49  ;;  %2848 = vrcp.f32 %v2241_v47  ;;  %2382 = vst.msk [vmem:[%s4292_s25] sm:$0xff] %vm2381_vm13, %v2376_v22  ;;  %v2357_v4 = vand.u32 2147483647, %v2242_v29 }
 0xd19   : > { %v2364_v57 = vmul.f32 %v2271_v52, %v4284_v9  ;;  %2850 = vrcp.f32 %v2242_v29  ;;  %2383 = vst.msk [vmem:[%s4292_s25 + $0x8] sm:$0xff] %vm2381_vm13, %v2378_v59  ;;  %v2342_v9 = vand.u32 2147483647, %v2241_v47  ;;  %v2359_v15 = vand.u32 2147483648, %v2242_v29 }
 0xd1a   : > { %v2841_v12 = vpop.eup %2840  ;;  %2543 = vst.msk [vmem:[%s4292_s25 + $0x20] sm:$0xff] %vm2381_vm13, %v2363_v23  ;;  %vm2338_vm6 = vweird.f32 %v2241_v47  ;;  %vm2353_vm7 = vweird.f32 %v2242_v29  ;;  %v2345_v45 = vor.u32 1.1754944e-38, %v2344_v51  ;;  %vm4358_vm10 = vcmp.eq.f32.partialorder %v2357_v4, 8.507059e+37 }
 0xd1b   : > { %v2843_v26 = vpop.eup %2842  ;;  %2544 = vst.msk [vmem:[%s4292_s25 + $0x28] sm:$0xff] %vm2381_vm13, %v2364_v57  ;;  %v4340_v19 = vadd.f32 1.0, %v2841_v12  ;;  %vm4352_vm8 = vcmp.eq.f32.partialorder %v2342_v9, 8.507059e+37  ;;  %v2360_v13 = vor.u32 1.1754944e-38, %v2359_v15 }
 0xd1c   : > { %v2845_v35 = vpop.eup %2844  ;;  %v4342_v10 = vadd.f32 1.0, %v2843_v26 }
 0xd1d   : > { %v2847_v53 = vpop.eup %2846  ;;  %2852 = vrcp.f32 %v4340_v19  ;;  %v4348_v34 = vadd.f32 1.0, %v2845_v35  ;;  %vm2278_vm12 = vweird.f32 %v4340_v19  ;;  %v2282_v8 = vand.u32 2147483647, %v4340_v19 }
 0xd1e   : > { %v2849_v41 = vpop.eup %2848  ;;  %2854 = vrcp.f32 %v4342_v10  ;;  %v4356_v44 = vadd.f32 1.0, %v2847_v53  ;;  %v2284_v61 = vand.u32 2147483648, %v4340_v19  ;;  %v2297_v31 = vand.u32 2147483647, %v4342_v10 }
 0xd1f   : > { %v2851_v39 = vpop.eup %2850  ;;  %v2334_v24 = vmul.f32 %v2849_v41, %v2241_v47  ;;  %v2392_v7 = vpop.permute.xlu0 %2391  ;;  %vm2339_vm9 = vweird.f32 %v2849_v41  ;;  %2856 = vrcp.f32 %v4348_v34  ;;  %v2299_v14 = vand.u32 2147483648, %v4342_v10 }
 0xd20   : > { %v2404_v1 = vpop.permute.xlu1 %2403  ;;  %v2349_v2 = vmul.f32 %v2851_v39, %v2242_v29  ;;  %2538 = vst.msk [vmem:[%s4292_s25 + $0x48] sm:$0xff] %vm2381_vm13, %v2392_v7  ;;  %vm2354_vm11 = vweird.f32 %v2851_v39  ;;  %vm2340_vm14 = vmor %vm2338_vm6, %vm2339_vm9  ;;  %2858 = vrcp.f32 %v4356_v44  ;;  %vm2293_vm2 = vweird.f32 %v4342_v10 }
 0xd21   : > { %v2335_v5 = vsub.f32 1.0, %v2334_v24  ;;  %2539 = vst.msk [vmem:[%s4292_s25 + $0x10] sm:$0xff] %vm2381_vm13, %v2404_v1  ;;  %vm2355_vm15 = vmor %vm2353_vm7, %vm2354_vm11  ;;  %vm2283_vm4 = vcmp.eq.f32.partialorder %v2282_v8, 8.507059e+37  ;;  %vm2298_vm5 = vcmp.eq.f32.partialorder %v2297_v31, 8.507059e+37  ;;  %v2312_v23 = vand.u32 2147483647, %v4348_v34 }
 0xd22   : > { %v2350_v60 = vsub.f32 1.0, %v2349_v2  ;;  %v2314_v12 = vand.u32 2147483648, %v4348_v34  ;;  %v2329_v51 = vand.u32 2147483648, %v4356_v44 }
 0xd23   : > { %v2853_v54 = vpop.eup %2852  ;;  %v2336_v48 = vmul.f32 %v2849_v41, %v2335_v5  ;;  %vm2313_vm11 = vcmp.eq.f32.partialorder %v2312_v23, 8.507059e+37 }
 0xd24   : > { %v2855_v56 = vpop.eup %2854  ;;  %v2351_v40 = vmul.f32 %v2851_v39, %v2350_v60  ;;  %v2274_v55 = vmul.f32 %v2853_v54, %v4340_v19  ;;  %vm2279_vm0 = vweird.f32 %v2853_v54  ;;  %v2330_v1 = vor.u32 1.1754944e-38, %v2329_v51 }
 0xd25   : > { %v2337_v27 = vadd.f32 %v2849_v41, %v2336_v48  ;;  %v2289_v63 = vmul.f32 %v2855_v56, %v4342_v10  ;;  %v2857_v18 = vpop.eup %2856  ;;  %vm2294_vm1 = vweird.f32 %v2855_v56  ;;  %vm2280_vm3 = vmor %vm2278_vm12, %vm2279_vm0  ;;  %vm2323_vm12 = vweird.f32 %v4356_v44 }
 0xd26   : > { %v2352_v0 = vadd.f32 %v2851_v39, %v2351_v40  ;;  %v2275_v3 = vsub.f32 1.0, %v2274_v55  ;;  %v2304_v38 = vmul.f32 %v2857_v18, %v4348_v34  ;;  %v2859_v29 = vpop.eup %2858  ;;  %vm2295_vm6 = vmor %vm2293_vm2, %vm2294_vm1  ;;  %vm2309_vm7 = vweird.f32 %v2857_v18 }
 0xd27   : > { %v2341_v43 = vsel %vm2340_vm14, %v2849_v41, %v2337_v27  ;;  %v2290_v46 = vsub.f32 1.0, %v2289_v63  ;;  %v2418_v16 = vpop.permute.xlu0 %2417  ;;  %v2319_v26 = vmul.f32 %v2859_v29, %v4356_v44 }
 0xd28   : > { %v2420_v11 = vpop.permute.xlu1 %2419  ;;  %v2346_v30 = vsel %vm4352_vm8, %v2345_v45, %v2341_v43  ;;  %v2356_v17 = vsel %vm2355_vm15, %v2851_v39, %v2352_v0  ;;  %v2276_v32 = vmul.f32 %v2853_v54, %v2275_v3  ;;  %2541 = vst.msk [vmem:[%s4292_s25 + $0x50] sm:$0xff] %vm2381_vm13, %v2418_v16  ;;  %v2305_v59 = vsub.f32 1.0, %v2304_v38 }
 0xd29   : > { %v2369_v36 = vmul.f32 %v2346_v30, %v4305_v50  ;;  %v2361_v25 = vsel %vm4358_vm10, %v2360_v13, %v2356_v17  ;;  %v2291_v58 = vmul.f32 %v2855_v56, %v2290_v46  ;;  %2542 = vst.msk [vmem:[%s4292_s25 + $0x58] sm:$0xff] %vm2381_vm13, %v2420_v11  ;;  %v2285_v50 = vor.u32 1.1754944e-38, %v2284_v61 }
 0xd2a   : > { %v2370_v20 = vmul.f32 %v2361_v25, %v4307_v21  ;;  %v2277_v47 = vadd.f32 %v2853_v54, %v2276_v32  ;;  %v2300_v21 = vor.u32 1.1754944e-38, %v2299_v14  ;;  %v2306_v10 = vmul.f32 %v2857_v18, %v2305_v59 }
 0xd2b   : > { %2549 = vst.msk [vmem:[%s4292_s25 + $0x70] sm:$0xff] %vm2381_vm13, %v2369_v36  ;;  %v2292_v49 = vadd.f32 %v2855_v56, %v2291_v58  ;;  %v2320_v41 = vsub.f32 1.0, %v2319_v26  ;;  %vm2308_vm8 = vweird.f32 %v4348_v34  ;;  %v2315_v39 = vor.u32 1.1754944e-38, %v2314_v12 }
 0xd2c   : > { %2550 = vst.msk [vmem:[%s4292_s25 + $0x78] sm:$0xff] %vm2381_vm13, %v2370_v20  ;;  %v2281_v22 = vsel %vm2280_vm3, %v2853_v54, %v2277_v47  ;;  %v2307_v9 = vadd.f32 %v2857_v18, %v2306_v10  ;;  %vm2310_vm9 = vmor %vm2308_vm8, %vm2309_vm7  ;;  %vm2324_vm10 = vweird.f32 %v2859_v29 }
 0xd2d   : > { %v2286_v52 = vsel %vm2283_vm4, %v2285_v50, %v2281_v22  ;;  %v2296_v57 = vsel %vm2295_vm6, %v2855_v56, %v2292_v49  ;;  %v2321_v24 = vmul.f32 %v2859_v29, %v2320_v41  ;;  %vm2325_vm14 = vmor %vm2323_vm12, %vm2324_vm10 }
 0xd2e   : > { %v2301_v19 = vsel %vm2298_vm5, %v2300_v21, %v2296_v57  ;;  %v2365_v35 = vmul.f32 %v2286_v52, %v4314_v28  ;;  %v2327_v28 = vand.u32 2147483647, %v4356_v44 }
 0xd2f   : > { %v2366_v53 = vmul.f32 %v2301_v19, %v4316_v33  ;;  %v2311_v33 = vsel %vm2310_vm9, %v2857_v18, %v2307_v9  ;;  %v2322_v7 = vadd.f32 %v2859_v29, %v2321_v24 }
 0xd30   : > { %2545 = vst.msk [vmem:[%s4292_s25 + $0x60] sm:$0xff] %vm2381_vm13, %v2365_v35  ;;  %v2316_v4 = vsel %vm2313_vm11, %v2315_v39, %v2311_v33  ;;  %vm2328_vm15 = vcmp.eq.f32.partialorder %v2327_v28, 8.507059e+37 }
 0xd31   : > { %2546 = vst.msk [vmem:[%s4292_s25 + $0x68] sm:$0xff] %vm2381_vm13, %v2366_v53  ;;  %v2367_v2 = vmul.f32 %v2316_v4, %v4319_v62  ;;  %v2326_v15 = vsel %vm2325_vm14, %v2859_v29, %v2322_v7 }
 0xd32   : > { %v2331_v5 = vsel %vm2328_vm15, %v2330_v1, %v2326_v15 }
 0xd33   : > { %2547 = vst.msk [vmem:[%s4292_s25 + $0x30] sm:$0xff] %vm2381_vm13, %v2367_v2  ;;  %v2368_v34 = vmul.f32 %v2331_v5, %v4321_v42 }
 0xd35   : > { %2548 = vst.msk [vmem:[%s4292_s25 + $0x38] sm:$0xff] %vm2381_vm13, %v2368_v34 }
 0xd36   : > { %2895 = shalt.err (!%p2892_p3)
}
 0xd37   : > { %s2946_s15 = smov 128   ;;  %s2947_s6 = smov 8  }
 0xd38   : > { %2758 = dma.vmem_to_hbm [thread:$0]  (%p3016_p5), %s2452_s7, 2048, %s2454_s16, %s2439_s30, %s2946_s15, %s2946_s15, %s2947_s6  }
 0xd39 PF: > { %p2764_p4 = scmp.ge.s32.totalorder %s2930_s21, 2  ;;  %s2468_s25 = sand.u32 1, %s2918_s18  }
 0xd3a   : > { %s2469_s10 = scalar_lea.sflag [#allocation4], %s2468_s25 }
 0xd3b   : > { %p2761_p7 = pnand %p2764_p4, %p3020_p6 }
 0xd3d   : > { %p2762_p8 = pneg %p2761_p7 }
 0xd3f   : > { %2913 = dma.done.wait (%p2762_p8), %s2469_s10, 2048  }
 0xd40   : > { %2915 = vsyncadd (%p2762_p8), %s2469_s10, 4294965248  ;;  %p15_p9 = scmp.ge.s32.totalorder %s3003_s24, 4   ;;  %s4503_s18 = smov %s2922_s19 }
 0xd41   : > { %s4504_s19 = smov %s2926_s20  ;;  %s4505_s20 = smov %s3014_s27 }
 0xd42   : > { %s4506_s21 = smov %s3003_s24  ;;  %17 = sbr.rel (!%p15_p9) target bundleno = 3 (0x3), region = 85 }
 0xd47   :  { %2475 = vsyncpa [#allocation4], 1 }
 0xd48   :  { %2477 = vsyncpa [#allocation4 + $0x1], 1 }

</bundles_post_ra>
